<compile_context>
chip_gen: v7x
topology: tpu7x:2x2x1
jax: 0.10.0
libtpu: 0.0.40
codegen_flags: <defaults>
</compile_context>

<pallas_src>
import functools
import math

import jax
import jax.numpy as jnp
from jax.experimental import pallas as pl
from jax.experimental.pallas import tpu as pltpu


# ----------------------------------------------------------------------------- kernel


def fused_transformer_kernel(idx_ref,                       # (B, S) int32 in SMEM
                             pos_ref, emb_ref,              # (P, D), (V, D) f32 VMEM
                             wqkv_ref, bqkv_ref, wo_ref, bo_ref,
                             w1_ref, b1_ref, w2_ref, b2_ref,
                             g1_ref, be1_ref, g2_ref, be2_ref,
                             wout_ref, bout_ref,
                             o_ref,
                             *, batch, seq, num_heads, num_layers):
    """Embedding gather + both encoder layers + output head, one invocation."""
    B, S = batch, seq
    D = emb_ref.shape[1]
    H = num_heads
    hd = D // H
    f32, bf16 = jnp.float32, jnp.bfloat16

    # --- fused embedding gather (indices from SMEM, dynamic row slices from VMEM) ---
    rows = []
    for b in range(B):
        for s in range(S):
            rows.append(emb_ref[pl.ds(idx_ref[b, s], 1), :])        # (1, D)
    x = jnp.concatenate(rows, axis=0).astype(f32)                   # (B*S, D)
    # batched positional encoding: x[b, s] += pos[s]
    x = x + jnp.tile(pos_ref[0:S, :].astype(f32), (B, 1))

    for li in range(num_layers):                    # static unroll; weights VMEM-resident
        wqkv = wqkv_ref[li]                         # (D, 3D) bf16, pre-transposed, q-scale folded
        bqkv = bqkv_ref[li]                         # (1, 3D) f32
        wo = wo_ref[li]                             # (D, D)  bf16, pre-transposed
        bo = bo_ref[li]                             # (1, D)  f32

        # --- fused Q/K/V projection: one MXU push, bf16 operands, f32 accumulation ---
        qkv = jnp.dot(x.astype(bf16), wqkv, preferred_element_type=f32) + bqkv
        qkv = qkv.reshape(B, S, 3 * D)
        q = qkv[:, :, :D]                           # 1/sqrt(hd) already folded into wqkv/bqkv
        k = qkv[:, :, D:2 * D]
        v = qkv[:, :, 2 * D:]

        # --- multi-head attention, batched over B; small static head loop ---
        ctx_heads = []
        for h in range(H):
            sl = slice(h * hd, (h + 1) * hd)
            s_hk = jnp.einsum('bqd,bkd->bqk',
                              q[:, :, sl].astype(bf16), k[:, :, sl].astype(bf16),
                              preferred_element_type=f32)           # (B, S, S)
            s_hk = s_hk - jnp.max(s_hk, axis=-1, keepdims=True)
            p = jnp.exp(s_hk)
            p = p * pl.reciprocal(jnp.sum(p, axis=-1, keepdims=True), approx=True)
            ctx_heads.append(jnp.einsum('bqk,bkd->bqd',
                                        p.astype(bf16), v[:, :, sl].astype(bf16),
                                        preferred_element_type=f32))  # (B, S, hd)
        # single out-projection dot instead of H tiny K=hd dots
        ctx = jnp.concatenate(ctx_heads, axis=-1).reshape(B * S, D)
        attn = jnp.dot(ctx.astype(bf16), wo, preferred_element_type=f32) + bo

        # --- residual + LayerNorm1 (post-norm, eps=1e-5), f32 math ---
        h1 = x + attn
        mu1 = jnp.mean(h1, axis=-1, keepdims=True)
        var1 = jnp.mean((h1 - mu1) ** 2, axis=-1, keepdims=True)
        h1 = (h1 - mu1) * jax.lax.rsqrt(var1 + 1e-5) * g1_ref[li] + be1_ref[li]

        # --- feed-forward (ReLU); dropout = identity at inference ---
        ff = jnp.dot(h1.astype(bf16), w1_ref[li], preferred_element_type=f32) + b1_ref[li]
        ff = jnp.maximum(ff, 0.0)
        ff = jnp.dot(ff.astype(bf16), w2_ref[li], preferred_element_type=f32) + b2_ref[li]

        # --- residual + LayerNorm2 ---
        h2 = h1 + ff
        mu2 = jnp.mean(h2, axis=-1, keepdims=True)
        var2 = jnp.mean((h2 - mu2) ** 2, axis=-1, keepdims=True)
        x = (h2 - mu2) * jax.lax.rsqrt(var2 + 1e-5) * g2_ref[li] + be2_ref[li]

    # --- output head: mean over seq BEFORE the affine Linear (identical result) ---
    xm = jnp.mean(x.reshape(B, S, D), axis=1)                                   # (B, D)
    logits = (jnp.dot(xm.astype(bf16), wout_ref[...], preferred_element_type=f32)
              + bout_ref[...])
    logits = logits - jnp.max(logits, axis=-1, keepdims=True)
    e = jnp.exp(logits)
    # exact f32 divide here so the returned probabilities sum to 1 at f32 precision
    o_ref[...] = (e / jnp.sum(e, axis=-1, keepdims=True)).astype(o_ref.dtype)


# ----------------------------------------------------------------------------- wrappers


def run_fused_model(indices, kp, num_heads, num_layers):
    """Single gridless pallas_call: entire forward in one dispatch."""
    B, S = indices.shape
    O = kp['wout'].shape[1]
    args = (indices, kp['pos_embedding'], kp['char_embedding'],
            kp['wqkv'], kp['bqkv'], kp['wo'], kp['bo'],
            kp['w1'], kp['b1'], kp['w2'], kp['b2'],
            kp['g1'], kp['be1'], kp['g2'], kp['be2'],
            kp['wout'], kp['bout'])
    in_specs = ([pl.BlockSpec(memory_space=pltpu.MemorySpace.SMEM)] +
                [pl.BlockSpec(memory_space=pltpu.MemorySpace.VMEM)] * (len(args) - 1))
    return pl.pallas_call(
        functools.partial(fused_transformer_kernel, batch=B, seq=S,
                          num_heads=num_heads, num_layers=num_layers),
        out_shape=jax.ShapeDtypeStruct((B, O), jnp.float32),
        in_specs=in_specs,
        out_specs=pl.BlockSpec(memory_space=pltpu.MemorySpace.VMEM),
    )(*args)


def transformer_encoder_model(kernel_params, indices, num_heads, num_layers):
    # Everything (gather, positional add, both layers, head) runs inside the kernel.
    return run_fused_model(indices, kernel_params, num_heads, num_layers)


# ----------------------------------------------------------------------------- params


def init_params(key, vocab_size, d_model, num_layers, num_heads,
                num_positions=20, dim_feedforward=2048, output_dim=2):
    keys = jax.random.split(key, 4 + num_layers)
    params = {
        'char_embedding': 0.02 * jax.random.normal(keys[0], (vocab_size, d_model), jnp.float32),
        'pos_embedding':  0.02 * jax.random.normal(keys[1], (num_positions, d_model), jnp.float32),
        'wout': 0.02 * jax.random.normal(keys[2], (output_dim, d_model), jnp.float32),
        'bout': jnp.zeros((1, output_dim), jnp.float32),
        'layers': [],
    }
    for li in range(num_layers):
        lk = jax.random.split(keys[4 + li], 6)
        layer = {
            'wq': 0.02 * jax.random.normal(lk[0], (d_model, d_model), jnp.float32),
            'wk': 0.02 * jax.random.normal(lk[1], (d_model, d_model), jnp.float32),
            'wv': 0.02 * jax.random.normal(lk[2], (d_model, d_model), jnp.float32),
            'bq': jnp.zeros((1, d_model), jnp.float32),
            'bk': jnp.zeros((1, d_model), jnp.float32),
            'bv': jnp.zeros((1, d_model), jnp.float32),
            'wo': 0.02 * jax.random.normal(lk[3], (d_model, d_model), jnp.float32),
            'bo': jnp.zeros((1, d_model), jnp.float32),
            'w1': 0.02 * jax.random.normal(lk[4], (dim_feedforward, d_model), jnp.float32),
            'b1': jnp.zeros((1, dim_feedforward), jnp.float32),
            'w2': 0.02 * jax.random.normal(lk[5], (d_model, dim_feedforward), jnp.float32),
            'b2': jnp.zeros((1, d_model), jnp.float32),
            'g1': jnp.ones((1, d_model), jnp.float32),
            'be1': jnp.zeros((1, d_model), jnp.float32),
            'g2': jnp.ones((1, d_model), jnp.float32),
            'be2': jnp.zeros((1, d_model), jnp.float32),
        }
        params['layers'].append(layer)
    return params


def prepare_packed_params(params, num_heads):
    """Pre-transpose to (in, out), fuse Q/K/V, fold attention scale, stack layers (f32)."""
    d_model = params['char_embedding'].shape[1]
    hd = d_model // num_heads
    scale = 1.0 / math.sqrt(hd)

    keys = ('wqkv', 'bqkv', 'wo', 'bo', 'w1', 'b1', 'w2', 'b2', 'g1', 'be1', 'g2', 'be2')
    acc = {k: [] for k in keys}
    for layer in params['layers']:
        acc['wqkv'].append(jnp.concatenate(
            [layer['wq'].T * scale, layer['wk'].T, layer['wv'].T], axis=1))   # (D, 3D)
        acc['bqkv'].append(jnp.concatenate(
            [layer['bq'] * scale, layer['bk'], layer['bv']], axis=1))         # (1, 3D)
        acc['wo'].append(layer['wo'].T)                                       # (D, D)
        acc['bo'].append(layer['bo'])
        acc['w1'].append(layer['w1'].T)                                       # (D, F) lane-dense
        acc['b1'].append(layer['b1'])
        acc['w2'].append(layer['w2'].T)                                       # (F, D)
        acc['b2'].append(layer['b2'])
        acc['g1'].append(layer['g1']); acc['be1'].append(layer['be1'])
        acc['g2'].append(layer['g2']); acc['be2'].append(layer['be2'])

    packed = {k: jnp.stack(v, axis=0) for k, v in acc.items()}                # leading layer axis
    packed['wout'] = params['wout'].T                                         # (D, O)
    packed['bout'] = params['bout']                                           # (1, O)
    packed['char_embedding'] = params['char_embedding']
    packed['pos_embedding'] = params['pos_embedding']
    return packed


def cast_for_kernel(packed, dtype=jnp.bfloat16):
    """Host-side bf16 cast of the matmul weights (halves the dominant weight DMA)."""
    out = dict(packed)
    for k in ('wqkv', 'wo', 'w1', 'w2', 'wout'):
        out[k] = packed[k].astype(dtype)
    return out


# ----------------------------------------------------------------------------- pure-JAX reference


def _ln(x, g, b, eps=1e-5):
    mu = jnp.mean(x, axis=-1, keepdims=True)
    var = jnp.mean((x - mu) ** 2, axis=-1, keepdims=True)
    return (x - mu) * jax.lax.rsqrt(var + eps) * g + b


def reference_forward(packed, indices, num_heads, num_layers):
    """Straight f32 transcription of the PyTorch forward (linear-then-mean head)."""
    B, S = indices.shape
    x = packed['char_embedding'][indices] + packed['pos_embedding'][None, :S, :]
    D = x.shape[-1]
    H, hd = num_heads, D // num_heads
    x = x.reshape(B * S, D)
    for li in range(num_layers):
        qkv = x @ packed['wqkv'][li] + packed['bqkv'][li]
        q, k, v = jnp.split(qkv.reshape(B, S, 3 * D), 3, axis=-1)
        qh = q.reshape(B, S, H, hd).transpose(0, 2, 1, 3)
        kh = k.reshape(B, S, H, hd).transpose(0, 2, 1, 3)
        vh = v.reshape(B, S, H, hd).transpose(0, 2, 1, 3)
        p = jax.nn.softmax(jnp.einsum('bhqd,bhkd->bhqk', qh, kh), axis=-1)
        ctx = jnp.einsum('bhqk,bhkd->bhqd', p, vh).transpose(0, 2, 1, 3).reshape(B * S, D)
        attn = ctx @ packed['wo'][li] + packed['bo'][li]
        h1 = _ln(x + attn, packed['g1'][li], packed['be1'][li])
        ff = jnp.maximum(h1 @ packed['w1'][li] + packed['b1'][li], 0.0)
        ff = ff @ packed['w2'][li] + packed['b2'][li]
        x = _ln(h1 + ff, packed['g2'][li], packed['be2'][li])
    logits = (x.reshape(B, S, D) @ packed['wout'] + packed['bout']).mean(axis=1)
    return jax.nn.softmax(logits, axis=-1)


# ----------------------------------------------------------------------------- main


if __name__ == "__main__":
    vocab_size, d_model, num_layers, num_heads = 50, 32, 2, 4
    num_positions, output_dim = 20, 2
    batch, seq = 2, 8

    key = jax.random.PRNGKey(0)
    pkey, ikey = jax.random.split(key)
    params = init_params(pkey, vocab_size, d_model, num_layers, num_heads,
                         num_positions=num_positions, output_dim=output_dim)
    packed_f32 = prepare_packed_params(params, num_heads)        # f32 (used by reference)
    kernel_params = cast_for_kernel(packed_f32)                  # bf16 matmul weights (kernel)
    indices = jax.random.randint(ikey, (batch, seq), 0, vocab_size, dtype=jnp.int32)

    probs = transformer_encoder_model(kernel_params, indices, num_heads, num_layers)
    probs = jax.block_until_ready(probs)

    ref = jax.block_until_ready(reference_forward(packed_f32, indices, num_heads, num_layers))

    assert probs.shape == (batch, output_dim)
    assert bool(jnp.all(jnp.isfinite(probs)))
    assert bool(jnp.allclose(jnp.sum(probs, axis=-1), 1.0, atol=1e-4))
    # bf16 weights/operands + approx reciprocal in attention -> compare vs f32 ref with
    # a loosened (but still tight for probabilities) tolerance.
    assert bool(jnp.allclose(probs, ref, atol=1e-2, rtol=1e-2))
    print("KERNEL_OK")
</pallas_src>

<mosaic_0001>
module attributes {stable_mosaic.version = 11 : i64} {
  func.func @fused_transformer_kernel(%arg0: memref<2x8xi32, #tpu.memory_space<smem>>, %arg1: memref<20x32xf32, #tpu.memory_space<vmem>>, %arg2: memref<50x32xf32, #tpu.memory_space<vmem>>, %arg3: memref<2x32x96xbf16, #tpu.memory_space<vmem>>, %arg4: memref<2x1x96xf32, #tpu.memory_space<vmem>>, %arg5: memref<2x32x32xbf16, #tpu.memory_space<vmem>>, %arg6: memref<2x1x32xf32, #tpu.memory_space<vmem>>, %arg7: memref<2x32x2048xbf16, #tpu.memory_space<vmem>>, %arg8: memref<2x1x2048xf32, #tpu.memory_space<vmem>>, %arg9: memref<2x2048x32xbf16, #tpu.memory_space<vmem>>, %arg10: memref<2x1x32xf32, #tpu.memory_space<vmem>>, %arg11: memref<2x1x32xf32, #tpu.memory_space<vmem>>, %arg12: memref<2x1x32xf32, #tpu.memory_space<vmem>>, %arg13: memref<2x1x32xf32, #tpu.memory_space<vmem>>, %arg14: memref<2x1x32xf32, #tpu.memory_space<vmem>>, %arg15: memref<32x2xbf16, #tpu.memory_space<vmem>>, %arg16: memref<1x2xf32, #tpu.memory_space<vmem>>, %arg17: memref<2x2xf32, #tpu.memory_space<vmem>>) attributes {dimension_semantics = [], scalar_prefetch = 0 : i64, scratch_operands = 0 : i64, tpu.core_type = #tpu.core_type<tc>} {
    %c0 = arith.constant 0 : index
    %c0_0 = arith.constant 0 : index
    %0 = memref.load %arg0[%c0, %c0_0] : memref<2x8xi32, #tpu.memory_space<smem>>
    %1 = arith.index_cast %0 : i32 to index
    %c0_1 = arith.constant 0 : index
    %2 = vector.load %arg2[%1, %c0_1] : memref<50x32xf32, #tpu.memory_space<vmem>>, vector<1x32xf32>
    %c0_2 = arith.constant 0 : index
    %c1 = arith.constant 1 : index
    %3 = memref.load %arg0[%c0_2, %c1] : memref<2x8xi32, #tpu.memory_space<smem>>
    %4 = arith.index_cast %3 : i32 to index
    %c0_3 = arith.constant 0 : index
    %5 = vector.load %arg2[%4, %c0_3] : memref<50x32xf32, #tpu.memory_space<vmem>>, vector<1x32xf32>
    %c0_4 = arith.constant 0 : index
    %c2 = arith.constant 2 : index
    %6 = memref.load %arg0[%c0_4, %c2] : memref<2x8xi32, #tpu.memory_space<smem>>
    %7 = arith.index_cast %6 : i32 to index
    %c0_5 = arith.constant 0 : index
    %8 = vector.load %arg2[%7, %c0_5] : memref<50x32xf32, #tpu.memory_space<vmem>>, vector<1x32xf32>
    %c0_6 = arith.constant 0 : index
    %c3 = arith.constant 3 : index
    %9 = memref.load %arg0[%c0_6, %c3] : memref<2x8xi32, #tpu.memory_space<smem>>
    %10 = arith.index_cast %9 : i32 to index
    %c0_7 = arith.constant 0 : index
    %11 = vector.load %arg2[%10, %c0_7] : memref<50x32xf32, #tpu.memory_space<vmem>>, vector<1x32xf32>
    %c0_8 = arith.constant 0 : index
    %c4 = arith.constant 4 : index
    %12 = memref.load %arg0[%c0_8, %c4] : memref<2x8xi32, #tpu.memory_space<smem>>
    %13 = arith.index_cast %12 : i32 to index
    %c0_9 = arith.constant 0 : index
    %14 = vector.load %arg2[%13, %c0_9] : memref<50x32xf32, #tpu.memory_space<vmem>>, vector<1x32xf32>
    %c0_10 = arith.constant 0 : index
    %c5 = arith.constant 5 : index
    %15 = memref.load %arg0[%c0_10, %c5] : memref<2x8xi32, #tpu.memory_space<smem>>
    %16 = arith.index_cast %15 : i32 to index
    %c0_11 = arith.constant 0 : index
    %17 = vector.load %arg2[%16, %c0_11] : memref<50x32xf32, #tpu.memory_space<vmem>>, vector<1x32xf32>
    %c0_12 = arith.constant 0 : index
    %c6 = arith.constant 6 : index
    %18 = memref.load %arg0[%c0_12, %c6] : memref<2x8xi32, #tpu.memory_space<smem>>
    %19 = arith.index_cast %18 : i32 to index
    %c0_13 = arith.constant 0 : index
    %20 = vector.load %arg2[%19, %c0_13] : memref<50x32xf32, #tpu.memory_space<vmem>>, vector<1x32xf32>
    %c0_14 = arith.constant 0 : index
    %c7 = arith.constant 7 : index
    %21 = memref.load %arg0[%c0_14, %c7] : memref<2x8xi32, #tpu.memory_space<smem>>
    %22 = arith.index_cast %21 : i32 to index
    %c0_15 = arith.constant 0 : index
    %23 = vector.load %arg2[%22, %c0_15] : memref<50x32xf32, #tpu.memory_space<vmem>>, vector<1x32xf32>
    %c1_16 = arith.constant 1 : index
    %c0_17 = arith.constant 0 : index
    %24 = memref.load %arg0[%c1_16, %c0_17] : memref<2x8xi32, #tpu.memory_space<smem>>
    %25 = arith.index_cast %24 : i32 to index
    %c0_18 = arith.constant 0 : index
    %26 = vector.load %arg2[%25, %c0_18] : memref<50x32xf32, #tpu.memory_space<vmem>>, vector<1x32xf32>
    %c1_19 = arith.constant 1 : index
    %c1_20 = arith.constant 1 : index
    %27 = memref.load %arg0[%c1_19, %c1_20] : memref<2x8xi32, #tpu.memory_space<smem>>
    %28 = arith.index_cast %27 : i32 to index
    %c0_21 = arith.constant 0 : index
    %29 = vector.load %arg2[%28, %c0_21] : memref<50x32xf32, #tpu.memory_space<vmem>>, vector<1x32xf32>
    %c1_22 = arith.constant 1 : index
    %c2_23 = arith.constant 2 : index
    %30 = memref.load %arg0[%c1_22, %c2_23] : memref<2x8xi32, #tpu.memory_space<smem>>
    %31 = arith.index_cast %30 : i32 to index
    %c0_24 = arith.constant 0 : index
    %32 = vector.load %arg2[%31, %c0_24] : memref<50x32xf32, #tpu.memory_space<vmem>>, vector<1x32xf32>
    %c1_25 = arith.constant 1 : index
    %c3_26 = arith.constant 3 : index
    %33 = memref.load %arg0[%c1_25, %c3_26] : memref<2x8xi32, #tpu.memory_space<smem>>
    %34 = arith.index_cast %33 : i32 to index
    %c0_27 = arith.constant 0 : index
    %35 = vector.load %arg2[%34, %c0_27] : memref<50x32xf32, #tpu.memory_space<vmem>>, vector<1x32xf32>
    %c1_28 = arith.constant 1 : index
    %c4_29 = arith.constant 4 : index
    %36 = memref.load %arg0[%c1_28, %c4_29] : memref<2x8xi32, #tpu.memory_space<smem>>
    %37 = arith.index_cast %36 : i32 to index
    %c0_30 = arith.constant 0 : index
    %38 = vector.load %arg2[%37, %c0_30] : memref<50x32xf32, #tpu.memory_space<vmem>>, vector<1x32xf32>
    %c1_31 = arith.constant 1 : index
    %c5_32 = arith.constant 5 : index
    %39 = memref.load %arg0[%c1_31, %c5_32] : memref<2x8xi32, #tpu.memory_space<smem>>
    %40 = arith.index_cast %39 : i32 to index
    %c0_33 = arith.constant 0 : index
    %41 = vector.load %arg2[%40, %c0_33] : memref<50x32xf32, #tpu.memory_space<vmem>>, vector<1x32xf32>
    %c1_34 = arith.constant 1 : index
    %c6_35 = arith.constant 6 : index
    %42 = memref.load %arg0[%c1_34, %c6_35] : memref<2x8xi32, #tpu.memory_space<smem>>
    %43 = arith.index_cast %42 : i32 to index
    %c0_36 = arith.constant 0 : index
    %44 = vector.load %arg2[%43, %c0_36] : memref<50x32xf32, #tpu.memory_space<vmem>>, vector<1x32xf32>
    %c1_37 = arith.constant 1 : index
    %c7_38 = arith.constant 7 : index
    %45 = memref.load %arg0[%c1_37, %c7_38] : memref<2x8xi32, #tpu.memory_space<smem>>
    %46 = arith.index_cast %45 : i32 to index
    %c0_39 = arith.constant 0 : index
    %47 = vector.load %arg2[%46, %c0_39] : memref<50x32xf32, #tpu.memory_space<vmem>>, vector<1x32xf32>
    %48 = tpu.concatenate %2, %5, %8, %11, %14, %17, %20, %23, %26, %29, %32, %35, %38, %41, %44, %47 in 0 : vector<1x32xf32>, vector<1x32xf32>, vector<1x32xf32>, vector<1x32xf32>, vector<1x32xf32>, vector<1x32xf32>, vector<1x32xf32>, vector<1x32xf32>, vector<1x32xf32>, vector<1x32xf32>, vector<1x32xf32>, vector<1x32xf32>, vector<1x32xf32>, vector<1x32xf32>, vector<1x32xf32>, vector<1x32xf32> -> vector<16x32xf32>
    %c0_40 = arith.constant 0 : index
    %c0_41 = arith.constant 0 : index
    %49 = vector.load %arg1[%c0_40, %c0_41] : memref<20x32xf32, #tpu.memory_space<vmem>>, vector<8x32xf32>
    %50 = tpu.concatenate %49, %49 in 0 : vector<8x32xf32>, vector<8x32xf32> -> vector<16x32xf32>
    %51 = arith.addf %48, %50 : vector<16x32xf32>
    %c0_42 = arith.constant 0 : index
    %c0_43 = arith.constant 0 : index
    %c0_44 = arith.constant 0 : index
    %52 = vector.load %arg3[%c0_42, %c0_43, %c0_44] : memref<2x32x96xbf16, #tpu.memory_space<vmem>>, vector<1x32x96xbf16>
    %53 = vector.shape_cast %52 : vector<1x32x96xbf16> to vector<32x96xbf16>
    %c0_45 = arith.constant 0 : index
    %c0_46 = arith.constant 0 : index
    %c0_47 = arith.constant 0 : index
    %54 = vector.load %arg4[%c0_45, %c0_46, %c0_47] : memref<2x1x96xf32, #tpu.memory_space<vmem>>, vector<1x1x96xf32>
    %55 = vector.shape_cast %54 : vector<1x1x96xf32> to vector<1x96xf32>
    %c0_48 = arith.constant 0 : index
    %c0_49 = arith.constant 0 : index
    %c0_50 = arith.constant 0 : index
    %56 = vector.load %arg5[%c0_48, %c0_49, %c0_50] : memref<2x32x32xbf16, #tpu.memory_space<vmem>>, vector<1x32x32xbf16>
    %57 = vector.shape_cast %56 : vector<1x32x32xbf16> to vector<32x32xbf16>
    %c0_51 = arith.constant 0 : index
    %c0_52 = arith.constant 0 : index
    %c0_53 = arith.constant 0 : index
    %58 = vector.load %arg6[%c0_51, %c0_52, %c0_53] : memref<2x1x32xf32, #tpu.memory_space<vmem>>, vector<1x1x32xf32>
    %59 = vector.shape_cast %58 : vector<1x1x32xf32> to vector<1x32xf32>
    %60 = arith.truncf %51 : vector<16x32xf32> to vector<16x32xbf16>
    %cst = arith.constant dense<0.000000e+00> : vector<16x96xf32>
    %61 = tpu.matmul %60, %53, %cst {dimension_numbers = #tpu.dot_dimension_numbers<[1], [0], [0], [1], [0, 0, 1, 1], [], []>} : vector<16x32xbf16>, vector<32x96xbf16>, vector<16x96xf32> -> vector<16x96xf32>
    %62 = vector.broadcast %55 : vector<1x96xf32> to vector<16x96xf32>
    %63 = arith.addf %61, %62 : vector<16x96xf32>
    %64 = vector.shape_cast %63 : vector<16x96xf32> to vector<2x8x96xf32>
    %65 = vector.extract_strided_slice %64 {offsets = [0, 0, 0], sizes = [2, 8, 32], strides = [1, 1, 1]} : vector<2x8x96xf32> to vector<2x8x32xf32>
    %66 = vector.extract_strided_slice %64 {offsets = [0, 0, 32], sizes = [2, 8, 32], strides = [1, 1, 1]} : vector<2x8x96xf32> to vector<2x8x32xf32>
    %67 = vector.extract_strided_slice %64 {offsets = [0, 0, 64], sizes = [2, 8, 32], strides = [1, 1, 1]} : vector<2x8x96xf32> to vector<2x8x32xf32>
    %68 = vector.extract_strided_slice %65 {offsets = [0, 0, 0], sizes = [2, 8, 8], strides = [1, 1, 1]} : vector<2x8x32xf32> to vector<2x8x8xf32>
    %69 = arith.truncf %68 : vector<2x8x8xf32> to vector<2x8x8xbf16>
    %70 = vector.extract_strided_slice %66 {offsets = [0, 0, 0], sizes = [2, 8, 8], strides = [1, 1, 1]} : vector<2x8x32xf32> to vector<2x8x8xf32>
    %71 = arith.truncf %70 : vector<2x8x8xf32> to vector<2x8x8xbf16>
    "tpu.trace_start"() <{level = 10 : i32, message = "bqd,bkd->bqk"}> : () -> ()
    %cst_54 = arith.constant dense<0.000000e+00> : vector<2x8x8xf32>
    %72 = tpu.matmul %69, %71, %cst_54 {dimension_numbers = #tpu.dot_dimension_numbers<[2], [2], [1], [1], [0, 0, 0, 1, 1, 1], [0], [0]>} : vector<2x8x8xbf16>, vector<2x8x8xbf16>, vector<2x8x8xf32> -> vector<2x8x8xf32>
    "tpu.trace_stop"() : () -> ()
    %cst_55 = arith.constant dense<0xFF800000> : vector<2x8xf32>
    %73 = vector.multi_reduction <maximumf>, %72, %cst_55 [2] : vector<2x8x8xf32> to vector<2x8xf32>
    %74 = vector.shape_cast %73 : vector<2x8xf32> to vector<2x8x1xf32>
    %75 = vector.broadcast %74 : vector<2x8x1xf32> to vector<2x8x8xf32>
    %76 = arith.subf %72, %75 : vector<2x8x8xf32>
    %77 = math.exp %76 : vector<2x8x8xf32>
    %cst_56 = arith.constant dense<0.000000e+00> : vector<2x8xf32>
    %78 = vector.multi_reduction <add>, %77, %cst_56 [2] : vector<2x8x8xf32> to vector<2x8xf32>
    %79 = vector.shape_cast %78 : vector<2x8xf32> to vector<2x8x1xf32>
    %80 = tpu.reciprocal %79 {approx = true} : vector<2x8x1xf32> -> vector<2x8x1xf32>
    %81 = vector.broadcast %80 : vector<2x8x1xf32> to vector<2x8x8xf32>
    %82 = arith.mulf %77, %81 : vector<2x8x8xf32>
    %83 = arith.truncf %82 : vector<2x8x8xf32> to vector<2x8x8xbf16>
    %84 = vector.extract_strided_slice %67 {offsets = [0, 0, 0], sizes = [2, 8, 8], strides = [1, 1, 1]} : vector<2x8x32xf32> to vector<2x8x8xf32>
    %85 = arith.truncf %84 : vector<2x8x8xf32> to vector<2x8x8xbf16>
    "tpu.trace_start"() <{level = 10 : i32, message = "bqk,bkd->bqd"}> : () -> ()
    %cst_57 = arith.constant dense<0.000000e+00> : vector<2x8x8xf32>
    %86 = tpu.matmul %83, %85, %cst_57 {dimension_numbers = #tpu.dot_dimension_numbers<[2], [1], [1], [2], [0, 0, 0, 1, 1, 2], [0], [0]>} : vector<2x8x8xbf16>, vector<2x8x8xbf16>, vector<2x8x8xf32> -> vector<2x8x8xf32>
    "tpu.trace_stop"() : () -> ()
    %87 = vector.extract_strided_slice %65 {offsets = [0, 0, 8], sizes = [2, 8, 8], strides = [1, 1, 1]} : vector<2x8x32xf32> to vector<2x8x8xf32>
    %88 = arith.truncf %87 : vector<2x8x8xf32> to vector<2x8x8xbf16>
    %89 = vector.extract_strided_slice %66 {offsets = [0, 0, 8], sizes = [2, 8, 8], strides = [1, 1, 1]} : vector<2x8x32xf32> to vector<2x8x8xf32>
    %90 = arith.truncf %89 : vector<2x8x8xf32> to vector<2x8x8xbf16>
    "tpu.trace_start"() <{level = 10 : i32, message = "bqd,bkd->bqk"}> : () -> ()
    %cst_58 = arith.constant dense<0.000000e+00> : vector<2x8x8xf32>
    %91 = tpu.matmul %88, %90, %cst_58 {dimension_numbers = #tpu.dot_dimension_numbers<[2], [2], [1], [1], [0, 0, 0, 1, 1, 1], [0], [0]>} : vector<2x8x8xbf16>, vector<2x8x8xbf16>, vector<2x8x8xf32> -> vector<2x8x8xf32>
    "tpu.trace_stop"() : () -> ()
    %cst_59 = arith.constant dense<0xFF800000> : vector<2x8xf32>
    %92 = vector.multi_reduction <maximumf>, %91, %cst_59 [2] : vector<2x8x8xf32> to vector<2x8xf32>
    %93 = vector.shape_cast %92 : vector<2x8xf32> to vector<2x8x1xf32>
    %94 = vector.broadcast %93 : vector<2x8x1xf32> to vector<2x8x8xf32>
    %95 = arith.subf %91, %94 : vector<2x8x8xf32>
    %96 = math.exp %95 : vector<2x8x8xf32>
    %cst_60 = arith.constant dense<0.000000e+00> : vector<2x8xf32>
    %97 = vector.multi_reduction <add>, %96, %cst_60 [2] : vector<2x8x8xf32> to vector<2x8xf32>
    %98 = vector.shape_cast %97 : vector<2x8xf32> to vector<2x8x1xf32>
    %99 = tpu.reciprocal %98 {approx = true} : vector<2x8x1xf32> -> vector<2x8x1xf32>
    %100 = vector.broadcast %99 : vector<2x8x1xf32> to vector<2x8x8xf32>
    %101 = arith.mulf %96, %100 : vector<2x8x8xf32>
    %102 = arith.truncf %101 : vector<2x8x8xf32> to vector<2x8x8xbf16>
    %103 = vector.extract_strided_slice %67 {offsets = [0, 0, 8], sizes = [2, 8, 8], strides = [1, 1, 1]} : vector<2x8x32xf32> to vector<2x8x8xf32>
    %104 = arith.truncf %103 : vector<2x8x8xf32> to vector<2x8x8xbf16>
    "tpu.trace_start"() <{level = 10 : i32, message = "bqk,bkd->bqd"}> : () -> ()
    %cst_61 = arith.constant dense<0.000000e+00> : vector<2x8x8xf32>
    %105 = tpu.matmul %102, %104, %cst_61 {dimension_numbers = #tpu.dot_dimension_numbers<[2], [1], [1], [2], [0, 0, 0, 1, 1, 2], [0], [0]>} : vector<2x8x8xbf16>, vector<2x8x8xbf16>, vector<2x8x8xf32> -> vector<2x8x8xf32>
    "tpu.trace_stop"() : () -> ()
    %106 = vector.extract_strided_slice %65 {offsets = [0, 0, 16], sizes = [2, 8, 8], strides = [1, 1, 1]} : vector<2x8x32xf32> to vector<2x8x8xf32>
    %107 = arith.truncf %106 : vector<2x8x8xf32> to vector<2x8x8xbf16>
    %108 = vector.extract_strided_slice %66 {offsets = [0, 0, 16], sizes = [2, 8, 8], strides = [1, 1, 1]} : vector<2x8x32xf32> to vector<2x8x8xf32>
    %109 = arith.truncf %108 : vector<2x8x8xf32> to vector<2x8x8xbf16>
    "tpu.trace_start"() <{level = 10 : i32, message = "bqd,bkd->bqk"}> : () -> ()
    %cst_62 = arith.constant dense<0.000000e+00> : vector<2x8x8xf32>
    %110 = tpu.matmul %107, %109, %cst_62 {dimension_numbers = #tpu.dot_dimension_numbers<[2], [2], [1], [1], [0, 0, 0, 1, 1, 1], [0], [0]>} : vector<2x8x8xbf16>, vector<2x8x8xbf16>, vector<2x8x8xf32> -> vector<2x8x8xf32>
    "tpu.trace_stop"() : () -> ()
    %cst_63 = arith.constant dense<0xFF800000> : vector<2x8xf32>
    %111 = vector.multi_reduction <maximumf>, %110, %cst_63 [2] : vector<2x8x8xf32> to vector<2x8xf32>
    %112 = vector.shape_cast %111 : vector<2x8xf32> to vector<2x8x1xf32>
    %113 = vector.broadcast %112 : vector<2x8x1xf32> to vector<2x8x8xf32>
    %114 = arith.subf %110, %113 : vector<2x8x8xf32>
    %115 = math.exp %114 : vector<2x8x8xf32>
    %cst_64 = arith.constant dense<0.000000e+00> : vector<2x8xf32>
    %116 = vector.multi_reduction <add>, %115, %cst_64 [2] : vector<2x8x8xf32> to vector<2x8xf32>
    %117 = vector.shape_cast %116 : vector<2x8xf32> to vector<2x8x1xf32>
    %118 = tpu.reciprocal %117 {approx = true} : vector<2x8x1xf32> -> vector<2x8x1xf32>
    %119 = vector.broadcast %118 : vector<2x8x1xf32> to vector<2x8x8xf32>
    %120 = arith.mulf %115, %119 : vector<2x8x8xf32>
    %121 = arith.truncf %120 : vector<2x8x8xf32> to vector<2x8x8xbf16>
    %122 = vector.extract_strided_slice %67 {offsets = [0, 0, 16], sizes = [2, 8, 8], strides = [1, 1, 1]} : vector<2x8x32xf32> to vector<2x8x8xf32>
    %123 = arith.truncf %122 : vector<2x8x8xf32> to vector<2x8x8xbf16>
    "tpu.trace_start"() <{level = 10 : i32, message = "bqk,bkd->bqd"}> : () -> ()
    %cst_65 = arith.constant dense<0.000000e+00> : vector<2x8x8xf32>
    %124 = tpu.matmul %121, %123, %cst_65 {dimension_numbers = #tpu.dot_dimension_numbers<[2], [1], [1], [2], [0, 0, 0, 1, 1, 2], [0], [0]>} : vector<2x8x8xbf16>, vector<2x8x8xbf16>, vector<2x8x8xf32> -> vector<2x8x8xf32>
    "tpu.trace_stop"() : () -> ()
    %125 = vector.extract_strided_slice %65 {offsets = [0, 0, 24], sizes = [2, 8, 8], strides = [1, 1, 1]} : vector<2x8x32xf32> to vector<2x8x8xf32>
    %126 = arith.truncf %125 : vector<2x8x8xf32> to vector<2x8x8xbf16>
    %127 = vector.extract_strided_slice %66 {offsets = [0, 0, 24], sizes = [2, 8, 8], strides = [1, 1, 1]} : vector<2x8x32xf32> to vector<2x8x8xf32>
    %128 = arith.truncf %127 : vector<2x8x8xf32> to vector<2x8x8xbf16>
    "tpu.trace_start"() <{level = 10 : i32, message = "bqd,bkd->bqk"}> : () -> ()
    %cst_66 = arith.constant dense<0.000000e+00> : vector<2x8x8xf32>
    %129 = tpu.matmul %126, %128, %cst_66 {dimension_numbers = #tpu.dot_dimension_numbers<[2], [2], [1], [1], [0, 0, 0, 1, 1, 1], [0], [0]>} : vector<2x8x8xbf16>, vector<2x8x8xbf16>, vector<2x8x8xf32> -> vector<2x8x8xf32>
    "tpu.trace_stop"() : () -> ()
    %cst_67 = arith.constant dense<0xFF800000> : vector<2x8xf32>
    %130 = vector.multi_reduction <maximumf>, %129, %cst_67 [2] : vector<2x8x8xf32> to vector<2x8xf32>
    %131 = vector.shape_cast %130 : vector<2x8xf32> to vector<2x8x1xf32>
    %132 = vector.broadcast %131 : vector<2x8x1xf32> to vector<2x8x8xf32>
    %133 = arith.subf %129, %132 : vector<2x8x8xf32>
    %134 = math.exp %133 : vector<2x8x8xf32>
    %cst_68 = arith.constant dense<0.000000e+00> : vector<2x8xf32>
    %135 = vector.multi_reduction <add>, %134, %cst_68 [2] : vector<2x8x8xf32> to vector<2x8xf32>
    %136 = vector.shape_cast %135 : vector<2x8xf32> to vector<2x8x1xf32>
    %137 = tpu.reciprocal %136 {approx = true} : vector<2x8x1xf32> -> vector<2x8x1xf32>
    %138 = vector.broadcast %137 : vector<2x8x1xf32> to vector<2x8x8xf32>
    %139 = arith.mulf %134, %138 : vector<2x8x8xf32>
    %140 = arith.truncf %139 : vector<2x8x8xf32> to vector<2x8x8xbf16>
    %141 = vector.extract_strided_slice %67 {offsets = [0, 0, 24], sizes = [2, 8, 8], strides = [1, 1, 1]} : vector<2x8x32xf32> to vector<2x8x8xf32>
    %142 = arith.truncf %141 : vector<2x8x8xf32> to vector<2x8x8xbf16>
    "tpu.trace_start"() <{level = 10 : i32, message = "bqk,bkd->bqd"}> : () -> ()
    %cst_69 = arith.constant dense<0.000000e+00> : vector<2x8x8xf32>
    %143 = tpu.matmul %140, %142, %cst_69 {dimension_numbers = #tpu.dot_dimension_numbers<[2], [1], [1], [2], [0, 0, 0, 1, 1, 2], [0], [0]>} : vector<2x8x8xbf16>, vector<2x8x8xbf16>, vector<2x8x8xf32> -> vector<2x8x8xf32>
    "tpu.trace_stop"() : () -> ()
    %144 = tpu.concatenate %86, %105, %124, %143 in 2 : vector<2x8x8xf32>, vector<2x8x8xf32>, vector<2x8x8xf32>, vector<2x8x8xf32> -> vector<2x8x32xf32>
    %145 = vector.shape_cast %144 : vector<2x8x32xf32> to vector<16x32xf32>
    %146 = arith.truncf %145 : vector<16x32xf32> to vector<16x32xbf16>
    %cst_70 = arith.constant dense<0.000000e+00> : vector<16x32xf32>
    %147 = tpu.matmul %146, %57, %cst_70 {dimension_numbers = #tpu.dot_dimension_numbers<[1], [0], [0], [1], [0, 0, 1, 1], [], []>} : vector<16x32xbf16>, vector<32x32xbf16>, vector<16x32xf32> -> vector<16x32xf32>
    %148 = vector.broadcast %59 : vector<1x32xf32> to vector<16x32xf32>
    %149 = arith.addf %147, %148 : vector<16x32xf32>
    %150 = arith.addf %51, %149 : vector<16x32xf32>
    %cst_71 = arith.constant dense<0.000000e+00> : vector<16xf32>
    %151 = vector.multi_reduction <add>, %150, %cst_71 [1] : vector<16x32xf32> to vector<16xf32>
    %152 = vector.shape_cast %151 : vector<16xf32> to vector<16x1xf32>
    %cst_72 = arith.constant 3.200000e+01 : f32
    %153 = vector.broadcast %cst_72 : f32 to vector<16x1xf32>
    %154 = arith.divf %152, %153 : vector<16x1xf32>
    %155 = vector.broadcast %154 : vector<16x1xf32> to vector<16x32xf32>
    %156 = arith.subf %150, %155 : vector<16x32xf32>
    %157 = arith.mulf %156, %156 : vector<16x32xf32>
    %cst_73 = arith.constant dense<0.000000e+00> : vector<16xf32>
    %158 = vector.multi_reduction <add>, %157, %cst_73 [1] : vector<16x32xf32> to vector<16xf32>
    %159 = vector.shape_cast %158 : vector<16xf32> to vector<16x1xf32>
    %cst_74 = arith.constant 3.200000e+01 : f32
    %160 = vector.broadcast %cst_74 : f32 to vector<16x1xf32>
    %161 = arith.divf %159, %160 : vector<16x1xf32>
    %162 = vector.broadcast %154 : vector<16x1xf32> to vector<16x32xf32>
    %163 = arith.subf %150, %162 : vector<16x32xf32>
    %cst_75 = arith.constant 9.99999974E-6 : f32
    %164 = vector.broadcast %cst_75 : f32 to vector<16x1xf32>
    %165 = arith.addf %161, %164 : vector<16x1xf32>
    %166 = math.rsqrt %165 : vector<16x1xf32>
    %167 = vector.broadcast %166 : vector<16x1xf32> to vector<16x32xf32>
    %168 = arith.mulf %163, %167 : vector<16x32xf32>
    %c0_76 = arith.constant 0 : index
    %c0_77 = arith.constant 0 : index
    %c0_78 = arith.constant 0 : index
    %169 = vector.load %arg11[%c0_76, %c0_77, %c0_78] : memref<2x1x32xf32, #tpu.memory_space<vmem>>, vector<1x1x32xf32>
    %170 = vector.shape_cast %169 : vector<1x1x32xf32> to vector<1x32xf32>
    %171 = vector.broadcast %170 : vector<1x32xf32> to vector<16x32xf32>
    %172 = arith.mulf %168, %171 : vector<16x32xf32>
    %c0_79 = arith.constant 0 : index
    %c0_80 = arith.constant 0 : index
    %c0_81 = arith.constant 0 : index
    %173 = vector.load %arg12[%c0_79, %c0_80, %c0_81] : memref<2x1x32xf32, #tpu.memory_space<vmem>>, vector<1x1x32xf32>
    %174 = vector.shape_cast %173 : vector<1x1x32xf32> to vector<1x32xf32>
    %175 = vector.broadcast %174 : vector<1x32xf32> to vector<16x32xf32>
    %176 = arith.addf %172, %175 : vector<16x32xf32>
    %177 = arith.truncf %176 : vector<16x32xf32> to vector<16x32xbf16>
    %c0_82 = arith.constant 0 : index
    %c0_83 = arith.constant 0 : index
    %c0_84 = arith.constant 0 : index
    %178 = vector.load %arg7[%c0_82, %c0_83, %c0_84] : memref<2x32x2048xbf16, #tpu.memory_space<vmem>>, vector<1x32x2048xbf16>
    %179 = vector.shape_cast %178 : vector<1x32x2048xbf16> to vector<32x2048xbf16>
    %cst_85 = arith.constant dense<0.000000e+00> : vector<16x2048xf32>
    %180 = tpu.matmul %177, %179, %cst_85 {dimension_numbers = #tpu.dot_dimension_numbers<[1], [0], [0], [1], [0, 0, 1, 1], [], []>} : vector<16x32xbf16>, vector<32x2048xbf16>, vector<16x2048xf32> -> vector<16x2048xf32>
    %c0_86 = arith.constant 0 : index
    %c0_87 = arith.constant 0 : index
    %c0_88 = arith.constant 0 : index
    %181 = vector.load %arg8[%c0_86, %c0_87, %c0_88] : memref<2x1x2048xf32, #tpu.memory_space<vmem>>, vector<1x1x2048xf32>
    %182 = vector.shape_cast %181 : vector<1x1x2048xf32> to vector<1x2048xf32>
    %183 = vector.broadcast %182 : vector<1x2048xf32> to vector<16x2048xf32>
    %184 = arith.addf %180, %183 : vector<16x2048xf32>
    %cst_89 = arith.constant 0.000000e+00 : f32
    %185 = vector.broadcast %cst_89 : f32 to vector<16x2048xf32>
    %186 = arith.maximumf %184, %185 : vector<16x2048xf32>
    %187 = arith.truncf %186 : vector<16x2048xf32> to vector<16x2048xbf16>
    %c0_90 = arith.constant 0 : index
    %c0_91 = arith.constant 0 : index
    %c0_92 = arith.constant 0 : index
    %188 = vector.load %arg9[%c0_90, %c0_91, %c0_92] : memref<2x2048x32xbf16, #tpu.memory_space<vmem>>, vector<1x2048x32xbf16>
    %189 = vector.shape_cast %188 : vector<1x2048x32xbf16> to vector<2048x32xbf16>
    %cst_93 = arith.constant dense<0.000000e+00> : vector<16x32xf32>
    %190 = tpu.matmul %187, %189, %cst_93 {dimension_numbers = #tpu.dot_dimension_numbers<[1], [0], [0], [1], [0, 0, 1, 1], [], []>} : vector<16x2048xbf16>, vector<2048x32xbf16>, vector<16x32xf32> -> vector<16x32xf32>
    %c0_94 = arith.constant 0 : index
    %c0_95 = arith.constant 0 : index
    %c0_96 = arith.constant 0 : index
    %191 = vector.load %arg10[%c0_94, %c0_95, %c0_96] : memref<2x1x32xf32, #tpu.memory_space<vmem>>, vector<1x1x32xf32>
    %192 = vector.shape_cast %191 : vector<1x1x32xf32> to vector<1x32xf32>
    %193 = vector.broadcast %192 : vector<1x32xf32> to vector<16x32xf32>
    %194 = arith.addf %190, %193 : vector<16x32xf32>
    %195 = arith.addf %176, %194 : vector<16x32xf32>
    %cst_97 = arith.constant dense<0.000000e+00> : vector<16xf32>
    %196 = vector.multi_reduction <add>, %195, %cst_97 [1] : vector<16x32xf32> to vector<16xf32>
    %197 = vector.shape_cast %196 : vector<16xf32> to vector<16x1xf32>
    %cst_98 = arith.constant 3.200000e+01 : f32
    %198 = vector.broadcast %cst_98 : f32 to vector<16x1xf32>
    %199 = arith.divf %197, %198 : vector<16x1xf32>
    %200 = vector.broadcast %199 : vector<16x1xf32> to vector<16x32xf32>
    %201 = arith.subf %195, %200 : vector<16x32xf32>
    %202 = arith.mulf %201, %201 : vector<16x32xf32>
    %cst_99 = arith.constant dense<0.000000e+00> : vector<16xf32>
    %203 = vector.multi_reduction <add>, %202, %cst_99 [1] : vector<16x32xf32> to vector<16xf32>
    %204 = vector.shape_cast %203 : vector<16xf32> to vector<16x1xf32>
    %cst_100 = arith.constant 3.200000e+01 : f32
    %205 = vector.broadcast %cst_100 : f32 to vector<16x1xf32>
    %206 = arith.divf %204, %205 : vector<16x1xf32>
    %207 = vector.broadcast %199 : vector<16x1xf32> to vector<16x32xf32>
    %208 = arith.subf %195, %207 : vector<16x32xf32>
    %cst_101 = arith.constant 9.99999974E-6 : f32
    %209 = vector.broadcast %cst_101 : f32 to vector<16x1xf32>
    %210 = arith.addf %206, %209 : vector<16x1xf32>
    %211 = math.rsqrt %210 : vector<16x1xf32>
    %212 = vector.broadcast %211 : vector<16x1xf32> to vector<16x32xf32>
    %213 = arith.mulf %208, %212 : vector<16x32xf32>
    %c0_102 = arith.constant 0 : index
    %c0_103 = arith.constant 0 : index
    %c0_104 = arith.constant 0 : index
    %214 = vector.load %arg13[%c0_102, %c0_103, %c0_104] : memref<2x1x32xf32, #tpu.memory_space<vmem>>, vector<1x1x32xf32>
    %215 = vector.shape_cast %214 : vector<1x1x32xf32> to vector<1x32xf32>
    %216 = vector.broadcast %215 : vector<1x32xf32> to vector<16x32xf32>
    %217 = arith.mulf %213, %216 : vector<16x32xf32>
    %c0_105 = arith.constant 0 : index
    %c0_106 = arith.constant 0 : index
    %c0_107 = arith.constant 0 : index
    %218 = vector.load %arg14[%c0_105, %c0_106, %c0_107] : memref<2x1x32xf32, #tpu.memory_space<vmem>>, vector<1x1x32xf32>
    %219 = vector.shape_cast %218 : vector<1x1x32xf32> to vector<1x32xf32>
    %220 = vector.broadcast %219 : vector<1x32xf32> to vector<16x32xf32>
    %221 = arith.addf %217, %220 : vector<16x32xf32>
    %c1_108 = arith.constant 1 : index
    %c0_109 = arith.constant 0 : index
    %c0_110 = arith.constant 0 : index
    %222 = vector.load %arg3[%c1_108, %c0_109, %c0_110] : memref<2x32x96xbf16, #tpu.memory_space<vmem>>, vector<1x32x96xbf16>
    %223 = vector.shape_cast %222 : vector<1x32x96xbf16> to vector<32x96xbf16>
    %c1_111 = arith.constant 1 : index
    %c0_112 = arith.constant 0 : index
    %c0_113 = arith.constant 0 : index
    %224 = vector.load %arg4[%c1_111, %c0_112, %c0_113] : memref<2x1x96xf32, #tpu.memory_space<vmem>>, vector<1x1x96xf32>
    %225 = vector.shape_cast %224 : vector<1x1x96xf32> to vector<1x96xf32>
    %c1_114 = arith.constant 1 : index
    %c0_115 = arith.constant 0 : index
    %c0_116 = arith.constant 0 : index
    %226 = vector.load %arg5[%c1_114, %c0_115, %c0_116] : memref<2x32x32xbf16, #tpu.memory_space<vmem>>, vector<1x32x32xbf16>
    %227 = vector.shape_cast %226 : vector<1x32x32xbf16> to vector<32x32xbf16>
    %c1_117 = arith.constant 1 : index
    %c0_118 = arith.constant 0 : index
    %c0_119 = arith.constant 0 : index
    %228 = vector.load %arg6[%c1_117, %c0_118, %c0_119] : memref<2x1x32xf32, #tpu.memory_space<vmem>>, vector<1x1x32xf32>
    %229 = vector.shape_cast %228 : vector<1x1x32xf32> to vector<1x32xf32>
    %230 = arith.truncf %221 : vector<16x32xf32> to vector<16x32xbf16>
    %cst_120 = arith.constant dense<0.000000e+00> : vector<16x96xf32>
    %231 = tpu.matmul %230, %223, %cst_120 {dimension_numbers = #tpu.dot_dimension_numbers<[1], [0], [0], [1], [0, 0, 1, 1], [], []>} : vector<16x32xbf16>, vector<32x96xbf16>, vector<16x96xf32> -> vector<16x96xf32>
    %232 = vector.broadcast %225 : vector<1x96xf32> to vector<16x96xf32>
    %233 = arith.addf %231, %232 : vector<16x96xf32>
    %234 = vector.shape_cast %233 : vector<16x96xf32> to vector<2x8x96xf32>
    %235 = vector.extract_strided_slice %234 {offsets = [0, 0, 0], sizes = [2, 8, 32], strides = [1, 1, 1]} : vector<2x8x96xf32> to vector<2x8x32xf32>
    %236 = vector.extract_strided_slice %234 {offsets = [0, 0, 32], sizes = [2, 8, 32], strides = [1, 1, 1]} : vector<2x8x96xf32> to vector<2x8x32xf32>
    %237 = vector.extract_strided_slice %234 {offsets = [0, 0, 64], sizes = [2, 8, 32], strides = [1, 1, 1]} : vector<2x8x96xf32> to vector<2x8x32xf32>
    %238 = vector.extract_strided_slice %235 {offsets = [0, 0, 0], sizes = [2, 8, 8], strides = [1, 1, 1]} : vector<2x8x32xf32> to vector<2x8x8xf32>
    %239 = arith.truncf %238 : vector<2x8x8xf32> to vector<2x8x8xbf16>
    %240 = vector.extract_strided_slice %236 {offsets = [0, 0, 0], sizes = [2, 8, 8], strides = [1, 1, 1]} : vector<2x8x32xf32> to vector<2x8x8xf32>
    %241 = arith.truncf %240 : vector<2x8x8xf32> to vector<2x8x8xbf16>
    "tpu.trace_start"() <{level = 10 : i32, message = "bqd,bkd->bqk"}> : () -> ()
    %cst_121 = arith.constant dense<0.000000e+00> : vector<2x8x8xf32>
    %242 = tpu.matmul %239, %241, %cst_121 {dimension_numbers = #tpu.dot_dimension_numbers<[2], [2], [1], [1], [0, 0, 0, 1, 1, 1], [0], [0]>} : vector<2x8x8xbf16>, vector<2x8x8xbf16>, vector<2x8x8xf32> -> vector<2x8x8xf32>
    "tpu.trace_stop"() : () -> ()
    %cst_122 = arith.constant dense<0xFF800000> : vector<2x8xf32>
    %243 = vector.multi_reduction <maximumf>, %242, %cst_122 [2] : vector<2x8x8xf32> to vector<2x8xf32>
    %244 = vector.shape_cast %243 : vector<2x8xf32> to vector<2x8x1xf32>
    %245 = vector.broadcast %244 : vector<2x8x1xf32> to vector<2x8x8xf32>
    %246 = arith.subf %242, %245 : vector<2x8x8xf32>
    %247 = math.exp %246 : vector<2x8x8xf32>
    %cst_123 = arith.constant dense<0.000000e+00> : vector<2x8xf32>
    %248 = vector.multi_reduction <add>, %247, %cst_123 [2] : vector<2x8x8xf32> to vector<2x8xf32>
    %249 = vector.shape_cast %248 : vector<2x8xf32> to vector<2x8x1xf32>
    %250 = tpu.reciprocal %249 {approx = true} : vector<2x8x1xf32> -> vector<2x8x1xf32>
    %251 = vector.broadcast %250 : vector<2x8x1xf32> to vector<2x8x8xf32>
    %252 = arith.mulf %247, %251 : vector<2x8x8xf32>
    %253 = arith.truncf %252 : vector<2x8x8xf32> to vector<2x8x8xbf16>
    %254 = vector.extract_strided_slice %237 {offsets = [0, 0, 0], sizes = [2, 8, 8], strides = [1, 1, 1]} : vector<2x8x32xf32> to vector<2x8x8xf32>
    %255 = arith.truncf %254 : vector<2x8x8xf32> to vector<2x8x8xbf16>
    "tpu.trace_start"() <{level = 10 : i32, message = "bqk,bkd->bqd"}> : () -> ()
    %cst_124 = arith.constant dense<0.000000e+00> : vector<2x8x8xf32>
    %256 = tpu.matmul %253, %255, %cst_124 {dimension_numbers = #tpu.dot_dimension_numbers<[2], [1], [1], [2], [0, 0, 0, 1, 1, 2], [0], [0]>} : vector<2x8x8xbf16>, vector<2x8x8xbf16>, vector<2x8x8xf32> -> vector<2x8x8xf32>
    "tpu.trace_stop"() : () -> ()
    %257 = vector.extract_strided_slice %235 {offsets = [0, 0, 8], sizes = [2, 8, 8], strides = [1, 1, 1]} : vector<2x8x32xf32> to vector<2x8x8xf32>
    %258 = arith.truncf %257 : vector<2x8x8xf32> to vector<2x8x8xbf16>
    %259 = vector.extract_strided_slice %236 {offsets = [0, 0, 8], sizes = [2, 8, 8], strides = [1, 1, 1]} : vector<2x8x32xf32> to vector<2x8x8xf32>
    %260 = arith.truncf %259 : vector<2x8x8xf32> to vector<2x8x8xbf16>
    "tpu.trace_start"() <{level = 10 : i32, message = "bqd,bkd->bqk"}> : () -> ()
    %cst_125 = arith.constant dense<0.000000e+00> : vector<2x8x8xf32>
    %261 = tpu.matmul %258, %260, %cst_125 {dimension_numbers = #tpu.dot_dimension_numbers<[2], [2], [1], [1], [0, 0, 0, 1, 1, 1], [0], [0]>} : vector<2x8x8xbf16>, vector<2x8x8xbf16>, vector<2x8x8xf32> -> vector<2x8x8xf32>
    "tpu.trace_stop"() : () -> ()
    %cst_126 = arith.constant dense<0xFF800000> : vector<2x8xf32>
    %262 = vector.multi_reduction <maximumf>, %261, %cst_126 [2] : vector<2x8x8xf32> to vector<2x8xf32>
    %263 = vector.shape_cast %262 : vector<2x8xf32> to vector<2x8x1xf32>
    %264 = vector.broadcast %263 : vector<2x8x1xf32> to vector<2x8x8xf32>
    %265 = arith.subf %261, %264 : vector<2x8x8xf32>
    %266 = math.exp %265 : vector<2x8x8xf32>
    %cst_127 = arith.constant dense<0.000000e+00> : vector<2x8xf32>
    %267 = vector.multi_reduction <add>, %266, %cst_127 [2] : vector<2x8x8xf32> to vector<2x8xf32>
    %268 = vector.shape_cast %267 : vector<2x8xf32> to vector<2x8x1xf32>
    %269 = tpu.reciprocal %268 {approx = true} : vector<2x8x1xf32> -> vector<2x8x1xf32>
    %270 = vector.broadcast %269 : vector<2x8x1xf32> to vector<2x8x8xf32>
    %271 = arith.mulf %266, %270 : vector<2x8x8xf32>
    %272 = arith.truncf %271 : vector<2x8x8xf32> to vector<2x8x8xbf16>
    %273 = vector.extract_strided_slice %237 {offsets = [0, 0, 8], sizes = [2, 8, 8], strides = [1, 1, 1]} : vector<2x8x32xf32> to vector<2x8x8xf32>
    %274 = arith.truncf %273 : vector<2x8x8xf32> to vector<2x8x8xbf16>
    "tpu.trace_start"() <{level = 10 : i32, message = "bqk,bkd->bqd"}> : () -> ()
    %cst_128 = arith.constant dense<0.000000e+00> : vector<2x8x8xf32>
    %275 = tpu.matmul %272, %274, %cst_128 {dimension_numbers = #tpu.dot_dimension_numbers<[2], [1], [1], [2], [0, 0, 0, 1, 1, 2], [0], [0]>} : vector<2x8x8xbf16>, vector<2x8x8xbf16>, vector<2x8x8xf32> -> vector<2x8x8xf32>
    "tpu.trace_stop"() : () -> ()
    %276 = vector.extract_strided_slice %235 {offsets = [0, 0, 16], sizes = [2, 8, 8], strides = [1, 1, 1]} : vector<2x8x32xf32> to vector<2x8x8xf32>
    %277 = arith.truncf %276 : vector<2x8x8xf32> to vector<2x8x8xbf16>
    %278 = vector.extract_strided_slice %236 {offsets = [0, 0, 16], sizes = [2, 8, 8], strides = [1, 1, 1]} : vector<2x8x32xf32> to vector<2x8x8xf32>
    %279 = arith.truncf %278 : vector<2x8x8xf32> to vector<2x8x8xbf16>
    "tpu.trace_start"() <{level = 10 : i32, message = "bqd,bkd->bqk"}> : () -> ()
    %cst_129 = arith.constant dense<0.000000e+00> : vector<2x8x8xf32>
    %280 = tpu.matmul %277, %279, %cst_129 {dimension_numbers = #tpu.dot_dimension_numbers<[2], [2], [1], [1], [0, 0, 0, 1, 1, 1], [0], [0]>} : vector<2x8x8xbf16>, vector<2x8x8xbf16>, vector<2x8x8xf32> -> vector<2x8x8xf32>
    "tpu.trace_stop"() : () -> ()
    %cst_130 = arith.constant dense<0xFF800000> : vector<2x8xf32>
    %281 = vector.multi_reduction <maximumf>, %280, %cst_130 [2] : vector<2x8x8xf32> to vector<2x8xf32>
    %282 = vector.shape_cast %281 : vector<2x8xf32> to vector<2x8x1xf32>
    %283 = vector.broadcast %282 : vector<2x8x1xf32> to vector<2x8x8xf32>
    %284 = arith.subf %280, %283 : vector<2x8x8xf32>
    %285 = math.exp %284 : vector<2x8x8xf32>
    %cst_131 = arith.constant dense<0.000000e+00> : vector<2x8xf32>
    %286 = vector.multi_reduction <add>, %285, %cst_131 [2] : vector<2x8x8xf32> to vector<2x8xf32>
    %287 = vector.shape_cast %286 : vector<2x8xf32> to vector<2x8x1xf32>
    %288 = tpu.reciprocal %287 {approx = true} : vector<2x8x1xf32> -> vector<2x8x1xf32>
    %289 = vector.broadcast %288 : vector<2x8x1xf32> to vector<2x8x8xf32>
    %290 = arith.mulf %285, %289 : vector<2x8x8xf32>
    %291 = arith.truncf %290 : vector<2x8x8xf32> to vector<2x8x8xbf16>
    %292 = vector.extract_strided_slice %237 {offsets = [0, 0, 16], sizes = [2, 8, 8], strides = [1, 1, 1]} : vector<2x8x32xf32> to vector<2x8x8xf32>
    %293 = arith.truncf %292 : vector<2x8x8xf32> to vector<2x8x8xbf16>
    "tpu.trace_start"() <{level = 10 : i32, message = "bqk,bkd->bqd"}> : () -> ()
    %cst_132 = arith.constant dense<0.000000e+00> : vector<2x8x8xf32>
    %294 = tpu.matmul %291, %293, %cst_132 {dimension_numbers = #tpu.dot_dimension_numbers<[2], [1], [1], [2], [0, 0, 0, 1, 1, 2], [0], [0]>} : vector<2x8x8xbf16>, vector<2x8x8xbf16>, vector<2x8x8xf32> -> vector<2x8x8xf32>
    "tpu.trace_stop"() : () -> ()
    %295 = vector.extract_strided_slice %235 {offsets = [0, 0, 24], sizes = [2, 8, 8], strides = [1, 1, 1]} : vector<2x8x32xf32> to vector<2x8x8xf32>
    %296 = arith.truncf %295 : vector<2x8x8xf32> to vector<2x8x8xbf16>
    %297 = vector.extract_strided_slice %236 {offsets = [0, 0, 24], sizes = [2, 8, 8], strides = [1, 1, 1]} : vector<2x8x32xf32> to vector<2x8x8xf32>
    %298 = arith.truncf %297 : vector<2x8x8xf32> to vector<2x8x8xbf16>
    "tpu.trace_start"() <{level = 10 : i32, message = "bqd,bkd->bqk"}> : () -> ()
    %cst_133 = arith.constant dense<0.000000e+00> : vector<2x8x8xf32>
    %299 = tpu.matmul %296, %298, %cst_133 {dimension_numbers = #tpu.dot_dimension_numbers<[2], [2], [1], [1], [0, 0, 0, 1, 1, 1], [0], [0]>} : vector<2x8x8xbf16>, vector<2x8x8xbf16>, vector<2x8x8xf32> -> vector<2x8x8xf32>
    "tpu.trace_stop"() : () -> ()
    %cst_134 = arith.constant dense<0xFF800000> : vector<2x8xf32>
    %300 = vector.multi_reduction <maximumf>, %299, %cst_134 [2] : vector<2x8x8xf32> to vector<2x8xf32>
    %301 = vector.shape_cast %300 : vector<2x8xf32> to vector<2x8x1xf32>
    %302 = vector.broadcast %301 : vector<2x8x1xf32> to vector<2x8x8xf32>
    %303 = arith.subf %299, %302 : vector<2x8x8xf32>
    %304 = math.exp %303 : vector<2x8x8xf32>
    %cst_135 = arith.constant dense<0.000000e+00> : vector<2x8xf32>
    %305 = vector.multi_reduction <add>, %304, %cst_135 [2] : vector<2x8x8xf32> to vector<2x8xf32>
    %306 = vector.shape_cast %305 : vector<2x8xf32> to vector<2x8x1xf32>
    %307 = tpu.reciprocal %306 {approx = true} : vector<2x8x1xf32> -> vector<2x8x1xf32>
    %308 = vector.broadcast %307 : vector<2x8x1xf32> to vector<2x8x8xf32>
    %309 = arith.mulf %304, %308 : vector<2x8x8xf32>
    %310 = arith.truncf %309 : vector<2x8x8xf32> to vector<2x8x8xbf16>
    %311 = vector.extract_strided_slice %237 {offsets = [0, 0, 24], sizes = [2, 8, 8], strides = [1, 1, 1]} : vector<2x8x32xf32> to vector<2x8x8xf32>
    %312 = arith.truncf %311 : vector<2x8x8xf32> to vector<2x8x8xbf16>
    "tpu.trace_start"() <{level = 10 : i32, message = "bqk,bkd->bqd"}> : () -> ()
    %cst_136 = arith.constant dense<0.000000e+00> : vector<2x8x8xf32>
    %313 = tpu.matmul %310, %312, %cst_136 {dimension_numbers = #tpu.dot_dimension_numbers<[2], [1], [1], [2], [0, 0, 0, 1, 1, 2], [0], [0]>} : vector<2x8x8xbf16>, vector<2x8x8xbf16>, vector<2x8x8xf32> -> vector<2x8x8xf32>
    "tpu.trace_stop"() : () -> ()
    %314 = tpu.concatenate %256, %275, %294, %313 in 2 : vector<2x8x8xf32>, vector<2x8x8xf32>, vector<2x8x8xf32>, vector<2x8x8xf32> -> vector<2x8x32xf32>
    %315 = vector.shape_cast %314 : vector<2x8x32xf32> to vector<16x32xf32>
    %316 = arith.truncf %315 : vector<16x32xf32> to vector<16x32xbf16>
    %cst_137 = arith.constant dense<0.000000e+00> : vector<16x32xf32>
    %317 = tpu.matmul %316, %227, %cst_137 {dimension_numbers = #tpu.dot_dimension_numbers<[1], [0], [0], [1], [0, 0, 1, 1], [], []>} : vector<16x32xbf16>, vector<32x32xbf16>, vector<16x32xf32> -> vector<16x32xf32>
    %318 = vector.broadcast %229 : vector<1x32xf32> to vector<16x32xf32>
    %319 = arith.addf %317, %318 : vector<16x32xf32>
    %320 = arith.addf %221, %319 : vector<16x32xf32>
    %cst_138 = arith.constant dense<0.000000e+00> : vector<16xf32>
    %321 = vector.multi_reduction <add>, %320, %cst_138 [1] : vector<16x32xf32> to vector<16xf32>
    %322 = vector.shape_cast %321 : vector<16xf32> to vector<16x1xf32>
    %cst_139 = arith.constant 3.200000e+01 : f32
    %323 = vector.broadcast %cst_139 : f32 to vector<16x1xf32>
    %324 = arith.divf %322, %323 : vector<16x1xf32>
    %325 = vector.broadcast %324 : vector<16x1xf32> to vector<16x32xf32>
    %326 = arith.subf %320, %325 : vector<16x32xf32>
    %327 = arith.mulf %326, %326 : vector<16x32xf32>
    %cst_140 = arith.constant dense<0.000000e+00> : vector<16xf32>
    %328 = vector.multi_reduction <add>, %327, %cst_140 [1] : vector<16x32xf32> to vector<16xf32>
    %329 = vector.shape_cast %328 : vector<16xf32> to vector<16x1xf32>
    %cst_141 = arith.constant 3.200000e+01 : f32
    %330 = vector.broadcast %cst_141 : f32 to vector<16x1xf32>
    %331 = arith.divf %329, %330 : vector<16x1xf32>
    %332 = vector.broadcast %324 : vector<16x1xf32> to vector<16x32xf32>
    %333 = arith.subf %320, %332 : vector<16x32xf32>
    %cst_142 = arith.constant 9.99999974E-6 : f32
    %334 = vector.broadcast %cst_142 : f32 to vector<16x1xf32>
    %335 = arith.addf %331, %334 : vector<16x1xf32>
    %336 = math.rsqrt %335 : vector<16x1xf32>
    %337 = vector.broadcast %336 : vector<16x1xf32> to vector<16x32xf32>
    %338 = arith.mulf %333, %337 : vector<16x32xf32>
    %c1_143 = arith.constant 1 : index
    %c0_144 = arith.constant 0 : index
    %c0_145 = arith.constant 0 : index
    %339 = vector.load %arg11[%c1_143, %c0_144, %c0_145] : memref<2x1x32xf32, #tpu.memory_space<vmem>>, vector<1x1x32xf32>
    %340 = vector.shape_cast %339 : vector<1x1x32xf32> to vector<1x32xf32>
    %341 = vector.broadcast %340 : vector<1x32xf32> to vector<16x32xf32>
    %342 = arith.mulf %338, %341 : vector<16x32xf32>
    %c1_146 = arith.constant 1 : index
    %c0_147 = arith.constant 0 : index
    %c0_148 = arith.constant 0 : index
    %343 = vector.load %arg12[%c1_146, %c0_147, %c0_148] : memref<2x1x32xf32, #tpu.memory_space<vmem>>, vector<1x1x32xf32>
    %344 = vector.shape_cast %343 : vector<1x1x32xf32> to vector<1x32xf32>
    %345 = vector.broadcast %344 : vector<1x32xf32> to vector<16x32xf32>
    %346 = arith.addf %342, %345 : vector<16x32xf32>
    %347 = arith.truncf %346 : vector<16x32xf32> to vector<16x32xbf16>
    %c1_149 = arith.constant 1 : index
    %c0_150 = arith.constant 0 : index
    %c0_151 = arith.constant 0 : index
    %348 = vector.load %arg7[%c1_149, %c0_150, %c0_151] : memref<2x32x2048xbf16, #tpu.memory_space<vmem>>, vector<1x32x2048xbf16>
    %349 = vector.shape_cast %348 : vector<1x32x2048xbf16> to vector<32x2048xbf16>
    %cst_152 = arith.constant dense<0.000000e+00> : vector<16x2048xf32>
    %350 = tpu.matmul %347, %349, %cst_152 {dimension_numbers = #tpu.dot_dimension_numbers<[1], [0], [0], [1], [0, 0, 1, 1], [], []>} : vector<16x32xbf16>, vector<32x2048xbf16>, vector<16x2048xf32> -> vector<16x2048xf32>
    %c1_153 = arith.constant 1 : index
    %c0_154 = arith.constant 0 : index
    %c0_155 = arith.constant 0 : index
    %351 = vector.load %arg8[%c1_153, %c0_154, %c0_155] : memref<2x1x2048xf32, #tpu.memory_space<vmem>>, vector<1x1x2048xf32>
    %352 = vector.shape_cast %351 : vector<1x1x2048xf32> to vector<1x2048xf32>
    %353 = vector.broadcast %352 : vector<1x2048xf32> to vector<16x2048xf32>
    %354 = arith.addf %350, %353 : vector<16x2048xf32>
    %cst_156 = arith.constant 0.000000e+00 : f32
    %355 = vector.broadcast %cst_156 : f32 to vector<16x2048xf32>
    %356 = arith.maximumf %354, %355 : vector<16x2048xf32>
    %357 = arith.truncf %356 : vector<16x2048xf32> to vector<16x2048xbf16>
    %c1_157 = arith.constant 1 : index
    %c0_158 = arith.constant 0 : index
    %c0_159 = arith.constant 0 : index
    %358 = vector.load %arg9[%c1_157, %c0_158, %c0_159] : memref<2x2048x32xbf16, #tpu.memory_space<vmem>>, vector<1x2048x32xbf16>
    %359 = vector.shape_cast %358 : vector<1x2048x32xbf16> to vector<2048x32xbf16>
    %cst_160 = arith.constant dense<0.000000e+00> : vector<16x32xf32>
    %360 = tpu.matmul %357, %359, %cst_160 {dimension_numbers = #tpu.dot_dimension_numbers<[1], [0], [0], [1], [0, 0, 1, 1], [], []>} : vector<16x2048xbf16>, vector<2048x32xbf16>, vector<16x32xf32> -> vector<16x32xf32>
    %c1_161 = arith.constant 1 : index
    %c0_162 = arith.constant 0 : index
    %c0_163 = arith.constant 0 : index
    %361 = vector.load %arg10[%c1_161, %c0_162, %c0_163] : memref<2x1x32xf32, #tpu.memory_space<vmem>>, vector<1x1x32xf32>
    %362 = vector.shape_cast %361 : vector<1x1x32xf32> to vector<1x32xf32>
    %363 = vector.broadcast %362 : vector<1x32xf32> to vector<16x32xf32>
    %364 = arith.addf %360, %363 : vector<16x32xf32>
    %365 = arith.addf %346, %364 : vector<16x32xf32>
    %cst_164 = arith.constant dense<0.000000e+00> : vector<16xf32>
    %366 = vector.multi_reduction <add>, %365, %cst_164 [1] : vector<16x32xf32> to vector<16xf32>
    %367 = vector.shape_cast %366 : vector<16xf32> to vector<16x1xf32>
    %cst_165 = arith.constant 3.200000e+01 : f32
    %368 = vector.broadcast %cst_165 : f32 to vector<16x1xf32>
    %369 = arith.divf %367, %368 : vector<16x1xf32>
    %370 = vector.broadcast %369 : vector<16x1xf32> to vector<16x32xf32>
    %371 = arith.subf %365, %370 : vector<16x32xf32>
    %372 = arith.mulf %371, %371 : vector<16x32xf32>
    %cst_166 = arith.constant dense<0.000000e+00> : vector<16xf32>
    %373 = vector.multi_reduction <add>, %372, %cst_166 [1] : vector<16x32xf32> to vector<16xf32>
    %374 = vector.shape_cast %373 : vector<16xf32> to vector<16x1xf32>
    %cst_167 = arith.constant 3.200000e+01 : f32
    %375 = vector.broadcast %cst_167 : f32 to vector<16x1xf32>
    %376 = arith.divf %374, %375 : vector<16x1xf32>
    %377 = vector.broadcast %369 : vector<16x1xf32> to vector<16x32xf32>
    %378 = arith.subf %365, %377 : vector<16x32xf32>
    %cst_168 = arith.constant 9.99999974E-6 : f32
    %379 = vector.broadcast %cst_168 : f32 to vector<16x1xf32>
    %380 = arith.addf %376, %379 : vector<16x1xf32>
    %381 = math.rsqrt %380 : vector<16x1xf32>
    %382 = vector.broadcast %381 : vector<16x1xf32> to vector<16x32xf32>
    %383 = arith.mulf %378, %382 : vector<16x32xf32>
    %c1_169 = arith.constant 1 : index
    %c0_170 = arith.constant 0 : index
    %c0_171 = arith.constant 0 : index
    %384 = vector.load %arg13[%c1_169, %c0_170, %c0_171] : memref<2x1x32xf32, #tpu.memory_space<vmem>>, vector<1x1x32xf32>
    %385 = vector.shape_cast %384 : vector<1x1x32xf32> to vector<1x32xf32>
    %386 = vector.broadcast %385 : vector<1x32xf32> to vector<16x32xf32>
    %387 = arith.mulf %383, %386 : vector<16x32xf32>
    %c1_172 = arith.constant 1 : index
    %c0_173 = arith.constant 0 : index
    %c0_174 = arith.constant 0 : index
    %388 = vector.load %arg14[%c1_172, %c0_173, %c0_174] : memref<2x1x32xf32, #tpu.memory_space<vmem>>, vector<1x1x32xf32>
    %389 = vector.shape_cast %388 : vector<1x1x32xf32> to vector<1x32xf32>
    %390 = vector.broadcast %389 : vector<1x32xf32> to vector<16x32xf32>
    %391 = arith.addf %387, %390 : vector<16x32xf32>
    %392 = vector.shape_cast %391 : vector<16x32xf32> to vector<2x8x32xf32>
    %cst_175 = arith.constant dense<0.000000e+00> : vector<2x32xf32>
    %393 = vector.multi_reduction <add>, %392, %cst_175 [1] : vector<2x8x32xf32> to vector<2x32xf32>
    %cst_176 = arith.constant 8.000000e+00 : f32
    %394 = vector.broadcast %cst_176 : f32 to vector<2x32xf32>
    %395 = arith.divf %393, %394 : vector<2x32xf32>
    %396 = arith.truncf %395 : vector<2x32xf32> to vector<2x32xbf16>
    %c0_177 = arith.constant 0 : index
    %c0_178 = arith.constant 0 : index
    %397 = vector.load %arg15[%c0_177, %c0_178] : memref<32x2xbf16, #tpu.memory_space<vmem>>, vector<32x2xbf16>
    %cst_179 = arith.constant dense<0.000000e+00> : vector<2x2xf32>
    %398 = tpu.matmul %396, %397, %cst_179 {dimension_numbers = #tpu.dot_dimension_numbers<[1], [0], [0], [1], [0, 0, 1, 1], [], []>} : vector<2x32xbf16>, vector<32x2xbf16>, vector<2x2xf32> -> vector<2x2xf32>
    %c0_180 = arith.constant 0 : index
    %c0_181 = arith.constant 0 : index
    %399 = vector.load %arg16[%c0_180, %c0_181] : memref<1x2xf32, #tpu.memory_space<vmem>>, vector<1x2xf32>
    %400 = vector.broadcast %399 : vector<1x2xf32> to vector<2x2xf32>
    %401 = arith.addf %398, %400 : vector<2x2xf32>
    %cst_182 = arith.constant dense<0xFF800000> : vector<2xf32>
    %402 = vector.multi_reduction <maximumf>, %401, %cst_182 [1] : vector<2x2xf32> to vector<2xf32>
    %403 = vector.shape_cast %402 : vector<2xf32> to vector<2x1xf32>
    %404 = vector.broadcast %403 : vector<2x1xf32> to vector<2x2xf32>
    %405 = arith.subf %401, %404 : vector<2x2xf32>
    %406 = math.exp %405 : vector<2x2xf32>
    %cst_183 = arith.constant dense<0.000000e+00> : vector<2xf32>
    %407 = vector.multi_reduction <add>, %406, %cst_183 [1] : vector<2x2xf32> to vector<2xf32>
    %408 = vector.shape_cast %407 : vector<2xf32> to vector<2x1xf32>
    %409 = vector.broadcast %408 : vector<2x1xf32> to vector<2x2xf32>
    %410 = arith.divf %406, %409 : vector<2x2xf32>
    %c0_184 = arith.constant 0 : index
    %c0_185 = arith.constant 0 : index
    %411 = vector.load %arg17[%c0_184, %c0_185] : memref<2x2xf32, #tpu.memory_space<vmem>>, vector<2x2xf32>
    tpu.vector_store %arg17[%c0_184, %c0_185], %410 {strides = array<i32>} : memref<2x2xf32, #tpu.memory_space<vmem>>, vector<2x2xf32>,
    return
  }
}

</mosaic_0001>

<bundles_post_ra>
// kernel: tpu_custom_call.1
= control target key start
LH: loop header
LB: loop body
LE: loop exit
PB: predicated region body
PF: predicated region fallthrough
CT: control target
= control target key end

     0   :  { %s10346_s0 = inlined_call_operand.vmem [shape: s32[2,8], index: 0, kind: input, shape index: {}]   ;;  %s10347_s1 = inlined_call_operand.vmem [shape: f32[20,32], index: 1, kind: input, shape index: {}]   ;;  %s10348_s2 = inlined_call_operand.vmem [shape: f32[50,32], index: 2, kind: input, shape index: {}]   ;;  %s10349_s3 = inlined_call_operand.vmem [shape: bf16[2,32,96], index: 3, kind: input, shape index: {}]   ;;  %s10350_s4 = inlined_call_operand.vmem [shape: f32[2,1,96], index: 4, kind: input, shape index: {}]   ;;  %s10351_s5 = inlined_call_operand.vmem [shape: bf16[2,32,32], index: 5, kind: input, shape index: {}]   ;;  %s10352_s6 = inlined_call_operand.vmem [shape: f32[2,1,32], index: 6, kind: input, shape index: {}]   ;;  %s10353_s7 = inlined_call_operand.vmem [shape: bf16[2,32,2048], index: 7, kind: input, shape index: {}]   ;;  %s10354_s8 = inlined_call_operand.vmem [shape: f32[2,1,2048], index: 8, kind: input, shape index: {}]   ;;  %s10355_s9 = inlined_call_operand.vmem [shape: bf16[2,2048,32], index: 9, kind: input, shape index: {}]   ;;  %s10356_s10 = inlined_call_operand.vmem [shape: f32[2,1,32], index: 10, kind: input, shape index: {}]   ;;  %s10357_s11 = inlined_call_operand.vmem [shape: f32[2,1,32], index: 11, kind: input, shape index: {}]   ;;  %s10358_s12 = inlined_call_operand.vmem [shape: f32[2,1,32], index: 12, kind: input, shape index: {}]   ;;  %s10359_s13 = inlined_call_operand.vmem [shape: f32[2,1,32], index: 13, kind: input, shape index: {}]   ;;  %s10360_s14 = inlined_call_operand.vmem [shape: f32[2,1,32], index: 14, kind: input, shape index: {}]   ;;  %s10361_s15 = inlined_call_operand.vmem [shape: bf16[32,2], index: 15, kind: input, shape index: {}]   ;;  %s10362_s16 = inlined_call_operand.vmem [shape: f32[1,2], index: 16, kind: input, shape index: {}]   ;;  %s10363_s17 = inlined_call_operand.hbm [shape: f32[2,2], index: 17, kind: output, shape index: {}]  }
   0x1   :  { %10374 = sst [smem:[#allocation8_spill]] %s10346_s0 }
   0x2   :  { %10375 = sst [smem:[#allocation9_spill]] %s10347_s1 }
   0x3   :  { %10376 = sst [smem:[#allocation10_spill]] %s10349_s3 }
   0x4   :  { %10377 = sst [smem:[#allocation11_spill]] %s10354_s8 }
   0x5   :  { %10378 = sst [smem:[#allocation12_spill]] %s10355_s9 }
   0x6   :  { %10379 = sst [smem:[#allocation13_spill]] %s10356_s10 }
   0x7   :  { %10380 = sst [smem:[#allocation14_spill]] %s10359_s13 }
   0x8   :  { %10381 = sst [smem:[#allocation15_spill]] %s10360_s14 }
   0x9   :  { %10382 = sst [smem:[#allocation16_spill]] %s10361_s15 }
   0xa   :  { %10383 = sst [smem:[#allocation17_spill]] %s10362_s16 }
   0xb   :  { %10384 = sst [smem:[#allocation18_spill]] %s10363_s17 }
   0xc   :  { %22 = vsyncpa [#allocation4], 0 }
   0xd   :  { %23 = vsyncpa [#allocation3], 0  ;;  %s10385_s26 = sld [smem:[#allocation8_spill]] }
  0x13   :  { %s30_s27 = sshll.u32 %s10385_s26, 4  ;;  %s31_s27 = int_to_ptr.vmem [resolvable:$true] %s30_s27 }
  0x14   :  { %s8456_s28 = scalar_lea.vmem %s31_s27, 32  ;;  %p8461_p1 = scmp.lt.s32.totalorder %s31_s27, %s31_s27 }
  0x15   :  { %p8457_p0 = scmp.ne.s32.totalorder %s31_s27, %s8456_s28  ;;  %p8462_p2 = scmp.lt.s32.totalorder %s8456_s28, %s8456_s28 }
  0x17   :  { %p8463_p3 = por %p8462_p2, %p8461_p1 }
  0x19   :  { %p8464_p4 = pnand %p8463_p3, %p8457_p0 }
  0x1b   :  { %8467 = shalt.err (!%p8464_p4)
}
  0x1c   :  { %s8494_s29 = smov [#allocation2]  }
  0x1d   :  { %33 = dma.vmem_to_smem %s31_s27, 32, %s8494_s29, [#allocation4]  }
  0x1e   :  { %8490 = dma.done.wait [#allocation4], 32  }
  0x1f   :  { %8491 = vsyncadd [#allocation4], 4294967264 }
  0x20   :  { %69 = sfence }
  0x21   :  { %v8106_v0 = vld [vmem:[%s10349_s3] sm:$0xff]   ;;  %v8495_v1 = vmov 0.0   ;;  %v8107_v2 = vld [vmem:[%s10349_s3 + $0x8] sm:$0xff]   ;;  %vm8496_vm0 = vmmov 0   ;;  %s71_s1 = sld [smem:[#allocation2]]  ;;  %s6676_s20 = sld [smem:[#allocation2 + $0x1]] }
  0x22   :  { %7825 = vmatprep.subr.bf16.mxu0 %v8495_v1  ;;  %7833 = vmatprep.subr.bf16.mxu1 %v8495_v1  ;;  %s6677_s21 = sld [smem:[#allocation2 + $0x2]]  ;;  %s6678_s22 = sld [smem:[#allocation2 + $0x3]]  ;;  %vm161_vm1 = vcmask 1040384   ;;  %vm163_vm2 = vcmask 1041408   ;;  %vm165_vm3 = vcmask 1042432   ;;  %vm167_vm4 = vcmask 1043456  }
  0x23   :  { %7826 = vmatpush3.bf16.msra.mxu0 %v8106_v0  ;;  %7829 = vmatprep.mubr.msk.bf16.mxu0 %vm8496_vm0, %v8495_v1  ;;  %s6679_s23 = sld [smem:[#allocation2 + $0x4]]  ;;  %s6680_s24 = sld [smem:[#allocation2 + $0x5]]  ;;  %vm169_vm5 = vcmask 1044480   ;;  %vm171_vm6 = vcmask 1045504   ;;  %vm173_vm7 = vcmask 1046528   ;;  %vm214_vm8 = vcmask 261120  }
  0x24   :  { %7827 = vmatprep.subr.bf16.mxu0 %v8495_v1  ;;  %7835 = vmatprep.mubr.msk.bf16.mxu1 %vm8496_vm0, %v8495_v1  ;;  %s8619_s25 = sld [smem:[#allocation2 + $0x6]]  ;;  %s8621_s26 = sld [smem:[#allocation2 + $0x7]]  ;;  %v6691_v51 = vld [vmem:[%s10350_s4] ss:$0 sm:$0xff]  ;;  %vm264_vm9 = vcmask 64512   ;;  %vm1166_vm10 = vcmask 130048  }
  0x25   :  { %s8623_s27 = sld [smem:[#allocation2 + $0x80]]  ;;  %s8625_s28 = sld [smem:[#allocation2 + $0x81]]  ;;  %vm1169_vm11 = vcmask 195584   ;;  %vm6574_vm12 = vcmask 1041409   ;;  %vm6632_vm13 = vcmask 9216  }
  0x26   :  { %s8627_s29 = sld [smem:[#allocation2 + $0x82]]  ;;  %s8629_s0 = sld [smem:[#allocation2 + $0x83]] }
  0x27   :  { %7828 = vmatpush3.bf16.msra.mxu0 %v8107_v2  ;;  %s72_s19 = scalar_lea.vmem %s10348_s2, %s71_s1  ;;  %s75_s15 = scalar_lea.vmem %s10348_s2, %s6676_s20 }
  0x28   :  { %7839 = vmatprep.subr.bf16.mxu0 %v8495_v1  ;;  %v73_v3 = vld [vmem:[%s72_s19] sm:$0x1]  ;;  %s78_s3 = scalar_lea.vmem %s10348_s2, %s6677_s21  ;;  %s81_s9 = scalar_lea.vmem %s10348_s2, %s6678_s22 }
  0x29   :  { %v76_v4 = vld [vmem:[%s75_s15] sm:$0x1]  ;;  %s84_s18 = scalar_lea.vmem %s10348_s2, %s6679_s23  ;;  %s87_s15 = scalar_lea.vmem %s10348_s2, %s6680_s24 }
  0x2a   :  { %v79_v5 = vld [vmem:[%s78_s3] sm:$0x1]  ;;  %v120_v7 = vrot.slane %v76_v4, 7  ;;  %s90_s13 = scalar_lea.vmem %s10348_s2, %s8619_s25  ;;  %s93_s14 = scalar_lea.vmem %s10348_s2, %s8621_s26 }
  0x2b   :  { %v82_v6 = vld [vmem:[%s81_s9] sm:$0x1]  ;;  %v123_v10 = vrot.slane %v79_v5, 6  ;;  %s96_s22 = scalar_lea.vmem %s10348_s2, %s8623_s27  ;;  %s99_s19 = scalar_lea.vmem %s10348_s2, %s8625_s28 }
  0x2c   :  { %v85_v8 = vld [vmem:[%s84_s18] sm:$0x1]  ;;  %v126_v11 = vrot.slane %v82_v6, 5  ;;  %v162_v15 = vsel %vm161_vm1, %v73_v3, %v120_v7  ;;  %s102_s30 = scalar_lea.vmem %s10348_s2, %s8627_s29  ;;  %s105_s16 = scalar_lea.vmem %s10348_s2, %s8629_s0 }
  0x2d   :  { %v88_v9 = vld [vmem:[%s87_s15] sm:$0x1]  ;;  %v129_v14 = vrot.slane %v85_v8, 4  ;;  %v164_v20 = vsel %vm163_vm2, %v162_v15, %v123_v10  ;;  %s6687_s27 = sld [smem:[#allocation2 + $0x84]]  ;;  %s6688_s28 = sld [smem:[#allocation2 + $0x85]] }
  0x2e   :  { %v91_v12 = vld [vmem:[%s90_s13] sm:$0x1]  ;;  %v132_v18 = vrot.slane %v88_v9, 3  ;;  %v166_v23 = vsel %vm165_vm3, %v164_v20, %v126_v11  ;;  %s6689_s17 = sld [smem:[#allocation2 + $0x86]]  ;;  %s6690_s29 = sld [smem:[#allocation2 + $0x87]] }
  0x2f   :  { %v94_v13 = vld [vmem:[%s93_s14] sm:$0x1]  ;;  %v135_v19 = vrot.slane %v91_v12, 2  ;;  %v168_v26 = vsel %vm167_vm4, %v166_v23, %v129_v14  ;;  %s10386_s25 = sld [smem:[#allocation9_spill]]  ;;  %s8498_s1 = smov 64  }
  0x30   :  { %v97_v16 = vld [vmem:[%s96_s22] sm:$0x1]  ;;  %v138_v27 = vrot.slane %v94_v13, 1  ;;  %v170_v29 = vsel %vm169_vm5, %v168_v26, %v132_v18  ;;  %s8499_s18 = smov 88   ;;  %s8505_s0 = smov 72  }
  0x31   :  { %v100_v17 = vld [vmem:[%s99_s19] sm:$0x1]  ;;  %v172_v32 = vsel %vm171_vm6, %v170_v29, %v135_v19  ;;  %s8506_s15 = smov 104   ;;  %s8508_s10 = smov 8  }
  0x32   :  { %v103_v21 = vld [vmem:[%s102_s30] sm:$0x1]  ;;  %v141_v24 = vrot.slane %v100_v17, 7  ;;  %v174_v42 = vsel %vm173_vm7, %v172_v32, %v138_v27  ;;  %s8497_s30 = smov 96   ;;  %s8509_s13 = smov 16  }
  0x33   :  { %v106_v22 = vld [vmem:[%s105_s16] sm:$0x1]  ;;  %v144_v25 = vrot.slane %v103_v21, 6  ;;  %s108_s8 = scalar_lea.vmem %s10348_s2, %s6687_s27  ;;  %s111_s3 = scalar_lea.vmem %s10348_s2, %s6688_s28 }
  0x34   :  { %v147_v28 = vrot.slane %v106_v22, 5  ;;  %v175_v30 = vsel %vm161_vm1, %v97_v16, %v141_v24  ;;  %v109_v33 = vld [vmem:[%s108_s8] sm:$0x1]  ;;  %s114_s20 = scalar_lea.vmem %s10348_s2, %s6689_s17  ;;  %s117_s23 = scalar_lea.vmem %s10348_s2, %s6690_s29 }
  0x35   :  { %v176_v31 = vsel %vm163_vm2, %v175_v30, %v144_v25  ;;  %v112_v35 = vld [vmem:[%s111_s3] sm:$0x1]  ;;  %v150_v37 = vrot.slane %v109_v33, 4  ;;  %s8500_s16 = smov 120   ;;  %s8501_s27 = smov 56  }
  0x36   :  { %v177_v34 = vsel %vm165_vm3, %v176_v31, %v147_v28  ;;  %v115_v36 = vld [vmem:[%s114_s20] sm:$0x1]  ;;  %v153_v40 = vrot.slane %v112_v35, 3  ;;  %s8502_s28 = smov 80   ;;  %s8503_s17 = smov 112  }
  0x37   :  { %v182_v38 = vld [vmem:[%s10386_s25] sm:$0xff]  ;;  %v156_v41 = vrot.slane %v115_v36, 2  ;;  %v178_v44 = vsel %vm167_vm4, %v177_v34, %v150_v37  ;;  %s8504_s29 = smov 48   ;;  %s8507_s8 = smov 40  }
  0x38   :  { %v118_v39 = vld [vmem:[%s117_s23] sm:$0x1]  ;;  %v179_v45 = vsel %vm169_vm5, %v178_v44, %v153_v40  ;;  %v8702_v47 = vadd.f32 %v182_v38, %v174_v42  ;;  %s10373_s21 = smov 24   ;;  %s10387_s26 = sld [smem:[#allocation12_spill]] }
  0x39   :  { %v159_v43 = vrot.slane %v118_v39, 1  ;;  %v180_v46 = vsel %vm171_vm6, %v179_v45, %v156_v41  ;;  %s10388_s25 = sld [smem:[#allocation11_spill]]  ;;  %s10389_s24 = sld [smem:[#allocation13_spill]] }
  0x3a   :  { %s10390_s3 = sld [smem:[#allocation10_spill]]  ;;  %s10391_s22 = sld [smem:[#allocation14_spill]] }
  0x3b   :  { %v181_v48 = vsel %vm173_vm7, %v180_v46, %v159_v43  ;;  %s10392_s2 = sld [smem:[#allocation15_spill]]  ;;  %s10394_s19 = sld [smem:[#allocation16_spill]] }
  0x3c   :  { %v8705_v49 = vadd.f32 %v182_v38, %v181_v48 }
  0x3e   :  { %v195_v50 = vpack.c.bf16 %v8705_v49, %v8702_v47 }
  0x40   :  { %7830 = vmatmul.mubr.msk.bf16.vlgmr.msra.gmra.mrb[0].mxu0 %vm214_vm8, %v195_v50 }
  0x41   :  { %7841 = vmatprep.mubr.msk.bf16.mxu0 %vm8496_vm0, %v8495_v1 }
 0x113   :  { %v252_v52 = vpop.f32.mrb[0].mxu0 }
 0x114   :  { %v253_v53 = vadd.f32 %v6691_v51, %v252_v52  ;;  %v7831_v54 = vpop.f32.mrb[1].mxu0 }
 0x115   :  { %v255_v55 = vpop.f32.mrb[2].mxu0 }
 0x116   :  { %v8715_v56 = vpack.c.bf16 %v253_v53, %v253_v53  ;;  %v256_v57 = vadd.f32 %v6691_v51, %v255_v55  ;;  %v7832_v58 = vpop.f32.mrb[3].mxu0 }
 0x118   :  { %262 = vrot.lane.b32.xlu0 %v8715_v56, %s8497_s30  ;;  %v8719_v59 = vpack.c.bf16 %v256_v57, %v256_v57 }
 0x11c   :  { %312 = vrot.lane.b32.xlu0 %v8719_v59, %s8497_s30 }
 0x18a   :  { %v263_v60 = vpop.permute.xlu0 %262 }
 0x18b   :  { %v269_v61 = vsel %vm264_vm9, %v263_v60, 0 }
 0x18c   :  { %7834 = vmatpush3.bf16.xpose.msra.mxu1 %v269_v61 }
 0x18d   :  { %7845 = vmatprep.subr.bf16.mxu1 %v8495_v1 }
 0x18e   :  { %v313_v62 = vpop.permute.xlu0 %312 }
 0x18f   :  { %v318_v63 = vsel %vm264_vm9, %v313_v62, 0 }
 0x190   :  { %7840 = vmatpush3.bf16.xpose.msra.mxu0 %v318_v63 }
 0x191   :  { %7851 = vmatprep.subr.bf16.mxu0 %v8495_v1 }
 0x193   :  { %7836 = vmatmul.mubr.msk.bf16.vlgmr.msra.gmra.mrb[0].mxu1 %vm264_vm9, %v8715_v56 }
 0x194   :  { %7847 = vmatprep.mubr.msk.bf16.mxu1 %vm8496_vm0, %v8495_v1 }
 0x197   :  { %7842 = vmatmul.mubr.msk.bf16.vlgmr.msra.gmra.mrb[4].mxu0 %vm264_vm9, %v8719_v59 }
 0x198   :  { %7853 = vmatprep.mubr.msk.bf16.mxu0 %vm8496_vm0, %v8495_v1 }
 0x266   :  { %v305_v0 = vpop.f32.mrb[0].mxu1 }
 0x267   :  { %v7837_v2 = vpop.f32.mrb[1].mxu1  ;;  %v360_v3 = vsel %vm264_vm9, %v305_v0, -inf }
 0x268   :  { %361 = vmax.xlane.f32.xlu1 %v360_v3  ;;  %v308_v4 = vpop.f32.mrb[2].mxu1 }
 0x269   :  { %v7838_v5 = vpop.f32.mrb[3].mxu1 }
 0x26a   :  { %v354_v6 = vpop.f32.mrb[4].mxu0 }
 0x26b   :  { %v7843_v7 = vpop.f32.mrb[5].mxu0  ;;  %v363_v8 = vsel %vm264_vm9, %v354_v6, -inf }
 0x26c   :  { %364 = vmax.xlane.f32.xlu1 %v363_v8  ;;  %v357_v9 = vpop.f32.mrb[6].mxu0 }
 0x26d   :  { %v7844_v10 = vpop.f32.mrb[7].mxu0 }
 0x27d   :  { %384 = vrot.lane.b32.xlu1 %v8715_v56, %s8498_s1 }
 0x281   :  { %432 = vrot.lane.b32.xlu1 %v8719_v59, %s8498_s1 }
 0x285   :  { %482 = vrot.lane.b32.xlu1 %v8715_v56, %s8499_s18 }
 0x2f5   :  { %v362_v11 = vpop.xlane.xlu1 %361 }
 0x2f6   :  { %v366_v12 = vsub.f32 %v305_v0, %v362_v11 }
 0x2f8   :  { %v368_v13 = vmul.f32 1.442695, %v366_v12 }
 0x2f9   :  { %v365_v14 = vpop.xlane.xlu1 %364 }
 0x2fa   :  { %8372 = vpow2.f32 %v368_v13  ;;  %v367_v15 = vsub.f32 %v354_v6, %v365_v14 }
 0x2fc   :  { %v370_v16 = vmul.f32 1.442695, %v367_v15 }
 0x2fd   :  { %v385_v17 = vpop.permute.xlu1 %384 }
 0x2fe   :  { %8374 = vpow2.f32 %v370_v16  ;;  %v390_v18 = vsel %vm167_vm4, %v385_v17, 0 }
 0x2ff   :  { %7846 = vmatpush3.bf16.msra.mxu1 %v390_v18 }
 0x300   :  { %7857 = vmatprep.subr.bf16.mxu1 %v8495_v1 }
 0x301   :  { %v433_v19 = vpop.permute.xlu1 %432 }
 0x302   :  { %v438_v20 = vsel %vm167_vm4, %v433_v19, 0 }
 0x303   :  { %7852 = vmatpush3.bf16.msra.mxu0 %v438_v20 }
 0x304   :  { %v8373_v21 = vpop.eup %8372  ;;  %7863 = vmatprep.subr.bf16.mxu0 %v8495_v1 }
 0x305   :  { %v372_v22 = vsel %vm264_vm9, %v8373_v21, 0.0  ;;  %v483_v25 = vpop.permute.xlu1 %482 }
 0x306   :  { %373 = vadd.xlane.f32.xlu0 %v372_v22  ;;  %v488_v32 = vsel %vm264_vm9, %v483_v25, 0 }
 0x308   :  { %v8375_v23 = vpop.eup %8374 }
 0x309   :  { %v375_v24 = vsel %vm264_vm9, %v8375_v23, 0.0 }
 0x30a   :  { %376 = vadd.xlane.f32.xlu1 %v375_v24 }
 0x31b   :  { %532 = vrot.lane.b32.xlu1 %v8719_v59, %s8499_s18 }
 0x31c   :  { %480 = vrot.lane.b32.xlu0 %v8715_v56, %s8500_s16 }
 0x31f   :  { %530 = vrot.lane.b32.xlu1 %v8719_v59, %s8500_s16 }
 0x393   :  { %v374_v26 = vpop.xlane.xlu0 %373 }
 0x394   :  { %8376 = vrcp.f32 %v374_v26 }
 0x397   :  { %v377_v27 = vpop.xlane.xlu1 %376  ;;  %v481_v37 = vpop.permute.xlu0 %480 }
 0x398   :  { %8378 = vrcp.f32 %v377_v27 }
 0x39b   :  { %v533_v34 = vpop.permute.xlu1 %532 }
 0x39c   :  { %v538_v36 = vsel %vm264_vm9, %v533_v34, 0 }
 0x39e   :  { %v8377_v28 = vpop.eup %8376 }
 0x39f   :  { %v380_v29 = vmul.f32 %v8377_v28, %v8373_v21  ;;  %v531_v38 = vpop.permute.xlu1 %530 }
 0x3a1   :  { %v382_v30 = vpack.c.bf16 %v380_v29, %v380_v29 }
 0x3a2   :  { %v8379_v31 = vpop.eup %8378 }
 0x3a3   :  { %v381_v33 = vmul.f32 %v8379_v31, %v8375_v23  ;;  %7848 = vmatmul.mubr.msk.bf16.vlgmr.msra.gmra.mrb[4].mxu1 %vm264_vm9, %v382_v30 }
 0x3a4   :  { %7858 = vmatpush3.bf16.xpose.msra.mxu1 %v488_v32  ;;  %7859 = vmatprep.mubr.msk.bf16.mxu1 %vm8496_vm0, %v8495_v1 }
 0x3a5   :  { %v383_v35 = vpack.c.bf16 %v381_v33, %v381_v33  ;;  %7869 = vmatprep.subr.bf16.mxu1 %v8495_v1 }
 0x3a7   :  { %7854 = vmatmul.mubr.msk.bf16.vlgmr.msra.gmra.mrb[8].mxu0 %vm264_vm9, %v383_v35 }
 0x3a8   :  { %7864 = vmatpush3.bf16.xpose.msra.mxu0 %v538_v36  ;;  %7865 = vmatprep.mubr.msk.bf16.mxu0 %vm8496_vm0, %v8495_v1 }
 0x3a9   :  { %7875 = vmatprep.subr.bf16.mxu0 %v8495_v1 }
 0x3ab   :  { %7860 = vmatmul.mubr.msk.bf16.vlgmr.msra.gmra.mrb[8].mxu1 %vm264_vm9, %v481_v37 }
 0x3ac   :  { %7871 = vmatprep.mubr.msk.bf16.mxu1 %vm8496_vm0, %v8495_v1 }
 0x3af   :  { %7866 = vmatmul.mubr.msk.bf16.vlgmr.msra.gmra.mrb[12].mxu0 %vm264_vm9, %v531_v38 }
 0x3b0   :  { %7877 = vmatprep.mubr.msk.bf16.mxu0 %vm8496_vm0, %v8495_v1 }
 0x476   :  { %v8771_v39 = vpop.f32.mrb[4].mxu1 }
 0x477   :  { %v7849_v40 = vpop.f32.mrb[5].mxu1 }
 0x478   :  { %v429_v41 = vpop.f32.mrb[6].mxu1 }
 0x479   :  { %v7850_v42 = vpop.f32.mrb[7].mxu1 }
 0x47a   :  { %v8773_v43 = vpop.f32.mrb[8].mxu0 }
 0x47b   :  { %v7855_v44 = vpop.f32.mrb[9].mxu0 }
 0x47c   :  { %v477_v45 = vpop.f32.mrb[10].mxu0 }
 0x47d   :  { %v7856_v46 = vpop.f32.mrb[11].mxu0 }
 0x47e   :  { %v524_v48 = vpop.f32.mrb[8].mxu1 }
 0x47f   :  { %v7861_v50 = vpop.f32.mrb[9].mxu1  ;;  %v580_v51 = vsel %vm264_vm9, %v524_v48, -inf }
 0x480   :  { %581 = vmax.xlane.f32.xlu1 %v580_v51  ;;  %v527_v52 = vpop.f32.mrb[10].mxu1 }
 0x481   :  { %v7862_v53 = vpop.f32.mrb[11].mxu1 }
 0x482   :  { %v574_v54 = vpop.f32.mrb[12].mxu0 }
 0x483   :  { %v7867_v55 = vpop.f32.mrb[13].mxu0  ;;  %v583_v57 = vsel %vm264_vm9, %v574_v54, -inf }
 0x484   :  { %584 = vmax.xlane.f32.xlu0 %v583_v57  ;;  %v577_v58 = vpop.f32.mrb[14].mxu0 }
 0x485   :  { %v7868_v60 = vpop.f32.mrb[15].mxu0 }
 0x491   :  { %604 = vrot.lane.b32.xlu1 %v8715_v56, %s8501_s27 }
 0x495   :  { %702 = vrot.lane.b32.xlu1 %v8715_v56, %s8502_s28 }
 0x49a   :  { %652 = vrot.lane.b32.xlu0 %v8719_v59, %s8501_s27 }
 0x49e   :  { %700 = vrot.lane.b32.xlu0 %v8715_v56, %s8503_s17 }
 0x50d   :  { %v582_v61 = vpop.xlane.xlu1 %581 }
 0x50e   :  { %v586_v62 = vsub.f32 %v524_v48, %v582_v61 }
 0x510   :  { %v588_v63 = vmul.f32 1.442695, %v586_v62 }
 0x511   :  { %v605_v0 = vpop.permute.xlu1 %604  ;;  %v585_v2 = vpop.xlane.xlu0 %584 }
 0x512   :  { %8380 = vpow2.f32 %v588_v63  ;;  %v610_v3 = vsel %vm167_vm4, %v605_v0, 0  ;;  %v587_v4 = vsub.f32 %v574_v54, %v585_v2 }
 0x513   :  { %7870 = vmatpush3.bf16.msra.mxu1 %v610_v3 }
 0x514   :  { %v590_v5 = vmul.f32 1.442695, %v587_v4  ;;  %7881 = vmatprep.subr.bf16.mxu1 %v8495_v1 }
 0x515   :  { %v653_v6 = vpop.permute.xlu0 %652  ;;  %v703_v12 = vpop.permute.xlu1 %702 }
 0x516   :  { %8382 = vpow2.f32 %v590_v5  ;;  %v658_v7 = vsel %vm167_vm4, %v653_v6, 0  ;;  %v708_v19 = vsel %vm264_vm9, %v703_v12, 0 }
 0x517   :  { %7876 = vmatpush3.bf16.msra.mxu0 %v658_v7 }
 0x518   :  { %7887 = vmatprep.subr.bf16.mxu0 %v8495_v1 }
 0x519   :  { %v701_v24 = vpop.permute.xlu0 %700 }
 0x51c   :  { %v8381_v8 = vpop.eup %8380 }
 0x51d   :  { %v592_v9 = vsel %vm264_vm9, %v8381_v8, 0.0 }
 0x51e   :  { %593 = vadd.xlane.f32.xlu1 %v592_v9 }
 0x520   :  { %v8383_v10 = vpop.eup %8382 }
 0x521   :  { %v595_v11 = vsel %vm264_vm9, %v8383_v10, 0.0 }
 0x522   :  { %596 = vadd.xlane.f32.xlu1 %v595_v11 }
 0x533   :  { %752 = vrot.lane.b32.xlu1 %v8719_v59, %s8502_s28 }
 0x537   :  { %750 = vrot.lane.b32.xlu1 %v8719_v59, %s8503_s17 }
 0x5ab   :  { %v594_v13 = vpop.xlane.xlu1 %593 }
 0x5ac   :  { %8384 = vrcp.f32 %v594_v13 }
 0x5af   :  { %v597_v14 = vpop.xlane.xlu1 %596 }
 0x5b0   :  { %8386 = vrcp.f32 %v597_v14 }
 0x5b3   :  { %v753_v21 = vpop.permute.xlu1 %752 }
 0x5b4   :  { %v758_v23 = vsel %vm264_vm9, %v753_v21, 0 }
 0x5b6   :  { %v8385_v15 = vpop.eup %8384 }
 0x5b7   :  { %v600_v16 = vmul.f32 %v8385_v15, %v8381_v8  ;;  %v751_v25 = vpop.permute.xlu1 %750 }
 0x5b9   :  { %v602_v17 = vpack.c.bf16 %v600_v16, %v600_v16 }
 0x5ba   :  { %v8387_v18 = vpop.eup %8386 }
 0x5bb   :  { %v601_v20 = vmul.f32 %v8387_v18, %v8383_v10  ;;  %7872 = vmatmul.mubr.msk.bf16.vlgmr.msra.gmra.mrb[12].mxu1 %vm264_vm9, %v602_v17 }
 0x5bc   :  { %7882 = vmatpush3.bf16.xpose.msra.mxu1 %v708_v19  ;;  %7883 = vmatprep.mubr.msk.bf16.mxu1 %vm8496_vm0, %v8495_v1 }
 0x5bd   :  { %v603_v22 = vpack.c.bf16 %v601_v20, %v601_v20  ;;  %7893 = vmatprep.subr.bf16.mxu1 %v8495_v1 }
 0x5bf   :  { %7878 = vmatmul.mubr.msk.bf16.vlgmr.msra.gmra.mrb[16].mxu0 %vm264_vm9, %v603_v22 }
 0x5c0   :  { %7888 = vmatpush3.bf16.xpose.msra.mxu0 %v758_v23  ;;  %7889 = vmatprep.mubr.msk.bf16.mxu0 %vm8496_vm0, %v8495_v1 }
 0x5c1   :  { %7899 = vmatprep.subr.bf16.mxu0 %v8495_v1 }
 0x5c3   :  { %7884 = vmatmul.mubr.msk.bf16.vlgmr.msra.gmra.mrb[16].mxu1 %vm264_vm9, %v701_v24 }
 0x5c4   :  { %7895 = vmatprep.mubr.msk.bf16.mxu1 %vm8496_vm0, %v8495_v1 }
 0x5c7   :  { %7890 = vmatmul.mubr.msk.bf16.vlgmr.msra.gmra.mrb[20].mxu0 %vm264_vm9, %v751_v25 }
 0x5c8   :  { %7901 = vmatprep.mubr.msk.bf16.mxu0 %vm8496_vm0, %v8495_v1 }
 0x68e   :  { %v8811_v26 = vpop.f32.mrb[12].mxu1 }
 0x68f   :  { %v7873_v27 = vpop.f32.mrb[13].mxu1 }
 0x690   :  { %v649_v28 = vpop.f32.mrb[14].mxu1 }
 0x691   :  { %v7874_v29 = vpop.f32.mrb[15].mxu1 }
 0x692   :  { %v8813_v30 = vpop.f32.mrb[16].mxu0 }
 0x693   :  { %v8076_v31 = vpack.i.bf16 %v8813_v30, %v8811_v26  ;;  %v7879_v32 = vpop.f32.mrb[17].mxu0 }
 0x694   :  { %v697_v33 = vpop.f32.mrb[18].mxu0 }
 0x695   :  { %v7880_v34 = vpop.f32.mrb[19].mxu0 }
 0x696   :  { %v744_v35 = vpop.f32.mrb[16].mxu1 }
 0x697   :  { %v7885_v36 = vpop.f32.mrb[17].mxu1  ;;  %v800_v37 = vsel %vm264_vm9, %v744_v35, -inf }
 0x698   :  { %801 = vmax.xlane.f32.xlu0 %v800_v37  ;;  %v747_v38 = vpop.f32.mrb[18].mxu1 }
 0x699   :  { %v7886_v40 = vpop.f32.mrb[19].mxu1 }
 0x69a   :  { %v794_v41 = vpop.f32.mrb[20].mxu0 }
 0x69b   :  { %v7891_v42 = vpop.f32.mrb[21].mxu0  ;;  %v803_v44 = vsel %vm264_vm9, %v794_v41, -inf }
 0x69c   :  { %804 = vmax.xlane.f32.xlu1 %v803_v44  ;;  %v797_v45 = vpop.f32.mrb[22].mxu0 }
 0x69d   :  { %v7892_v46 = vpop.f32.mrb[23].mxu0 }
 0x6ad   :  { %824 = vrot.lane.b32.xlu1 %v8715_v56, %s8504_s29 }
 0x6b1   :  { %922 = vrot.lane.b32.xlu1 %v8715_v56, %s8505_s0 }
 0x6b5   :  { %972 = vrot.lane.b32.xlu1 %v8719_v59, %s8505_s0 }
 0x6b9   :  { %970 = vrot.lane.b32.xlu1 %v8719_v59, %s8506_s15 }
 0x725   :  { %v802_v48 = vpop.xlane.xlu0 %801 }
 0x726   :  { %v806_v50 = vsub.f32 %v744_v35, %v802_v48 }
 0x728   :  { %v808_v51 = vmul.f32 1.442695, %v806_v50 }
 0x729   :  { %v805_v52 = vpop.xlane.xlu1 %804 }
 0x72a   :  { %8388 = vpow2.f32 %v808_v51  ;;  %v807_v53 = vsub.f32 %v794_v41, %v805_v52 }
 0x72c   :  { %v810_v54 = vmul.f32 1.442695, %v807_v53 }
 0x72d   :  { %v825_v55 = vpop.permute.xlu1 %824 }
 0x72e   :  { %8390 = vpow2.f32 %v810_v54  ;;  %v830_v57 = vsel %vm167_vm4, %v825_v55, 0 }
 0x72f   :  { %7894 = vmatpush3.bf16.msra.mxu1 %v830_v57 }
 0x730   :  { %7905 = vmatprep.subr.bf16.mxu1 %v8495_v1 }
 0x731   :  { %v923_v5 = vpop.permute.xlu1 %922 }
 0x732   :  { %v928_v9 = vsel %vm264_vm9, %v923_v5, 0 }
 0x734   :  { %v8389_v58 = vpop.eup %8388 }
 0x735   :  { %v812_v60 = vsel %vm264_vm9, %v8389_v58, 0.0  ;;  %v973_v11 = vpop.permute.xlu1 %972 }
 0x736   :  { %813 = vadd.xlane.f32.xlu0 %v812_v60  ;;  %v978_v13 = vsel %vm264_vm9, %v973_v11, 0 }
 0x738   :  { %v8391_v61 = vpop.eup %8390 }
 0x739   :  { %v815_v62 = vsel %vm264_vm9, %v8391_v61, 0.0  ;;  %v971_v15 = vpop.permute.xlu1 %970 }
 0x73a   :  { %816 = vadd.xlane.f32.xlu0 %v815_v62  ;;  %v8109_v62 = vld [vmem:[%s10351_s5 + $0x8] sm:$0xff]  }
 0x750   :  { %872 = vrot.lane.b32.xlu0 %v8719_v59, %s8504_s29 }
 0x754   :  { %920 = vrot.lane.b32.xlu0 %v8715_v56, %s8506_s15 }
 0x7c3   :  { %v814_v63 = vpop.xlane.xlu0 %813 }
 0x7c4   :  { %8392 = vrcp.f32 %v814_v63 }
 0x7c7   :  { %v817_v0 = vpop.xlane.xlu0 %816 }
 0x7c8   :  { %8394 = vrcp.f32 %v817_v0 }
 0x7cb   :  { %v873_v2 = vpop.permute.xlu0 %872 }
 0x7cc   :  { %v878_v3 = vsel %vm167_vm4, %v873_v2, 0 }
 0x7cd   :  { %7900 = vmatpush3.bf16.msra.mxu0 %v878_v3 }
 0x7ce   :  { %v8393_v4 = vpop.eup %8392  ;;  %7911 = vmatprep.subr.bf16.mxu0 %v8495_v1 }
 0x7cf   :  { %v820_v6 = vmul.f32 %v8393_v4, %v8389_v58  ;;  %v921_v14 = vpop.permute.xlu0 %920 }
 0x7d1   :  { %v822_v7 = vpack.c.bf16 %v820_v6, %v820_v6 }
 0x7d2   :  { %v8395_v8 = vpop.eup %8394 }
 0x7d3   :  { %v821_v10 = vmul.f32 %v8395_v8, %v8391_v61  ;;  %7896 = vmatmul.mubr.msk.bf16.vlgmr.msra.gmra.mrb[20].mxu1 %vm264_vm9, %v822_v7 }
 0x7d4   :  { %7906 = vmatpush3.bf16.xpose.msra.mxu1 %v928_v9  ;;  %7907 = vmatprep.mubr.msk.bf16.mxu1 %vm8496_vm0, %v8495_v1 }
 0x7d5   :  { %v823_v12 = vpack.c.bf16 %v821_v10, %v821_v10  ;;  %7917 = vmatprep.subr.bf16.mxu1 %v8495_v1 }
 0x7d7   :  { %7902 = vmatmul.mubr.msk.bf16.vlgmr.msra.gmra.mrb[24].mxu0 %vm264_vm9, %v823_v12 }
 0x7d8   :  { %7912 = vmatpush3.bf16.xpose.msra.mxu0 %v978_v13  ;;  %7913 = vmatprep.mubr.msk.bf16.mxu0 %vm8496_vm0, %v8495_v1 }
 0x7d9   :  { %7923 = vmatprep.subr.bf16.mxu0 %v8495_v1 }
 0x7db   :  { %7908 = vmatmul.mubr.msk.bf16.vlgmr.msra.gmra.mrb[24].mxu1 %vm264_vm9, %v921_v14 }
 0x7dc   :  { %7919 = vmatprep.mubr.msk.bf16.mxu1 %vm8496_vm0, %v8495_v1 }
 0x7df   :  { %7914 = vmatmul.mubr.msk.bf16.vlgmr.msra.gmra.mrb[28].mxu0 %vm264_vm9, %v971_v15 }
 0x7e0   :  { %7925 = vmatprep.mubr.msk.bf16.mxu0 %vm8496_vm0, %v8495_v1 }
 0x8a6   :  { %v866_v16 = vpop.f32.mrb[20].mxu1 }
 0x8a7   :  { %v7897_v17 = vpop.f32.mrb[21].mxu1 }
 0x8a8   :  { %v869_v18 = vpop.f32.mrb[22].mxu1 }
 0x8a9   :  { %v7898_v19 = vpop.f32.mrb[23].mxu1 }
 0x8aa   :  { %v914_v20 = vpop.f32.mrb[24].mxu0 }
 0x8ab   :  { %v8081_v21 = vpack.i.bf16 %v914_v20, %v866_v16  ;;  %v7903_v22 = vpop.f32.mrb[25].mxu0 }
 0x8ac   :  { %v917_v23 = vpop.f32.mrb[26].mxu0 }
 0x8ad   :  { %v7904_v24 = vpop.f32.mrb[27].mxu0 }
 0x8ae   :  { %v964_v25 = vpop.f32.mrb[24].mxu1 }
 0x8af   :  { %v7909_v27 = vpop.f32.mrb[25].mxu1  ;;  %v1020_v28 = vsel %vm264_vm9, %v964_v25, -inf }
 0x8b0   :  { %1021 = vmax.xlane.f32.xlu0 %v1020_v28  ;;  %v967_v29 = vpop.f32.mrb[26].mxu1 }
 0x8b1   :  { %v7910_v32 = vpop.f32.mrb[27].mxu1 }
 0x8b2   :  { %v1014_v33 = vpop.f32.mrb[28].mxu0 }
 0x8b3   :  { %v7915_v34 = vpop.f32.mrb[29].mxu0  ;;  %v1023_v35 = vsel %vm264_vm9, %v1014_v33, -inf }
 0x8b4   :  { %1024 = vmax.xlane.f32.xlu1 %v1023_v35  ;;  %v1017_v36 = vpop.f32.mrb[30].mxu0 }
 0x8b5   :  { %v7916_v37 = vpop.f32.mrb[31].mxu0 }
 0x8c5   :  { %1044 = vrot.lane.b32.xlu1 %v8715_v56, %s8507_s8 }
 0x8c9   :  { %8077 = vrot.lane.b32.xlu1 %v8076_v31, %s8508_s10 }
 0x8cd   :  { %8082 = vrot.lane.b32.xlu1 %v8081_v21, %s8509_s13 }
 0x93d   :  { %v1022_v38 = vpop.xlane.xlu0 %1021 }
 0x93e   :  { %v1026_v40 = vsub.f32 %v964_v25, %v1022_v38 }
 0x940   :  { %v1028_v41 = vmul.f32 1.442695, %v1026_v40 }
 0x941   :  { %v1025_v42 = vpop.xlane.xlu1 %1024 }
 0x942   :  { %8396 = vpow2.f32 %v1028_v41  ;;  %v1027_v44 = vsub.f32 %v1014_v33, %v1025_v42 }
 0x944   :  { %v1030_v45 = vmul.f32 1.442695, %v1027_v44 }
 0x945   :  { %v1045_v46 = vpop.permute.xlu1 %1044 }
 0x946   :  { %8398 = vpow2.f32 %v1030_v45  ;;  %v1050_v56 = vsel %vm167_vm4, %v1045_v46, 0 }
 0x947   :  { %7918 = vmatpush3.bf16.msra.mxu1 %v1050_v56 }
 0x948   :  { %7929 = vmatprep.subr.bf16.mxu1 %v8495_v1 }
 0x949   :  { %v8078_v9 = vpop.permute.xlu1 %8077 }
 0x94a   :  { %v8080_v11 = vunpack.i.h.bf16 %v8078_v9  ;;  %v8079_v12 = vunpack.i.l.bf16 %v8078_v9 }
 0x94c   :  { %v8397_v48 = vpop.eup %8396  ;;  %v1165_v16 = vsel %vm264_vm9, %v8773_v43, %v8080_v11  ;;  %v1164_v17 = vsel %vm264_vm9, %v8771_v39, %v8079_v12  ;;  %v6711_v43 = vld [vmem:[%s10352_s6] ss:$0 sm:$0xff] }
 0x94d   :  { %v1032_v26 = vsel %vm264_vm9, %v8397_v48, 0.0  ;;  %v8083_v10 = vpop.permute.xlu1 %8082 }
 0x94e   :  { %1033 = vadd.xlane.f32.xlu0 %v1032_v26  ;;  %v8085_v13 = vunpack.i.h.bf16 %v8083_v10  ;;  %v8084_v14 = vunpack.i.l.bf16 %v8083_v10  ;;  %v1284_v26 = vld [vmem:[%s10353_s7 + $0x8] sm:$0xff] }
 0x950   :  { %v8399_v30 = vpop.eup %8398  ;;  %v1167_v20 = vsel %vm1166_vm10, %v1164_v17, %v8084_v14  ;;  %v1168_v21 = vsel %vm1166_vm10, %v1165_v16, %v8085_v13 }
 0x951   :  { %v1035_v31 = vsel %vm264_vm9, %v8399_v30, 0.0 }
 0x952   :  { %1036 = vadd.xlane.f32.xlu0 %v1035_v31  ;;  %v1292_v31 = vld [vmem:[%s10353_s7 + $0x48] sm:$0xff] }
 0x968   :  { %1092 = vrot.lane.b32.xlu0 %v8719_v59, %s8507_s8  ;;  %v8108_v59 = vld [vmem:[%s10351_s5] sm:$0xff]  }
 0x9db   :  { %v1034_v50 = vpop.xlane.xlu0 %1033 }
 0x9dc   :  { %8400 = vrcp.f32 %v1034_v50 }
 0x9df   :  { %v1037_v51 = vpop.xlane.xlu0 %1036 }
 0x9e0   :  { %8402 = vrcp.f32 %v1037_v51  ;;  %v6719_v51 = vcombine.low %v1284_v26, %v1292_v31 }
 0x9e3   :  { %v1093_v52 = vpop.permute.xlu0 %1092 }
 0x9e4   :  { %v1098_v53 = vsel %vm167_vm4, %v1093_v52, 0  ;;  %v6720_v52 = vcombine.high %v1284_v26, %v1292_v31  ;;  %v1297_v26 = vld [vmem:[%s10353_s7 + $0x70] sm:$0xff]  ;;  %v1298_v31 = vld [vmem:[%s10353_s7 + $0x78] sm:$0xff] }
 0x9e5   :  { %7924 = vmatpush3.bf16.msra.mxu0 %v1098_v53  ;;  %v1299_v53 = vld [vmem:[%s10353_s7 + $0x80] sm:$0xff] }
 0x9e6   :  { %v8401_v54 = vpop.eup %8400 }
 0x9e7   :  { %v1040_v55 = vmul.f32 %v8401_v54, %v8397_v48  ;;  %v1291_v48 = vld [vmem:[%s10353_s7 + $0x40] sm:$0xff] }
 0x9e8   :  { %v1307_v54 = vld [vmem:[%s10353_s7 + $0xc0] sm:$0xff] }
 0x9e9   :  { %v1042_v57 = vpack.c.bf16 %v1040_v55, %v1040_v55  ;;  %v1300_v55 = vld [vmem:[%s10353_s7 + $0x88] sm:$0xff] }
 0x9ea   :  { %v8403_v58 = vpop.eup %8402 }
 0x9eb   :  { %v1041_v60 = vmul.f32 %v8403_v58, %v8399_v30  ;;  %7920 = vmatmul.mubr.msk.bf16.vlgmr.msra.gmra.mrb[28].mxu1 %vm264_vm9, %v1042_v57  ;;  %v6734_v57 = vcombine.high %v1299_v53, %v1307_v54  ;;  %v1308_v58 = vld [vmem:[%s10353_s7 + $0xc8] sm:$0xff] }
 0x9ec   :  { %7933 = vmatprep.mubr.msk.bf16.mxu1 %vm8496_vm0, %v8495_v1  ;;  %7930 = vmatpush3.bf16.msra.mxu1 %v8108_v59  ;;  %v6736_v59 = vcombine.high %v1300_v55, %v1308_v58 }
 0x9ed   :  { %v1043_v61 = vpack.c.bf16 %v1041_v60, %v1041_v60  ;;  %7931 = vmatprep.subr.bf16.mxu1 %v8495_v1  ;;  %v6733_v60 = vcombine.low %v1299_v53, %v1307_v54  ;;  %v1305_v54 = vld [vmem:[%s10353_s7 + $0xb0] sm:$0xff] }
 0x9ef   :  { %7926 = vmatmul.mubr.msk.bf16.vlgmr.msra.gmra.mrb[32].mxu0 %vm264_vm9, %v1043_v61  ;;  %v6735_v61 = vcombine.low %v1300_v55, %v1308_v58  ;;  %v1313_v55 = vld [vmem:[%s10353_s7 + $0xf0] sm:$0xff]  ;;  %v1314_v58 = vld [vmem:[%s10353_s7 + $0xf8] sm:$0xff] }
 0x9f0   :  { %7932 = vmatpush3.bf16.msra.mxu1 %v8109_v62  ;;  %v1285_v62 = vld [vmem:[%s10353_s7 + $0x10] sm:$0xff] }
 0x9f1   :  { %1605 = vmatprep.subr.bf16.mxu1 %v6720_v52 }
 0xabe   :  { %v1086_v63 = vpop.f32.mrb[28].mxu1 }
 0xabf   :  { %v7921_v0 = vpop.f32.mrb[29].mxu1 }
 0xac0   :  { %v1089_v2 = vpop.f32.mrb[30].mxu1  ;;  %v1286_v0 = vld [vmem:[%s10353_s7 + $0x18] sm:$0xff] }
 0xac1   :  { %v7922_v3 = vpop.f32.mrb[31].mxu1  ;;  %v8511_v2 = vmov 0  }
 0xac2   :  { %v1134_v4 = vpop.f32.mrb[32].mxu0  ;;  %1594 = vmatprep.mubr.bf16.mxu0 %v8511_v2 }
 0xac3   :  { %v8086_v5 = vpack.i.bf16 %v1134_v4, %v1086_v63  ;;  %v7927_v6 = vpop.f32.mrb[33].mxu0  ;;  %v1293_v63 = vld [vmem:[%s10353_s7 + $0x50] sm:$0xff]  ;;  %v1294_v4 = vld [vmem:[%s10353_s7 + $0x58] sm:$0xff] }
 0xac4   :  { %v1137_v7 = vpop.f32.mrb[34].mxu0  ;;  %v6722_v3 = vcombine.high %v1285_v62, %v1293_v63  ;;  %v6723_v6 = vcombine.low %v1286_v0, %v1294_v4 }
 0xac5   :  { %8087 = vrot.lane.b32.xlu0 %v8086_v5, %s10373_s21  ;;  %v7928_v8 = vpop.f32.mrb[35].mxu0  ;;  %v6721_v5 = vcombine.low %v1285_v62, %v1293_v63  ;;  %v6724_v7 = vcombine.high %v1286_v0, %v1294_v4  ;;  %v6745_v63 = vcombine.low %v1305_v54, %v1313_v55  ;;  %v8111_v4 = vld [vmem:[%s10387_s26 + $0xc0] sm:$0xff]  }
 0xb37   :  { %v8088_v15 = vpop.permute.xlu0 %8087 }
 0xb38   :  { %v8090_v18 = vunpack.i.h.bf16 %v8088_v15  ;;  %v8089_v19 = vunpack.i.l.bf16 %v8088_v15  ;;  %v6715_v15 = vld [vmem:[%s10357_s11] ss:$0 sm:$0xff] }
 0xb3a   :  { %v1171_v22 = vsel %vm1169_vm11, %v1168_v21, %v8090_v18  ;;  %v1170_v23 = vsel %vm1169_vm11, %v1167_v20, %v8089_v19  ;;  %v6716_v20 = vld [vmem:[%s10358_s12] ss:$0 sm:$0xff] }
 0xb3b   :  { %v1172_v24 = vpack.c.bf16 %v1171_v22, %v1170_v23  ;;  %v1301_v22 = vld [vmem:[%s10353_s7 + $0x90] sm:$0xff] }
 0xb3c   :  { %v1309_v23 = vld [vmem:[%s10353_s7 + $0xd0] sm:$0xff] }
 0xb3d   :  { %7934 = vmatmul.mubr.msk.bf16.vlgmr.msra.gmra.mrb[32].mxu1 %vm214_vm8, %v1172_v24  ;;  %v1302_v24 = vld [vmem:[%s10353_s7 + $0x98] sm:$0xff] }
 0xb3e   :  { %1606 = vmatpush1.bf16.msra.mxu1 %v6719_v51  ;;  %1637 = vmatprep.mubr.bf16.mxu1 %v8511_v2 }
 0xb3f   :  { %1607 = vmatprep.subr.bf16.mxu1 %v6736_v59  ;;  %v6746_v59 = vcombine.high %v1305_v54, %v1313_v55 }
 0xb42   :  { %1608 = vmatpush1.bf16.msra.mxu1 %v6735_v61 }
 0xb43   :  { %1691 = vmatprep.subr.bf16.mxu1 %v6724_v7  ;;  %v8114_v7 = vld [vmem:[%s10387_s26 + $0x48] sm:$0xff]  }
 0xc10   :  { %v1228_v25 = vpop.f32.mrb[32].mxu1 }
 0xc11   :  { %v1229_v27 = vadd.f32 %v6711_v43, %v1228_v25  ;;  %v7935_v39 = vpop.f32.mrb[33].mxu1 }
 0xc12   :  { %v1231_v28 = vpop.f32.mrb[34].mxu1 }
 0xc13   :  { %v1232_v29 = vadd.f32 %v6711_v43, %v1231_v28  ;;  %v7936_v32 = vpop.f32.mrb[35].mxu1  ;;  %v1235_v33 = vadd.f32 %v1229_v27, %v8702_v47  ;;  %v1310_v43 = vld [vmem:[%s10353_s7 + $0xd8] sm:$0xff]  ;;  %v6738_v28 = vcombine.high %v1301_v22, %v1309_v23 }
 0xc14   :  { %v1287_v32 = vld [vmem:[%s10353_s7 + $0x20] sm:$0xff] }
 0xc15   :  { %v1237_v34 = vsel %vm214_vm8, %v1235_v33, 0.0  ;;  %v1236_v35 = vadd.f32 %v1232_v29, %v8705_v49  ;;  %v1283_v49 = vld [vmem:[%s10353_s7] sm:$0xff]  ;;  %v6740_v29 = vcombine.high %v1302_v24, %v1310_v43 }
 0xc16   :  { %1238 = vadd.xlane.f32.xlu1 %v1237_v34  ;;  %v6718_v30 = vcombine.high %v1283_v49, %v1291_v48  ;;  %v6717_v50 = vcombine.low %v1283_v49, %v1291_v48  ;;  %v1288_v34 = vld [vmem:[%s10353_s7 + $0x28] sm:$0xff]  ;;  %v1289_v48 = vld [vmem:[%s10353_s7 + $0x30] sm:$0xff] }
 0xc17   :  { %v1240_v36 = vsel %vm214_vm8, %v1236_v35, 0.0  ;;  %v6730_v52 = vcombine.high %v1289_v48, %v1297_v26 }
 0xc18   :  { %1241 = vadd.xlane.f32.xlu0 %v1240_v36  ;;  %1562 = vmatprep.subr.bf16.mxu0 %v6718_v30  ;;  %v6737_v36 = vcombine.low %v1301_v22, %v1309_v23  ;;  %v1290_v30 = vld [vmem:[%s10353_s7 + $0x38] sm:$0xff]  ;;  %v8129_v22 = vld [vmem:[%s10387_s26 + $0xa0] sm:$0xff]   ;;  %v8130_v23 = vld [vmem:[%s10387_s26 + $0x68] sm:$0xff]  }
 0xc19   :  { %1563 = vmatpush1.bf16.msra.mxu0 %v6717_v50  ;;  %v6732_v53 = vcombine.high %v1290_v30, %v1298_v31  ;;  %v6731_v61 = vcombine.low %v1290_v30, %v1298_v31 }
 0xc1a   :  { %1564 = vmatprep.subr.bf16.mxu0 %v6734_v57  ;;  %v1306_v57 = vld [vmem:[%s10353_s7 + $0xb8] sm:$0xff] }
 0xc1b   :  { %v6748_v62 = vcombine.high %v1306_v57, %v1314_v58  ;;  %v6747_v0 = vcombine.low %v1306_v57, %v1314_v58 }
 0xc1d   :  { %1565 = vmatpush1.bf16.msra.mxu0 %v6733_v60  ;;  %v6729_v60 = vcombine.low %v1289_v48, %v1297_v26 }
 0xc1e   :  { %1648 = vmatprep.subr.bf16.mxu0 %v6722_v3  ;;  %v8110_v3 = vld [vmem:[%s10387_s26 + $0x40] sm:$0xff]  }
 0xca3   :  { %v1239_v37 = vpop.xlane.xlu1 %1238 }
 0xca4   :  { %v1244_v38 = vmul.f32 0.03125, %v1239_v37  ;;  %v6739_v37 = vcombine.low %v1302_v24, %v1310_v43  ;;  %v8131_v24 = vld [vmem:[%s10387_s26 + $0xe8] sm:$0xff]  }
 0xca5   :  { %v1242_v40 = vpop.xlane.xlu0 %1241  ;;  %v8132_v43 = vld [vmem:[%s10387_s26 + $0x28] sm:$0xff]  }
 0xca6   :  { %v1246_v41 = vsub.f32 %v1235_v33, %v1244_v38  ;;  %v1245_v42 = vmul.f32 0.03125, %v1242_v40  ;;  %v1295_v33 = vld [vmem:[%s10353_s7 + $0x60] sm:$0xff] }
 0xca7   :  { %v6726_v38 = vcombine.high %v1287_v32, %v1295_v33 }
 0xca8   :  { %v1247_v44 = vsub.f32 %v1236_v35, %v1245_v42  ;;  %v1248_v45 = vmul.f32 %v1246_v41, %v1246_v41  ;;  %v1296_v35 = vld [vmem:[%s10353_s7 + $0x68] sm:$0xff]  ;;  %v1311_v42 = vld [vmem:[%s10353_s7 + $0xe0] sm:$0xff] }
 0xca9   :  { %v6728_v40 = vcombine.high %v1288_v34, %v1296_v35 }
 0xcaa   :  { %v1250_v46 = vsel %vm214_vm8, %v1248_v45, 0.0  ;;  %v1249_v56 = vmul.f32 %v1247_v44, %v1247_v44  ;;  %v1312_v45 = vld [vmem:[%s10353_s7 + $0xe8] sm:$0xff] }
 0xcab   :  { %1251 = vadd.xlane.f32.xlu0 %v1250_v46  ;;  %v6725_v46 = vcombine.low %v1287_v32, %v1295_v33  ;;  %v8136_v32 = vld [vmem:[%s10387_s26 + $0x30] sm:$0xff]  }
 0xcac   :  { %v1253_v47 = vsel %vm214_vm8, %v1249_v56, 0.0  ;;  %v6727_v56 = vcombine.low %v1288_v34, %v1296_v35  ;;  %v8137_v33 = vld [vmem:[%s10387_s26 + $0xb0] sm:$0xff]   ;;  %v8138_v34 = vld [vmem:[%s10387_s26 + $0x78] sm:$0xff]  }
 0xcad   :  { %1254 = vadd.xlane.f32.xlu1 %v1253_v47  ;;  %v8139_v35 = vld [vmem:[%s10387_s26 + $0xf8] sm:$0xff]  }
 0xd38   :  { %v1252_v8 = vpop.xlane.xlu0 %1251 }
 0xd39   :  { %v1256_v9 = vmul.f32 0.03125, %v1252_v8  ;;  %v8115_v8 = vld [vmem:[%s10387_s26 + $0xc8] sm:$0xff]  }
 0xd3a   :  { %v1255_v10 = vpop.xlane.xlu1 %1254 }
 0xd3b   :  { %v1258_v11 = vadd.f32 1e-05, %v1256_v9  ;;  %v1257_v12 = vmul.f32 0.03125, %v1255_v10  ;;  %v8116_v9 = vld [vmem:[%s10387_s26 + $0x8] sm:$0xff]  }
 0xd3c   :  { %v8117_v10 = vld [vmem:[%s10387_s26 + $0x88] sm:$0xff]  }
 0xd3d   :  { %8404 = vrsqrt.f32 %v1258_v11  ;;  %v1259_v13 = vadd.f32 1e-05, %v1257_v12  ;;  %v8118_v11 = vld [vmem:[%s10387_s26 + $0x50] sm:$0xff]  }
 0xd3e   :  { %v8119_v12 = vld [vmem:[%s10387_s26 + $0xd0] sm:$0xff]  }
 0xd3f   :  { %8406 = vrsqrt.f32 %v1259_v13  ;;  %v8120_v13 = vld [vmem:[%s10387_s26 + $0x10] sm:$0xff]  }
 0xd47   :  { %v8405_v14 = vpop.eup %8404 }
 0xd48   :  { %v1262_v16 = vmul.f32 %v8405_v14, %v1246_v41  ;;  %v1303_v41 = vld [vmem:[%s10353_s7 + $0xa0] sm:$0xff]  ;;  %v8121_v14 = vld [vmem:[%s10387_s26 + $0x90] sm:$0xff]  }
 0xd49   :  { %v8407_v17 = vpop.eup %8406  ;;  %v6742_v47 = vcombine.high %v1303_v41, %v1311_v42  ;;  %v6741_v50 = vcombine.low %v1303_v41, %v1311_v42  ;;  %v1319_v41 = vlaneseq }
 0xd4a   :  { %v1271_v18 = vmul.f32 %v6715_v15, %v1262_v16  ;;  %v1263_v19 = vmul.f32 %v8407_v17, %v1247_v44  ;;  %v1304_v44 = vld [vmem:[%s10353_s7 + $0xa8] sm:$0xff]  ;;  %v8123_v16 = vld [vmem:[%s10387_s26 + $0xd8] sm:$0xff]  }
 0xd4b   :  { %v6744_v49 = vcombine.high %v1304_v44, %v1312_v45  ;;  %v6743_v51 = vcombine.low %v1304_v44, %v1312_v45  ;;  %v8124_v17 = vld [vmem:[%s10387_s26 + $0x18] sm:$0xff]   ;;  %v1320_v42 = vshrl.u32 %v1319_v41, 7 }
 0xd4c   :  { %v1272_v21 = vmul.f32 %v6715_v15, %v1263_v19  ;;  %v8955_v25 = vadd.f32 %v6716_v20, %v1271_v18  ;;  %v8122_v15 = vld [vmem:[%s10387_s26 + $0x58] sm:$0xff]   ;;  %v8126_v19 = vld [vmem:[%s10387_s26 + $0x60] sm:$0xff]  }
 0xd4d   :  { %v8125_v18 = vld [vmem:[%s10387_s26 + $0x98] sm:$0xff]   ;;  %v9135_v44 = vsub.s32 0, %v1320_v42  ;;  %v9137_v45 = vsub.s32 2, %v1320_v42  ;;  %v9150_v31 = vsub.s32 4, %v1320_v42  ;;  %v9156_v54 = vsub.s32 7, %v1320_v42 }
 0xd4e   :  { %v8957_v27 = vadd.f32 %v6716_v20, %v1272_v21  ;;  %v8127_v20 = vld [vmem:[%s10387_s26 + $0xe0] sm:$0xff]  }
 0xd4f   :  { %v8128_v21 = vld [vmem:[%s10387_s26 + $0x20] sm:$0xff]  }
 0xd50   :  { %v8961_v39 = vpack.c.bf16 %v8957_v27, %v8955_v25 }
 0xd52   :  { %6749 = vmatmul.mubr.msk.bf16.vlgmr.msra.gmra.mrb[36].mxu0 %vm214_vm8, %v8961_v39  ;;  %6750 = vmatmul.mubr.msk.bf16.vlgmr.msra.gmra.mrb[36].mxu1 %vm214_vm8, %v8961_v39 }
 0xd53   :  { %1649 = vmatpush1.bf16.msra.mxu0 %v6721_v5  ;;  %1692 = vmatpush1.bf16.msra.mxu1 %v6723_v6  ;;  %v8112_v5 = vld [vmem:[%s10387_s26] sm:$0xff]  }
 0xd54   :  { %1650 = vmatprep.subr.bf16.mxu0 %v6738_v28  ;;  %1693 = vmatprep.subr.bf16.mxu1 %v6740_v29  ;;  %v8113_v6 = vld [vmem:[%s10387_s26 + $0x80] sm:$0xff]   ;;  %v8134_v28 = vld [vmem:[%s10387_s26 + $0x70] sm:$0xff]  }
 0xd55   :  { %1680 = vmatprep.mubr.bf16.mxu0 %v8511_v2  ;;  %1723 = vmatprep.mubr.bf16.mxu1 %v8511_v2  ;;  %v8135_v29 = vld [vmem:[%s10387_s26 + $0xf0] sm:$0xff]  }
 0xd57   :  { %1651 = vmatpush1.bf16.msra.mxu0 %v6737_v36  ;;  %1694 = vmatpush1.bf16.msra.mxu1 %v6739_v37  ;;  %v8140_v36 = vld [vmem:[%s10387_s26 + $0x38] sm:$0xff]  }
 0xd58   :  { %1734 = vmatprep.subr.bf16.mxu0 %v6726_v38  ;;  %1777 = vmatprep.subr.bf16.mxu1 %v6728_v40  ;;  %v8141_v37 = vld [vmem:[%s10387_s26 + $0xb8] sm:$0xff]   ;;  %v8142_v38 = vld [vmem:[%s10387_s26 + $0x140] sm:$0xff]  }
 0xd59   :  { %v8143_v40 = vld [vmem:[%s10387_s26 + $0x1c0] sm:$0xff]  }
 0xd5a   :  { %6751 = vmatmul.mubr.msk.bf16.vlgmr.msra.gmra.mrb[40].mxu0 %vm214_vm8, %v8961_v39  ;;  %6752 = vmatmul.mubr.msk.bf16.vlgmr.msra.gmra.mrb[40].mxu1 %vm214_vm8, %v8961_v39 }
 0xd5b   :  { %1735 = vmatpush1.bf16.msra.mxu0 %v6725_v46  ;;  %1778 = vmatpush1.bf16.msra.mxu1 %v6727_v56  ;;  %v1315_v46 = vld [vmem:[%s10388_s25] sm:$0xff]  ;;  %v9142_v56 = vsub.s32 1, %v1320_v42 }
 0xd5c   :  { %1736 = vmatprep.subr.bf16.mxu0 %v6742_v47  ;;  %1779 = vmatprep.subr.bf16.mxu1 %v6744_v49  ;;  %v9144_v47 = vsub.s32 3, %v1320_v42  ;;  %v1322_v49 = vrot.slane %v1315_v46, %v9135_v44  ;;  %v1330_v48 = vrot.slane %v1315_v46, %v9137_v45 }
 0xd5d   :  { %1766 = vmatprep.mubr.bf16.mxu0 %v8511_v2  ;;  %1809 = vmatprep.mubr.bf16.mxu1 %v8511_v2  ;;  %v1326_v26 = vrot.slane %v1315_v46, %v9142_v56 }
 0xd5e   :  { %v1334_v30 = vrot.slane %v1315_v46, %v9144_v47 }
 0xd5f   :  { %1737 = vmatpush1.bf16.msra.mxu0 %v6741_v50  ;;  %1780 = vmatpush1.bf16.msra.mxu1 %v6743_v51  ;;  %v9152_v50 = vsub.s32 6, %v1320_v42 }
 0xd60   :  { %1820 = vmatprep.subr.bf16.mxu0 %v6730_v52  ;;  %1863 = vmatprep.subr.bf16.mxu1 %v6732_v53  ;;  %v9154_v53 = vsub.s32 5, %v1320_v42 }
 0xd62   :  { %6753 = vmatmul.mubr.msk.bf16.vlgmr.msra.gmra.mrb[44].mxu0 %vm214_vm8, %v8961_v39  ;;  %6754 = vmatmul.mubr.msk.bf16.vlgmr.msra.gmra.mrb[44].mxu1 %vm214_vm8, %v8961_v39 }
 0xd63   :  { %1821 = vmatpush1.bf16.msra.mxu0 %v6729_v60  ;;  %1864 = vmatpush1.bf16.msra.mxu1 %v6731_v61 }
 0xd64   :  { %1822 = vmatprep.subr.bf16.mxu0 %v6746_v59  ;;  %1865 = vmatprep.subr.bf16.mxu1 %v6748_v62 }
 0xd65   :  { %1852 = vmatprep.mubr.bf16.mxu0 %v8511_v2  ;;  %1895 = vmatprep.mubr.bf16.mxu1 %v8511_v2 }
 0xd67   :  { %1823 = vmatpush1.bf16.msra.mxu0 %v6745_v63  ;;  %1866 = vmatpush1.bf16.msra.mxu1 %v6747_v0 }
 0xd68   :  { %7432 = vmatprep.subr.bf16.mxu0 %v8110_v3  ;;  %7454 = vmatprep.subr.bf16.mxu1 %v8111_v4 }
 0xd6a   :  { %6755 = vmatmul.mubr.msk.bf16.vlgmr.msra.gmra.mrb[48].mxu0 %vm214_vm8, %v8961_v39  ;;  %6756 = vmatmul.mubr.msk.bf16.vlgmr.msra.gmra.mrb[48].mxu1 %vm214_vm8, %v8961_v39  ;;  %v8133_v39 = vld [vmem:[%s10387_s26 + $0xa8] sm:$0xff]  }
 0xd6b   :  { %7433 = vmatpush3.bf16.msra.mxu0 %v8112_v5  ;;  %7455 = vmatpush3.bf16.msra.mxu1 %v8113_v6  ;;  %v1338_v6 = vrot.slane %v1315_v46, %v9150_v31 }
 0xd6c   :  { %7434 = vmatprep.subr.bf16.mxu0 %v8114_v7  ;;  %7456 = vmatprep.subr.bf16.mxu1 %v8115_v8  ;;  %v1346_v7 = vrot.slane %v1315_v46, %v9152_v50 }
 0xd6f   :  { %7435 = vmatpush3.bf16.msra.mxu0 %v8116_v9  ;;  %7457 = vmatpush3.bf16.msra.mxu1 %v8117_v10  ;;  %v1342_v10 = vrot.slane %v1315_v46, %v9154_v53 }
 0xd70   :  { %7436 = vmatprep.subr.bf16.mxu0 %v8118_v11  ;;  %7458 = vmatprep.subr.bf16.mxu1 %v8119_v12  ;;  %v1350_v11 = vrot.slane %v1315_v46, %v9156_v54 }
 0xd73   :  { %7437 = vmatpush3.bf16.msra.mxu0 %v8120_v13  ;;  %7459 = vmatpush3.bf16.msra.mxu1 %v8121_v14 }
 0xd74   :  { %7438 = vmatprep.subr.bf16.mxu0 %v8122_v15  ;;  %7460 = vmatprep.subr.bf16.mxu1 %v8123_v16 }
 0xd77   :  { %7439 = vmatpush3.bf16.msra.mxu0 %v8124_v17  ;;  %7461 = vmatpush3.bf16.msra.mxu1 %v8125_v18 }
 0xd78   :  { %7440 = vmatprep.subr.bf16.mxu0 %v8126_v19  ;;  %7462 = vmatprep.subr.bf16.mxu1 %v8127_v20  ;;  %v9165_v20 = vld [vmem:[%s10388_s25 + $0x8] sm:$0xff] }
 0xd7b   :  { %7441 = vmatpush3.bf16.msra.mxu0 %v8128_v21  ;;  %7463 = vmatpush3.bf16.msra.mxu1 %v8129_v22 }
 0xd7c   :  { %7442 = vmatprep.subr.bf16.mxu0 %v8130_v23  ;;  %7464 = vmatprep.subr.bf16.mxu1 %v8131_v24 }
 0xd7f   :  { %7443 = vmatpush3.bf16.msra.mxu0 %v8132_v43  ;;  %7465 = vmatpush3.bf16.msra.mxu1 %v8133_v39 }
 0xd80   :  { %7444 = vmatprep.subr.bf16.mxu0 %v8134_v28  ;;  %7466 = vmatprep.subr.bf16.mxu1 %v8135_v29  ;;  %v8144_v28 = vld [vmem:[%s10387_s26 + $0x100] sm:$0xff]  }
 0xd81   :  { %v8145_v29 = vld [vmem:[%s10387_s26 + $0x180] sm:$0xff]  }
 0xd83   :  { %7445 = vmatpush3.bf16.msra.mxu0 %v8136_v32  ;;  %7467 = vmatpush3.bf16.msra.mxu1 %v8137_v33 }
 0xd84   :  { %7446 = vmatprep.subr.bf16.mxu0 %v8138_v34  ;;  %7468 = vmatprep.subr.bf16.mxu1 %v8139_v35 }
 0xd87   :  { %7447 = vmatpush3.bf16.msra.mxu0 %v8140_v36  ;;  %7469 = vmatpush3.bf16.msra.mxu1 %v8141_v37  ;;  %v8146_v36 = vld [vmem:[%s10387_s26 + $0x148] sm:$0xff]  }
 0xd88   :  { %7476 = vmatprep.subr.bf16.mxu0 %v8142_v38  ;;  %7498 = vmatprep.subr.bf16.mxu1 %v8143_v40  ;;  %v8147_v37 = vld [vmem:[%s10387_s26 + $0x1c8] sm:$0xff]   ;;  %v1354_v38 = vrot.slane %v9165_v20, %v9135_v44 }
 0xe25   :  { %v1596_v51 = vpop.f32.mrb[36].mxu0  ;;  %v1639_v52 = vpop.f32.mrb[36].mxu1 }
 0xe26   :  { %v1597_v55 = vadd.f32 %v1596_v51, %v1322_v49  ;;  %v1640_v57 = vadd.f32 %v1639_v52, %v1330_v48  ;;  %v1598_v58 = vpop.f32.mrb[37].mxu0  ;;  %v1641_v60 = vpop.f32.mrb[37].mxu1  ;;  %v1358_v52 = vrot.slane %v9165_v20, %v9142_v56 }
 0xe27   :  { %v1599_v61 = vadd.f32 %v1598_v58, %v1326_v26  ;;  %v1642_v59 = vadd.f32 %v1641_v60, %v1334_v30  ;;  %v1600_v62 = vpop.f32.mrb[38].mxu0  ;;  %v1643_v63 = vpop.f32.mrb[38].mxu1  ;;  %v8148_v58 = vld [vmem:[%s10387_s26 + $0x108] sm:$0xff]  }
 0xe28   :  { %v1601_v0 = vadd.f32 %v1600_v62, %v1322_v49  ;;  %v1644_v3 = vadd.f32 %v1643_v63, %v1330_v48  ;;  %v1602_v4 = vpop.f32.mrb[39].mxu0  ;;  %v1645_v5 = vpop.f32.mrb[39].mxu1  ;;  %v1906_v12 = vmax.f32 %v1597_v55, 0.0  ;;  %v1908_v13 = vmax.f32 %v1640_v57, 0.0  ;;  %v8149_v60 = vld [vmem:[%s10387_s26 + $0x188] sm:$0xff]  }
 0xe29   :  { %v1603_v8 = vadd.f32 %v1602_v4, %v1326_v26  ;;  %v1646_v9 = vadd.f32 %v1645_v5, %v1334_v30  ;;  %v1907_v16 = vmax.f32 %v1599_v61, 0.0  ;;  %v1909_v17 = vmax.f32 %v1642_v59, 0.0  ;;  %v8151_v4 = vld [vmem:[%s10387_s26 + $0x1d0] sm:$0xff]  }
 0xe2a   :  { %v1922_v14 = vmax.f32 %v1601_v0, 0.0  ;;  %v1924_v15 = vmax.f32 %v1644_v3, 0.0  ;;  %v1362_v49 = vrot.slane %v9165_v20, %v9137_v45  ;;  %v1366_v61 = vrot.slane %v9165_v20, %v9144_v47  ;;  %v8150_v3 = vld [vmem:[%s10387_s26 + $0x150] sm:$0xff]  }
 0xe2b   :  { %v1923_v18 = vmax.f32 %v1603_v8, 0.0  ;;  %v1925_v19 = vmax.f32 %v1646_v9, 0.0 }
 0xe2c   :  { %v1938_v21 = vpack.c.bf16 %v1922_v14, %v1906_v12  ;;  %v1940_v22 = vpack.c.bf16 %v1924_v15, %v1908_v13  ;;  %v8152_v15 = vld [vmem:[%s10387_s26 + $0x110] sm:$0xff]  }
 0xe2d   :  { %v1939_v23 = vpack.c.bf16 %v1923_v18, %v1907_v16  ;;  %v1941_v24 = vpack.c.bf16 %v1925_v19, %v1909_v17  ;;  %v1682_v43 = vpop.f32.mrb[40].mxu0  ;;  %v1725_v39 = vpop.f32.mrb[40].mxu1  ;;  %v8153_v16 = vld [vmem:[%s10387_s26 + $0x190] sm:$0xff]  }
 0xe2e   :  { %v1683_v32 = vadd.f32 %v1682_v43, %v1338_v6  ;;  %v1726_v33 = vadd.f32 %v1725_v39, %v1346_v7  ;;  %v1684_v34 = vpop.f32.mrb[41].mxu0  ;;  %v1727_v35 = vpop.f32.mrb[41].mxu1 }
 0xe2f   :  { %v1685_v40 = vadd.f32 %v1684_v34, %v1342_v10  ;;  %v1728_v41 = vadd.f32 %v1727_v35, %v1350_v11  ;;  %v1686_v42 = vpop.f32.mrb[42].mxu0  ;;  %v1729_v46 = vpop.f32.mrb[42].mxu1  ;;  %3017 = vmatprep.mubr.bf16.mxu0 %v1939_v23  ;;  %3058 = vmatprep.mubr.bf16.mxu1 %v1941_v24  ;;  %v8155_v23 = vld [vmem:[%s10387_s26 + $0x1d8] sm:$0xff]  }
 0xe30   :  { %v1687_v48 = vadd.f32 %v1686_v42, %v1338_v6  ;;  %v1730_v26 = vadd.f32 %v1729_v46, %v1346_v7  ;;  %v1688_v30 = vpop.f32.mrb[43].mxu0  ;;  %v1731_v51 = vpop.f32.mrb[43].mxu1  ;;  %3018 = vmatmul.mubr.bf16.vlgmr.msra.gmra.mrb[52].mxu0 %v1938_v21  ;;  %3059 = vmatmul.mubr.bf16.vlgmr.msra.gmra.mrb[52].mxu1 %v1940_v22  ;;  %v1910_v59 = vmax.f32 %v1683_v32, 0.0  ;;  %v1912_v62 = vmax.f32 %v1726_v33, 0.0  ;;  %v8154_v22 = vld [vmem:[%s10387_s26 + $0x158] sm:$0xff]  }
 0xe31   :  { %v1689_v55 = vadd.f32 %v1688_v30, %v1342_v10  ;;  %v1732_v57 = vadd.f32 %v1731_v51, %v1350_v11  ;;  %7477 = vmatpush3.bf16.msra.mxu0 %v8144_v28  ;;  %7499 = vmatpush3.bf16.msra.mxu1 %v8145_v29  ;;  %v1911_v5 = vmax.f32 %v1685_v40, 0.0  ;;  %v1913_v6 = vmax.f32 %v1728_v41, 0.0  ;;  %v8156_v42 = vld [vmem:[%s10387_s26 + $0x118] sm:$0xff]   ;;  %v8158_v51 = vld [vmem:[%s10387_s26 + $0x160] sm:$0xff]  }
 0xe32   :  { %v1926_v63 = vmax.f32 %v1687_v48, 0.0  ;;  %v1928_v0 = vmax.f32 %v1730_v26, 0.0  ;;  %7478 = vmatprep.subr.bf16.mxu0 %v8146_v36  ;;  %7500 = vmatprep.subr.bf16.mxu1 %v8147_v37  ;;  %v1370_v29 = vrot.slane %v9165_v20, %v9150_v31  ;;  %v1378_v36 = vrot.slane %v9165_v20, %v9152_v50 }
 0xe33   :  { %v1927_v7 = vmax.f32 %v1689_v55, 0.0  ;;  %v1929_v8 = vmax.f32 %v1732_v57, 0.0  ;;  %v1374_v37 = vrot.slane %v9165_v20, %v9154_v53  ;;  %v1382_v46 = vrot.slane %v9165_v20, %v9156_v54 }
 0xe34   :  { %v9199_v9 = vpack.c.bf16 %v1926_v63, %v1910_v59  ;;  %v9201_v10 = vpack.c.bf16 %v1928_v0, %v1912_v62 }
 0xe35   :  { %v1943_v11 = vpack.c.bf16 %v1927_v7, %v1911_v5  ;;  %v1945_v12 = vpack.c.bf16 %v1929_v8, %v1913_v6  ;;  %7479 = vmatpush3.bf16.msra.mxu0 %v8148_v58  ;;  %7501 = vmatpush3.bf16.msra.mxu1 %v8149_v60  ;;  %v1768_v13 = vpop.f32.mrb[44].mxu0  ;;  %v1811_v14 = vpop.f32.mrb[44].mxu1 }
 0xe36   :  { %v1769_v17 = vadd.f32 %v1768_v13, %v1354_v38  ;;  %v1812_v18 = vadd.f32 %v1811_v14, %v1362_v49  ;;  %v1770_v19 = vpop.f32.mrb[45].mxu0  ;;  %v1813_v21 = vpop.f32.mrb[45].mxu1  ;;  %7480 = vmatprep.subr.bf16.mxu0 %v8150_v3  ;;  %7502 = vmatprep.subr.bf16.mxu1 %v8151_v4  ;;  %v8160_v3 = vld [vmem:[%s10387_s26 + $0x120] sm:$0xff]  }
 0xe37   :  { %v1771_v24 = vadd.f32 %v1770_v19, %v1358_v52  ;;  %v1814_v43 = vadd.f32 %v1813_v21, %v1366_v61  ;;  %v1772_v39 = vpop.f32.mrb[46].mxu0  ;;  %v1815_v28 = vpop.f32.mrb[46].mxu1  ;;  %3099 = vmatprep.mubr.bf16.mxu0 %v1943_v11  ;;  %3140 = vmatprep.mubr.bf16.mxu1 %v1945_v12  ;;  %v8161_v4 = vld [vmem:[%s10387_s26 + $0x1a0] sm:$0xff]   ;;  %v8162_v11 = vld [vmem:[%s10387_s26 + $0x168] sm:$0xff]  }
 0xe38   :  { %v1773_v32 = vadd.f32 %v1772_v39, %v1354_v38  ;;  %v1816_v33 = vadd.f32 %v1815_v28, %v1362_v49  ;;  %v1774_v34 = vpop.f32.mrb[47].mxu0  ;;  %v1817_v35 = vpop.f32.mrb[47].mxu1  ;;  %v8157_v38 = vld [vmem:[%s10387_s26 + $0x198] sm:$0xff]   ;;  %v1914_v49 = vmax.f32 %v1769_v17, 0.0  ;;  %v1916_v48 = vmax.f32 %v1812_v18, 0.0  ;;  %v8163_v12 = vld [vmem:[%s10387_s26 + $0x1e8] sm:$0xff]  }
 0xe39   :  { %v1775_v40 = vadd.f32 %v1774_v34, %v1358_v52  ;;  %v1818_v41 = vadd.f32 %v1817_v35, %v1366_v61  ;;  %7481 = vmatpush3.bf16.msra.mxu0 %v8152_v15  ;;  %7503 = vmatpush3.bf16.msra.mxu1 %v8153_v16  ;;  %v8159_v52 = vld [vmem:[%s10387_s26 + $0x1e0] sm:$0xff]   ;;  %v1915_v55 = vmax.f32 %v1771_v24, 0.0  ;;  %v1917_v57 = vmax.f32 %v1814_v43, 0.0  ;;  %v8164_v24 = vld [vmem:[%s10387_s26 + $0x128] sm:$0xff]   ;;  %v8167_v34 = vld [vmem:[%s10387_s26 + $0x1f0] sm:$0xff]  }
 0xe3a   :  { %v1930_v26 = vmax.f32 %v1773_v32, 0.0  ;;  %v1932_v30 = vmax.f32 %v1816_v33, 0.0  ;;  %7482 = vmatprep.subr.bf16.mxu0 %v8154_v22  ;;  %7504 = vmatprep.subr.bf16.mxu1 %v8155_v23  ;;  %v8165_v43 = vld [vmem:[%s10387_s26 + $0x1a8] sm:$0xff]  }
 0xe3b   :  { %v1931_v58 = vmax.f32 %v1775_v40, 0.0  ;;  %v1933_v60 = vmax.f32 %v1818_v41, 0.0 }
 0xe3c   :  { %v9235_v61 = vpack.c.bf16 %v1930_v26, %v1914_v49  ;;  %v9237_v20 = vpack.c.bf16 %v1932_v30, %v1916_v48  ;;  %v8168_v49 = vld [vmem:[%s10387_s26 + $0x130] sm:$0xff]   ;;  %v8170_v26 = vld [vmem:[%s10387_s26 + $0x178] sm:$0xff]  }
 0xe3d   :  { %v9239_v59 = vpack.c.bf16 %v1931_v58, %v1915_v55  ;;  %v9241_v62 = vpack.c.bf16 %v1933_v60, %v1917_v57  ;;  %7483 = vmatpush3.bf16.msra.mxu0 %v8156_v42  ;;  %7505 = vmatpush3.bf16.msra.mxu1 %v8157_v38  ;;  %v1854_v63 = vpop.f32.mrb[48].mxu0  ;;  %v1897_v0 = vpop.f32.mrb[48].mxu1  ;;  %v8169_v48 = vld [vmem:[%s10387_s26 + $0x1b0] sm:$0xff]   ;;  %v8171_v30 = vld [vmem:[%s10387_s26 + $0x1f8] sm:$0xff]   ;;  %v8174_v55 = vld [vmem:[%s10387_s26 + $0x240] sm:$0xff]  }
 0xe3e   :  { %v1855_v5 = vadd.f32 %v1854_v63, %v1370_v29  ;;  %v1898_v6 = vadd.f32 %v1897_v0, %v1378_v36  ;;  %v1856_v7 = vpop.f32.mrb[49].mxu0  ;;  %v1899_v8 = vpop.f32.mrb[49].mxu1  ;;  %7484 = vmatprep.subr.bf16.mxu0 %v8158_v51  ;;  %7506 = vmatprep.subr.bf16.mxu1 %v8159_v52  ;;  %v8172_v51 = vld [vmem:[%s10387_s26 + $0x138] sm:$0xff]   ;;  %v8175_v57 = vld [vmem:[%s10387_s26 + $0x2c0] sm:$0xff]   ;;  %v8178_v63 = vld [vmem:[%s10387_s26 + $0x248] sm:$0xff]  }
 0xe3f   :  { %v1857_v13 = vadd.f32 %v1856_v7, %v1374_v37  ;;  %v1900_v14 = vadd.f32 %v1899_v8, %v1382_v46  ;;  %v1858_v15 = vpop.f32.mrb[50].mxu0  ;;  %v1901_v16 = vpop.f32.mrb[50].mxu1  ;;  %v8173_v52 = vld [vmem:[%s10387_s26 + $0x1b8] sm:$0xff]   ;;  %v8176_v58 = vld [vmem:[%s10387_s26 + $0x200] sm:$0xff]   ;;  %v8179_v0 = vld [vmem:[%s10387_s26 + $0x2c8] sm:$0xff]  }
 0xe40   :  { %v1859_v17 = vadd.f32 %v1858_v15, %v1370_v29  ;;  %v1902_v18 = vadd.f32 %v1901_v16, %v1378_v36  ;;  %v1860_v19 = vpop.f32.mrb[51].mxu0  ;;  %v1903_v21 = vpop.f32.mrb[51].mxu1  ;;  %v1918_v39 = vmax.f32 %v1855_v5, 0.0  ;;  %v1920_v28 = vmax.f32 %v1898_v6, 0.0  ;;  %v8166_v29 = vld [vmem:[%s10387_s26 + $0x170] sm:$0xff]   ;;  %v8177_v60 = vld [vmem:[%s10387_s26 + $0x280] sm:$0xff]  }
 0xe41   :  { %v1861_v22 = vadd.f32 %v1860_v19, %v1374_v37  ;;  %v1904_v23 = vadd.f32 %v1903_v21, %v1382_v46  ;;  %7485 = vmatpush3.bf16.msra.mxu0 %v8160_v3  ;;  %7507 = vmatpush3.bf16.msra.mxu1 %v8161_v4  ;;  %v1919_v35 = vmax.f32 %v1857_v13, 0.0  ;;  %v1921_v36 = vmax.f32 %v1900_v14, 0.0  ;;  %v8180_v3 = vld [vmem:[%s10387_s26 + $0x208] sm:$0xff]   ;;  %v8186_v5 = vld [vmem:[%s10387_s26 + $0x258] sm:$0xff]   ;;  %v8192_v13 = vld [vmem:[%s10387_s26 + $0x220] sm:$0xff]  }
 0xe42   :  { %v1934_v32 = vmax.f32 %v1859_v17, 0.0  ;;  %v1936_v33 = vmax.f32 %v1902_v18, 0.0  ;;  %7486 = vmatprep.subr.bf16.mxu0 %v8162_v11  ;;  %7508 = vmatprep.subr.bf16.mxu1 %v8163_v12  ;;  %v8181_v4 = vld [vmem:[%s10387_s26 + $0x288] sm:$0xff]   ;;  %v8187_v6 = vld [vmem:[%s10387_s26 + $0x2d8] sm:$0xff]   ;;  %v8190_v11 = vld [vmem:[%s10387_s26 + $0x260] sm:$0xff]  }
 0xe43   :  { %v1935_v37 = vmax.f32 %v1861_v22, 0.0  ;;  %v1937_v40 = vmax.f32 %v1904_v23, 0.0  ;;  %v8188_v7 = vld [vmem:[%s10387_s26 + $0x218] sm:$0xff]   ;;  %v8191_v12 = vld [vmem:[%s10387_s26 + $0x2e0] sm:$0xff]   ;;  %v8194_v15 = vld [vmem:[%s10387_s26 + $0x268] sm:$0xff]  }
 0xe44   :  { %v9267_v41 = vpack.c.bf16 %v1934_v32, %v1918_v39  ;;  %v9269_v42 = vpack.c.bf16 %v1936_v33, %v1920_v28  ;;  %v8189_v8 = vld [vmem:[%s10387_s26 + $0x298] sm:$0xff]   ;;  %v8193_v14 = vld [vmem:[%s10387_s26 + $0x2a0] sm:$0xff]   ;;  %v8195_v16 = vld [vmem:[%s10387_s26 + $0x2e8] sm:$0xff]  }
 0xe45   :  { %v9271_v38 = vpack.c.bf16 %v1935_v37, %v1919_v35  ;;  %v9273_v46 = vpack.c.bf16 %v1937_v40, %v1921_v36  ;;  %7487 = vmatpush3.bf16.msra.mxu0 %v8164_v24  ;;  %7509 = vmatpush3.bf16.msra.mxu1 %v8165_v43  ;;  %v8196_v17 = vld [vmem:[%s10387_s26 + $0x228] sm:$0xff]   ;;  %v8198_v19 = vld [vmem:[%s10387_s26 + $0x270] sm:$0xff]   ;;  %v8202_v24 = vld [vmem:[%s10387_s26 + $0x278] sm:$0xff]  }
 0xe46   :  { %7488 = vmatprep.subr.bf16.mxu0 %v8166_v29  ;;  %7510 = vmatprep.subr.bf16.mxu1 %v8167_v34  ;;  %v8197_v18 = vld [vmem:[%s10387_s26 + $0x2a8] sm:$0xff]   ;;  %v8199_v21 = vld [vmem:[%s10387_s26 + $0x2f0] sm:$0xff]   ;;  %v8203_v43 = vld [vmem:[%s10387_s26 + $0x2f8] sm:$0xff]  }
 0xe47   :  { %v8200_v22 = vld [vmem:[%s10387_s26 + $0x230] sm:$0xff]   ;;  %v8204_v39 = vld [vmem:[%s10387_s26 + $0x238] sm:$0xff]   ;;  %v8206_v32 = vld [vmem:[%s10387_s26 + $0x340] sm:$0xff]  }
 0xe48   :  { %v8201_v23 = vld [vmem:[%s10387_s26 + $0x2b0] sm:$0xff]   ;;  %v8205_v28 = vld [vmem:[%s10387_s26 + $0x2b8] sm:$0xff]   ;;  %v8207_v33 = vld [vmem:[%s10387_s26 + $0x3c0] sm:$0xff]  }
 0xe49   :  { %7489 = vmatpush3.bf16.msra.mxu0 %v8168_v49  ;;  %7511 = vmatpush3.bf16.msra.mxu1 %v8169_v48  ;;  %v8208_v29 = vld [vmem:[%s10387_s26 + $0x300] sm:$0xff]   ;;  %v8210_v35 = vld [vmem:[%s10387_s26 + $0x348] sm:$0xff]   ;;  %v8217_v49 = vld [vmem:[%s10387_s26 + $0x390] sm:$0xff]  }
 0xe4a   :  { %7490 = vmatprep.subr.bf16.mxu0 %v8170_v26  ;;  %7512 = vmatprep.subr.bf16.mxu1 %v8171_v30  ;;  %v8209_v34 = vld [vmem:[%s10387_s26 + $0x380] sm:$0xff]   ;;  %v8211_v36 = vld [vmem:[%s10387_s26 + $0x3c8] sm:$0xff]   ;;  %v8219_v48 = vld [vmem:[%s10387_s26 + $0x3d8] sm:$0xff]  }
 0xe4b   :  { %v8212_v37 = vld [vmem:[%s10387_s26 + $0x308] sm:$0xff]   ;;  %v8220_v26 = vld [vmem:[%s10387_s26 + $0x318] sm:$0xff]  }
 0xe4c   :  { %v8213_v40 = vld [vmem:[%s10387_s26 + $0x388] sm:$0xff]   ;;  %v8221_v30 = vld [vmem:[%s10387_s26 + $0x398] sm:$0xff]  }
 0xe4d   :  { %7491 = vmatpush3.bf16.msra.mxu0 %v8172_v51  ;;  %7513 = vmatpush3.bf16.msra.mxu1 %v8173_v52  ;;  %v8222_v51 = vld [vmem:[%s10387_s26 + $0x360] sm:$0xff]  }
 0xe4e   :  { %7520 = vmatprep.subr.bf16.mxu0 %v8174_v55  ;;  %7542 = vmatprep.subr.bf16.mxu1 %v8175_v57  ;;  %v8223_v52 = vld [vmem:[%s10387_s26 + $0x3e0] sm:$0xff]  }
 0xe4f   :  { %v8224_v55 = vld [vmem:[%s10387_s26 + $0x320] sm:$0xff]  }
 0xe50   :  { %3100 = vmatmul.mubr.bf16.vlgmr.msra.gmra.mrb[56].mxu0 %v9199_v9  ;;  %3141 = vmatmul.mubr.bf16.vlgmr.msra.gmra.mrb[56].mxu1 %v9201_v10  ;;  %v8182_v9 = vld [vmem:[%s10387_s26 + $0x250] sm:$0xff]   ;;  %v8225_v57 = vld [vmem:[%s10387_s26 + $0x3a0] sm:$0xff]  }
 0xe51   :  { %7521 = vmatpush3.bf16.msra.mxu0 %v8176_v58  ;;  %3181 = vmatprep.mubr.bf16.mxu0 %v9239_v59  ;;  %v8183_v10 = vld [vmem:[%s10387_s26 + $0x2d0] sm:$0xff]   ;;  %v8226_v58 = vld [vmem:[%s10387_s26 + $0x368] sm:$0xff]  }
 0xe52   :  { %7543 = vmatpush3.bf16.msra.mxu1 %v8177_v60  ;;  %3222 = vmatprep.mubr.bf16.mxu1 %v9241_v62  ;;  %v8184_v59 = vld [vmem:[%s10387_s26 + $0x210] sm:$0xff]   ;;  %v8227_v60 = vld [vmem:[%s10387_s26 + $0x3e8] sm:$0xff]  }
 0xe53   :  { %7522 = vmatprep.subr.bf16.mxu0 %v8178_v63  ;;  %7544 = vmatprep.subr.bf16.mxu1 %v8179_v0  ;;  %v8185_v62 = vld [vmem:[%s10387_s26 + $0x290] sm:$0xff]   ;;  %v8228_v63 = vld [vmem:[%s10387_s26 + $0x328] sm:$0xff]  }
 0xe54   :  { %v8229_v0 = vld [vmem:[%s10387_s26 + $0x3a8] sm:$0xff]  }
 0xe55   :  { %7523 = vmatpush3.bf16.msra.mxu0 %v8180_v3  ;;  %v8230_v3 = vld [vmem:[%s10387_s26 + $0x370] sm:$0xff]  }
 0xe56   :  { %7545 = vmatpush3.bf16.msra.mxu1 %v8181_v4  ;;  %7524 = vmatprep.subr.bf16.mxu0 %v8182_v9  ;;  %v8231_v4 = vld [vmem:[%s10387_s26 + $0x3f0] sm:$0xff]  }
 0xe57   :  { %7546 = vmatprep.subr.bf16.mxu1 %v8183_v10  ;;  %v8232_v9 = vld [vmem:[%s10387_s26 + $0x330] sm:$0xff]  }
 0xe58   :  { %v8233_v10 = vld [vmem:[%s10387_s26 + $0x3b0] sm:$0xff]  }
 0xe59   :  { %7525 = vmatpush3.bf16.msra.mxu0 %v8184_v59  ;;  %v8234_v59 = vld [vmem:[%s10387_s26 + $0x378] sm:$0xff]  }
 0xe5a   :  { %7547 = vmatpush3.bf16.msra.mxu1 %v8185_v62  ;;  %7526 = vmatprep.subr.bf16.mxu0 %v8186_v5  ;;  %v8235_v62 = vld [vmem:[%s10387_s26 + $0x3f8] sm:$0xff]  }
 0xe5b   :  { %7548 = vmatprep.subr.bf16.mxu1 %v8187_v6  ;;  %v8236_v5 = vld [vmem:[%s10387_s26 + $0x338] sm:$0xff]  }
 0xe5c   :  { %v8237_v6 = vld [vmem:[%s10387_s26 + $0x3b8] sm:$0xff]  }
 0xe5d   :  { %7527 = vmatpush3.bf16.msra.mxu0 %v8188_v7 }
 0xe5e   :  { %7549 = vmatpush3.bf16.msra.mxu1 %v8189_v8  ;;  %7528 = vmatprep.subr.bf16.mxu0 %v8190_v11  ;;  %v6757_v11 = vld [vmem:[%s10389_s24] ss:$0 sm:$0xff] }
 0xe5f   :  { %7550 = vmatprep.subr.bf16.mxu1 %v8191_v12 }
 0xe61   :  { %7529 = vmatpush3.bf16.msra.mxu0 %v8192_v13 }
 0xe62   :  { %7551 = vmatpush3.bf16.msra.mxu1 %v8193_v14  ;;  %7530 = vmatprep.subr.bf16.mxu0 %v8194_v15 }
 0xe63   :  { %7552 = vmatprep.subr.bf16.mxu1 %v8195_v16 }
 0xe65   :  { %7531 = vmatpush3.bf16.msra.mxu0 %v8196_v17 }
 0xe66   :  { %7553 = vmatpush3.bf16.msra.mxu1 %v8197_v18  ;;  %7532 = vmatprep.subr.bf16.mxu0 %v8198_v19 }
 0xe67   :  { %7554 = vmatprep.subr.bf16.mxu1 %v8199_v21 }
 0xe69   :  { %7533 = vmatpush3.bf16.msra.mxu0 %v8200_v22 }
 0xe6a   :  { %7555 = vmatpush3.bf16.msra.mxu1 %v8201_v23  ;;  %7534 = vmatprep.subr.bf16.mxu0 %v8202_v24 }
 0xe6b   :  { %7556 = vmatprep.subr.bf16.mxu1 %v8203_v43 }
 0xe6d   :  { %7535 = vmatpush3.bf16.msra.mxu0 %v8204_v39 }
 0xe6e   :  { %7557 = vmatpush3.bf16.msra.mxu1 %v8205_v28  ;;  %7564 = vmatprep.subr.bf16.mxu0 %v8206_v32 }
 0xe6f   :  { %7586 = vmatprep.subr.bf16.mxu1 %v8207_v33 }
 0xe70   :  { %3182 = vmatmul.mubr.bf16.vlgmr.msra.gmra.mrb[60].mxu0 %v9235_v61  ;;  %v8214_v61 = vld [vmem:[%s10387_s26 + $0x350] sm:$0xff]  }
 0xe71   :  { %3223 = vmatmul.mubr.bf16.vlgmr.msra.gmra.mrb[60].mxu1 %v9237_v20  ;;  %7565 = vmatpush3.bf16.msra.mxu0 %v8208_v29  ;;  %v8215_v20 = vld [vmem:[%s10387_s26 + $0x3d0] sm:$0xff]  }
 0xe72   :  { %3263 = vmatprep.mubr.bf16.mxu0 %v9271_v38  ;;  %7587 = vmatpush3.bf16.msra.mxu1 %v8209_v34  ;;  %v8216_v38 = vld [vmem:[%s10387_s26 + $0x310] sm:$0xff]  }
 0xe73   :  { %3304 = vmatprep.mubr.bf16.mxu1 %v9273_v46  ;;  %7566 = vmatprep.subr.bf16.mxu0 %v8210_v35  ;;  %v8218_v46 = vld [vmem:[%s10387_s26 + $0x358] sm:$0xff]  }
 0xe74   :  { %7588 = vmatprep.subr.bf16.mxu1 %v8211_v36 }
 0xe75   :  { %7567 = vmatpush3.bf16.msra.mxu0 %v8212_v37 }
 0xe76   :  { %7589 = vmatpush3.bf16.msra.mxu1 %v8213_v40  ;;  %7568 = vmatprep.subr.bf16.mxu0 %v8214_v61 }
 0xe77   :  { %7590 = vmatprep.subr.bf16.mxu1 %v8215_v20 }
 0xe79   :  { %7569 = vmatpush3.bf16.msra.mxu0 %v8216_v38 }
 0xe7a   :  { %7591 = vmatpush3.bf16.msra.mxu1 %v8217_v49  ;;  %7570 = vmatprep.subr.bf16.mxu0 %v8218_v46 }
 0xe7b   :  { %7592 = vmatprep.subr.bf16.mxu1 %v8219_v48 }
 0xe7d   :  { %7571 = vmatpush3.bf16.msra.mxu0 %v8220_v26 }
 0xe7e   :  { %7593 = vmatpush3.bf16.msra.mxu1 %v8221_v30  ;;  %7572 = vmatprep.subr.bf16.mxu0 %v8222_v51 }
 0xe7f   :  { %7594 = vmatprep.subr.bf16.mxu1 %v8223_v52 }
 0xe81   :  { %7573 = vmatpush3.bf16.msra.mxu0 %v8224_v55 }
 0xe82   :  { %7595 = vmatpush3.bf16.msra.mxu1 %v8225_v57  ;;  %7574 = vmatprep.subr.bf16.mxu0 %v8226_v58 }
 0xe83   :  { %7596 = vmatprep.subr.bf16.mxu1 %v8227_v60 }
 0xe85   :  { %7575 = vmatpush3.bf16.msra.mxu0 %v8228_v63 }
 0xe86   :  { %7597 = vmatpush3.bf16.msra.mxu1 %v8229_v0  ;;  %7576 = vmatprep.subr.bf16.mxu0 %v8230_v3 }
 0xe87   :  { %7598 = vmatprep.subr.bf16.mxu1 %v8231_v4 }
 0xe89   :  { %7577 = vmatpush3.bf16.msra.mxu0 %v8232_v9 }
 0xe8a   :  { %7599 = vmatpush3.bf16.msra.mxu1 %v8233_v10  ;;  %7578 = vmatprep.subr.bf16.mxu0 %v8234_v59 }
 0xe8b   :  { %7600 = vmatprep.subr.bf16.mxu1 %v8235_v62 }
 0xe8d   :  { %7579 = vmatpush3.bf16.msra.mxu0 %v8236_v5 }
 0xe8e   :  { %7601 = vmatpush3.bf16.msra.mxu1 %v8237_v6  ;;  %7937 = vmatprep.subr.bf16.mxu0 %v8495_v1 }
 0xe8f   :  { %7945 = vmatprep.subr.bf16.mxu1 %v8495_v1 }
 0xe90   :  { %3264 = vmatmul.mubr.bf16.vlgmr.msra.gmra.mrb[64].mxu0 %v9267_v41 }
 0xe91   :  { %3305 = vmatmul.mubr.bf16.vlgmr.msra.gmra.mrb[64].mxu1 %v9269_v42  ;;  %7941 = vmatprep.mubr.msk.bf16.mxu0 %vm8496_vm0, %v8495_v1 }
 0xe92   :  { %7947 = vmatprep.mubr.msk.bf16.mxu1 %vm8496_vm0, %v8495_v1 }
 0xf03   :  { %v7448_v7 = vpop.f32.mrb[52].mxu0  ;;  %v7470_v8 = vpop.f32.mrb[52].mxu1 }
 0xf04   :  { %v7449_v12 = vpop.f32.mrb[53].mxu0  ;;  %v7471_v13 = vpop.f32.mrb[53].mxu1 }
 0xf05   :  { %v7450_v14 = vadd.f32 %v7449_v12, %v7448_v7  ;;  %v7472_v15 = vadd.f32 %v7471_v13, %v7470_v8  ;;  %v7451_v16 = vpop.f32.mrb[54].mxu0  ;;  %v7473_v41 = vpop.f32.mrb[54].mxu1 }
 0xf06   :  { %v7452_v17 = vpop.f32.mrb[55].mxu0  ;;  %v7474_v42 = vpop.f32.mrb[55].mxu1 }
 0xf07   :  { %v3020_v18 = vadd.f32 %v7450_v14, %v6757_v11  ;;  %v7453_v19 = vadd.f32 %v7452_v17, %v7451_v16  ;;  %v7475_v21 = vadd.f32 %v7474_v42, %v7473_v41 }
 0xf09   :  { %v3061_v22 = vadd.f32 %v7472_v15, %v3020_v18  ;;  %v3023_v23 = vadd.f32 %v7453_v19, %v6757_v11 }
 0xf0b   :  { %v3064_v24 = vadd.f32 %v7475_v21, %v3023_v23 }
 0xf23   :  { %v7492_v43 = vpop.f32.mrb[56].mxu0  ;;  %v7514_v39 = vpop.f32.mrb[56].mxu1 }
 0xf24   :  { %v7493_v28 = vpop.f32.mrb[57].mxu0  ;;  %v7515_v32 = vpop.f32.mrb[57].mxu1 }
 0xf25   :  { %v7494_v33 = vadd.f32 %v7493_v28, %v7492_v43  ;;  %v7516_v29 = vadd.f32 %v7515_v32, %v7514_v39  ;;  %v7495_v34 = vpop.f32.mrb[58].mxu0  ;;  %v7517_v35 = vpop.f32.mrb[58].mxu1 }
 0xf26   :  { %v7496_v36 = vpop.f32.mrb[59].mxu0  ;;  %v7518_v37 = vpop.f32.mrb[59].mxu1 }
 0xf27   :  { %v3102_v40 = vadd.f32 %v7494_v33, %v3061_v22  ;;  %v7497_v61 = vadd.f32 %v7496_v36, %v7495_v34  ;;  %v7519_v20 = vadd.f32 %v7518_v37, %v7517_v35  ;;  %v8239_v37 = vld [vmem:[%s10390_s3 + $0x18] sm:$0xff]  }
 0xf29   :  { %v3143_v38 = vadd.f32 %v7516_v29, %v3102_v40  ;;  %v3105_v49 = vadd.f32 %v7497_v61, %v3064_v24 }
 0xf2b   :  { %v3146_v46 = vadd.f32 %v7519_v20, %v3105_v49 }
 0xf43   :  { %v7536_v48 = vpop.f32.mrb[60].mxu0 }
 0xf44   :  { %v7558_v26 = vpop.f32.mrb[60].mxu1  ;;  %v7537_v30 = vpop.f32.mrb[61].mxu0 }
 0xf45   :  { %v7538_v51 = vadd.f32 %v7537_v30, %v7536_v48  ;;  %v7559_v52 = vpop.f32.mrb[61].mxu1  ;;  %v7539_v55 = vpop.f32.mrb[62].mxu0 }
 0xf46   :  { %v7560_v57 = vadd.f32 %v7559_v52, %v7558_v26  ;;  %v7561_v58 = vpop.f32.mrb[62].mxu1  ;;  %v7540_v60 = vpop.f32.mrb[63].mxu0  ;;  %v6886_v26 = vld [vmem:[%s10391_s22] ss:$0 sm:$0xff] }
 0xf47   :  { %v3184_v63 = vadd.f32 %v7538_v51, %v3143_v38  ;;  %v7541_v0 = vadd.f32 %v7540_v60, %v7539_v55  ;;  %v7562_v3 = vpop.f32.mrb[63].mxu1 }
 0xf48   :  { %v7563_v4 = vadd.f32 %v7562_v3, %v7561_v58  ;;  %v6898_v3 = vld [vmem:[%s10350_s4 + $0x1] ss:$0 sm:$0xff] }
 0xf49   :  { %v3225_v9 = vadd.f32 %v7560_v57, %v3184_v63  ;;  %v3187_v10 = vadd.f32 %v7541_v0, %v3146_v46  ;;  %v6887_v57 = vld [vmem:[%s10392_s2] ss:$0 sm:$0xff] }
 0xf4b   :  { %v3228_v59 = vadd.f32 %v7563_v4, %v3187_v10 }
 0xf63   :  { %v7580_v62 = vpop.f32.mrb[64].mxu0 }
 0xf64   :  { %v7602_v5 = vpop.f32.mrb[64].mxu1  ;;  %v7581_v6 = vpop.f32.mrb[65].mxu0 }
 0xf65   :  { %v7582_v7 = vadd.f32 %v7581_v6, %v7580_v62  ;;  %v7603_v8 = vpop.f32.mrb[65].mxu1  ;;  %v7583_v11 = vpop.f32.mrb[66].mxu0 }
 0xf66   :  { %v7604_v12 = vadd.f32 %v7603_v8, %v7602_v5  ;;  %v7605_v13 = vpop.f32.mrb[66].mxu1  ;;  %v7584_v14 = vpop.f32.mrb[67].mxu0 }
 0xf67   :  { %v3266_v15 = vadd.f32 %v7582_v7, %v3225_v9  ;;  %v7585_v16 = vadd.f32 %v7584_v14, %v7583_v11  ;;  %v7606_v41 = vpop.f32.mrb[67].mxu1 }
 0xf68   :  { %v7607_v17 = vadd.f32 %v7606_v41, %v7605_v13 }
 0xf69   :  { %v3307_v42 = vadd.f32 %v7604_v12, %v3266_v15  ;;  %v3269_v18 = vadd.f32 %v7585_v16, %v3228_v59 }
 0xf6b   :  { %v3310_v19 = vadd.f32 %v7607_v17, %v3269_v18  ;;  %v3313_v21 = vadd.f32 %v3307_v42, %v8955_v25 }
 0xf6d   :  { %v3315_v22 = vsel %vm214_vm8, %v3313_v21, 0.0  ;;  %v3314_v23 = vadd.f32 %v3310_v19, %v8957_v27  ;;  %v8238_v27 = vld [vmem:[%s10390_s3 + $0x10] sm:$0xff]  }
 0xf6e   :  { %3316 = vadd.xlane.f32.xlu0 %v3315_v22  ;;  %7938 = vmatpush3.bf16.msra.mxu0 %v8238_v27 }
 0xf6f   :  { %v3318_v24 = vsel %vm214_vm8, %v3314_v23, 0.0  ;;  %7939 = vmatprep.subr.bf16.mxu0 %v8495_v1 }
 0xf70   :  { %3319 = vadd.xlane.f32.xlu1 %v3318_v24 }
 0xf72   :  { %7940 = vmatpush3.bf16.msra.mxu0 %v8239_v37 }
 0xf73   :  { %7951 = vmatprep.subr.bf16.mxu0 %v8495_v1 }
 0xffb   :  { %v3317_v43 = vpop.xlane.xlu0 %3316 }
 0xffc   :  { %v3321_v39 = vmul.f32 0.03125, %v3317_v43 }
 0xffd   :  { %v3320_v28 = vpop.xlane.xlu1 %3319 }
 0xffe   :  { %v3323_v32 = vsub.f32 %v3313_v21, %v3321_v39  ;;  %v3322_v33 = vmul.f32 0.03125, %v3320_v28 }
0x1000   :  { %v3324_v29 = vsub.f32 %v3314_v23, %v3322_v33  ;;  %v3325_v34 = vmul.f32 %v3323_v32, %v3323_v32 }
0x1002   :  { %v3327_v35 = vsel %vm214_vm8, %v3325_v34, 0.0  ;;  %v3326_v36 = vmul.f32 %v3324_v29, %v3324_v29 }
0x1003   :  { %3328 = vadd.xlane.f32.xlu0 %v3327_v35 }
0x1004   :  { %v3330_v25 = vsel %vm214_vm8, %v3326_v36, 0.0 }
0x1005   :  { %3331 = vadd.xlane.f32.xlu1 %v3330_v25 }
0x1090   :  { %v3329_v40 = vpop.xlane.xlu0 %3328 }
0x1091   :  { %v3333_v61 = vmul.f32 0.03125, %v3329_v40 }
0x1092   :  { %v3332_v20 = vpop.xlane.xlu1 %3331 }
0x1093   :  { %v3335_v38 = vadd.f32 1e-05, %v3333_v61  ;;  %v3334_v49 = vmul.f32 0.03125, %v3332_v20 }
0x1095   :  { %8408 = vrsqrt.f32 %v3335_v38  ;;  %v3336_v46 = vadd.f32 1e-05, %v3334_v49 }
0x1097   :  { %8410 = vrsqrt.f32 %v3336_v46 }
0x109f   :  { %v8409_v48 = vpop.eup %8408 }
0x10a0   :  { %v3339_v30 = vmul.f32 %v8409_v48, %v3323_v32 }
0x10a1   :  { %v8411_v51 = vpop.eup %8410 }
0x10a2   :  { %v3348_v52 = vmul.f32 %v6886_v26, %v3339_v30  ;;  %v3340_v55 = vmul.f32 %v8411_v51, %v3324_v29 }
0x10a4   :  { %v3349_v58 = vmul.f32 %v6886_v26, %v3340_v55  ;;  %v9524_v60 = vadd.f32 %v6887_v57, %v3348_v52 }
0x10a6   :  { %v9526_v63 = vadd.f32 %v6887_v57, %v3349_v58 }
0x10a8   :  { %v3373_v0 = vpack.c.bf16 %v9526_v63, %v9524_v60 }
0x10aa   :  { %7942 = vmatmul.mubr.msk.bf16.vlgmr.msra.gmra.mrb[68].mxu0 %vm214_vm8, %v3373_v0 }
0x10ab   :  { %7953 = vmatprep.mubr.msk.bf16.mxu0 %vm8496_vm0, %v8495_v1 }
0x117d   :  { %v3429_v4 = vpop.f32.mrb[68].mxu0 }
0x117e   :  { %v3430_v9 = vadd.f32 %v6898_v3, %v3429_v4  ;;  %v7943_v10 = vpop.f32.mrb[69].mxu0 }
0x117f   :  { %v3432_v59 = vpop.f32.mrb[70].mxu0 }
0x1180   :  { %v9536_v62 = vpack.c.bf16 %v3430_v9, %v3430_v9  ;;  %v3433_v5 = vadd.f32 %v6898_v3, %v3432_v59  ;;  %v7944_v6 = vpop.f32.mrb[71].mxu0 }
0x1182   :  { %v9538_v7 = vpack.c.bf16 %v3433_v5, %v3433_v5  ;;  %3439 = vrot.lane.b32.xlu0 %v9536_v62, %s8497_s30 }
0x1184   :  { %3488 = vrot.lane.b32.xlu1 %v9538_v7, %s8497_s30 }
0x11f4   :  { %v3440_v8 = vpop.permute.xlu0 %3439 }
0x11f5   :  { %v3445_v11 = vsel %vm264_vm9, %v3440_v8, 0 }
0x11f6   :  { %7946 = vmatpush3.bf16.xpose.msra.mxu1 %v3445_v11  ;;  %v3489_v12 = vpop.permute.xlu1 %3488 }
0x11f7   :  { %v3494_v13 = vsel %vm264_vm9, %v3489_v12, 0  ;;  %7957 = vmatprep.subr.bf16.mxu1 %v8495_v1 }
0x11f8   :  { %7952 = vmatpush3.bf16.xpose.msra.mxu0 %v3494_v13 }
0x11f9   :  { %7963 = vmatprep.subr.bf16.mxu0 %v8495_v1 }
0x11fd   :  { %7948 = vmatmul.mubr.msk.bf16.vlgmr.msra.gmra.mrb[68].mxu1 %vm264_vm9, %v9536_v62 }
0x11fe   :  { %7959 = vmatprep.mubr.msk.bf16.mxu1 %vm8496_vm0, %v8495_v1 }
0x11ff   :  { %7954 = vmatmul.mubr.msk.bf16.vlgmr.msra.gmra.mrb[72].mxu0 %vm264_vm9, %v9538_v7 }
0x1200   :  { %7965 = vmatprep.mubr.msk.bf16.mxu0 %vm8496_vm0, %v8495_v1 }
0x12d0   :  { %v3481_v14 = vpop.f32.mrb[68].mxu1 }
0x12d1   :  { %v7949_v15 = vpop.f32.mrb[69].mxu1  ;;  %v3536_v16 = vsel %vm264_vm9, %v3481_v14, -inf }
0x12d2   :  { %v3484_v41 = vpop.f32.mrb[70].mxu1  ;;  %3537 = vmax.xlane.f32.xlu1 %v3536_v16  ;;  %v3530_v17 = vpop.f32.mrb[72].mxu0 }
0x12d3   :  { %v7950_v42 = vpop.f32.mrb[71].mxu1  ;;  %v7955_v18 = vpop.f32.mrb[73].mxu0  ;;  %v3539_v19 = vsel %vm264_vm9, %v3530_v17, -inf }
0x12d4   :  { %3540 = vmax.xlane.f32.xlu0 %v3539_v19  ;;  %v3533_v21 = vpop.f32.mrb[74].mxu0 }
0x12d5   :  { %v7956_v22 = vpop.f32.mrb[75].mxu0 }
0x12e3   :  { %3608 = vrot.lane.b32.xlu1 %v9538_v7, %s8498_s1 }
0x12ea   :  { %3560 = vrot.lane.b32.xlu0 %v9536_v62, %s8498_s1  ;;  %s10395_s1 = sld [smem:[#allocation17_spill]] }
0x135f   :  { %v3538_v23 = vpop.xlane.xlu1 %3537 }
0x1360   :  { %v3542_v24 = vsub.f32 %v3481_v14, %v3538_v23 }
0x1361   :  { %v3541_v43 = vpop.xlane.xlu0 %3540 }
0x1362   :  { %v3544_v39 = vmul.f32 1.442695, %v3542_v24  ;;  %v3543_v28 = vsub.f32 %v3530_v17, %v3541_v43 }
0x1363   :  { %v3609_v32 = vpop.permute.xlu1 %3608 }
0x1364   :  { %8412 = vpow2.f32 %v3544_v39  ;;  %v3546_v33 = vmul.f32 1.442695, %v3543_v28  ;;  %v3614_v29 = vsel %vm167_vm4, %v3609_v32, 0 }
0x1365   :  { %7964 = vmatpush3.bf16.msra.mxu0 %v3614_v29  ;;  %v3561_v34 = vpop.permute.xlu0 %3560 }
0x1366   :  { %8414 = vpow2.f32 %v3546_v33  ;;  %v3566_v35 = vsel %vm167_vm4, %v3561_v34, 0  ;;  %7975 = vmatprep.subr.bf16.mxu0 %v8495_v1 }
0x1367   :  { %7958 = vmatpush3.bf16.msra.mxu1 %v3566_v35 }
0x1368   :  { %7969 = vmatprep.subr.bf16.mxu1 %v8495_v1 }
0x136e   :  { %v8413_v36 = vpop.eup %8412 }
0x136f   :  { %v3548_v25 = vsel %vm264_vm9, %v8413_v36, 0.0 }
0x1370   :  { %v8415_v27 = vpop.eup %8414  ;;  %3549 = vadd.xlane.f32.xlu0 %v3548_v25 }
0x1371   :  { %v3551_v37 = vsel %vm264_vm9, %v8415_v27, 0.0 }
0x1372   :  { %3552 = vadd.xlane.f32.xlu1 %v3551_v37 }
0x1383   :  { %3658 = vrot.lane.b32.xlu1 %v9536_v62, %s8499_s18 }
0x1386   :  { %3708 = vrot.lane.b32.xlu0 %v9538_v7, %s8499_s18  ;;  %s8512_s18 = smov [#allocation5]  }
0x1387   :  { %3656 = vrot.lane.b32.xlu1 %v9536_v62, %s8500_s16 }
0x138a   :  { %3706 = vrot.lane.b32.xlu0 %v9538_v7, %s8500_s16  ;;  %s10393_s16 = smov 24  }
0x13fd   :  { %v3550_v40 = vpop.xlane.xlu0 %3549 }
0x13fe   :  { %8416 = vrcp.f32 %v3550_v40 }
0x13ff   :  { %v3553_v61 = vpop.xlane.xlu1 %3552 }
0x1400   :  { %8418 = vrcp.f32 %v3553_v61 }
0x1401   :  { %v3709_v30 = vpop.permute.xlu0 %3708 }
0x1402   :  { %v3714_v55 = vsel %vm264_vm9, %v3709_v30, 0 }
0x1403   :  { %v3659_v46 = vpop.permute.xlu1 %3658 }
0x1404   :  { %v3664_v51 = vsel %vm264_vm9, %v3659_v46, 0 }
0x1405   :  { %v3707_v58 = vpop.permute.xlu0 %3706 }
0x1407   :  { %v3657_v57 = vpop.permute.xlu1 %3656 }
0x1408   :  { %v8417_v20 = vpop.eup %8416 }
0x1409   :  { %v3556_v38 = vmul.f32 %v8417_v20, %v8413_v36 }
0x140a   :  { %v8419_v49 = vpop.eup %8418 }
0x140b   :  { %v3557_v48 = vmul.f32 %v8419_v49, %v8415_v27  ;;  %v3558_v26 = vpack.c.bf16 %v3556_v38, %v3556_v38 }
0x140d   :  { %7960 = vmatmul.mubr.msk.bf16.vlgmr.msra.gmra.mrb[72].mxu1 %vm264_vm9, %v3558_v26  ;;  %v3559_v52 = vpack.c.bf16 %v3557_v48, %v3557_v48 }
0x140e   :  { %7970 = vmatpush3.bf16.xpose.msra.mxu1 %v3664_v51  ;;  %7971 = vmatprep.mubr.msk.bf16.mxu1 %vm8496_vm0, %v8495_v1 }
0x140f   :  { %7966 = vmatmul.mubr.msk.bf16.vlgmr.msra.gmra.mrb[76].mxu0 %vm264_vm9, %v3559_v52  ;;  %7981 = vmatprep.subr.bf16.mxu1 %v8495_v1 }
0x1410   :  { %7976 = vmatpush3.bf16.xpose.msra.mxu0 %v3714_v55  ;;  %7977 = vmatprep.mubr.msk.bf16.mxu0 %vm8496_vm0, %v8495_v1 }
0x1411   :  { %7987 = vmatprep.subr.bf16.mxu0 %v8495_v1 }
0x1415   :  { %7972 = vmatmul.mubr.msk.bf16.vlgmr.msra.gmra.mrb[76].mxu1 %vm264_vm9, %v3657_v57 }
0x1416   :  { %7983 = vmatprep.mubr.msk.bf16.mxu1 %vm8496_vm0, %v8495_v1 }
0x1417   :  { %7978 = vmatmul.mubr.msk.bf16.vlgmr.msra.gmra.mrb[80].mxu0 %vm264_vm9, %v3707_v58 }
0x1418   :  { %7989 = vmatprep.mubr.msk.bf16.mxu0 %vm8496_vm0, %v8495_v1 }
0x14e0   :  { %v9592_v0 = vpop.f32.mrb[72].mxu1 }
0x14e1   :  { %v7961_v3 = vpop.f32.mrb[73].mxu1 }
0x14e2   :  { %v3605_v4 = vpop.f32.mrb[74].mxu1  ;;  %v9594_v9 = vpop.f32.mrb[76].mxu0 }
0x14e3   :  { %v7962_v10 = vpop.f32.mrb[75].mxu1  ;;  %v7967_v59 = vpop.f32.mrb[77].mxu0 }
0x14e4   :  { %v3653_v5 = vpop.f32.mrb[78].mxu0 }
0x14e5   :  { %v7968_v6 = vpop.f32.mrb[79].mxu0 }
0x14e8   :  { %v3700_v8 = vpop.f32.mrb[76].mxu1 }
0x14e9   :  { %v7973_v11 = vpop.f32.mrb[77].mxu1  ;;  %v3756_v12 = vsel %vm264_vm9, %v3700_v8, -inf }
0x14ea   :  { %3757 = vmax.xlane.f32.xlu1 %v3756_v12  ;;  %v3703_v13 = vpop.f32.mrb[78].mxu1  ;;  %v3750_v14 = vpop.f32.mrb[80].mxu0 }
0x14eb   :  { %v7974_v15 = vpop.f32.mrb[79].mxu1  ;;  %v7979_v16 = vpop.f32.mrb[81].mxu0  ;;  %v3759_v41 = vsel %vm264_vm9, %v3750_v14, -inf }
0x14ec   :  { %3760 = vmax.xlane.f32.xlu0 %v3759_v41  ;;  %v3753_v17 = vpop.f32.mrb[82].mxu0 }
0x14ed   :  { %v7980_v42 = vpop.f32.mrb[83].mxu0 }
0x14fb   :  { %3828 = vrot.lane.b32.xlu1 %v9538_v7, %s8501_s27 }
0x1502   :  { %3780 = vrot.lane.b32.xlu0 %v9536_v62, %s8501_s27 }
0x1577   :  { %v3758_v18 = vpop.xlane.xlu1 %3757 }
0x1578   :  { %v3762_v19 = vsub.f32 %v3700_v8, %v3758_v18 }
0x1579   :  { %v3761_v21 = vpop.xlane.xlu0 %3760 }
0x157a   :  { %v3764_v22 = vmul.f32 1.442695, %v3762_v19  ;;  %v3763_v23 = vsub.f32 %v3750_v14, %v3761_v21 }
0x157b   :  { %v3829_v24 = vpop.permute.xlu1 %3828 }
0x157c   :  { %8420 = vpow2.f32 %v3764_v22  ;;  %v3766_v43 = vmul.f32 1.442695, %v3763_v23  ;;  %v3834_v39 = vsel %vm167_vm4, %v3829_v24, 0 }
0x157d   :  { %7988 = vmatpush3.bf16.msra.mxu0 %v3834_v39  ;;  %v3781_v28 = vpop.permute.xlu0 %3780 }
0x157e   :  { %8422 = vpow2.f32 %v3766_v43  ;;  %v3786_v32 = vsel %vm167_vm4, %v3781_v28, 0  ;;  %7999 = vmatprep.subr.bf16.mxu0 %v8495_v1 }
0x157f   :  { %7982 = vmatpush3.bf16.msra.mxu1 %v3786_v32 }
0x1580   :  { %7993 = vmatprep.subr.bf16.mxu1 %v8495_v1 }
0x1586   :  { %v8421_v33 = vpop.eup %8420 }
0x1587   :  { %v3768_v29 = vsel %vm264_vm9, %v8421_v33, 0.0 }
0x1588   :  { %v8423_v34 = vpop.eup %8422  ;;  %3769 = vadd.xlane.f32.xlu0 %v3768_v29 }
0x1589   :  { %v3771_v35 = vsel %vm264_vm9, %v8423_v34, 0.0 }
0x158a   :  { %3772 = vadd.xlane.f32.xlu1 %v3771_v35 }
0x159b   :  { %3878 = vrot.lane.b32.xlu1 %v9536_v62, %s8502_s28 }
0x159e   :  { %3928 = vrot.lane.b32.xlu0 %v9538_v7, %s8502_s28 }
0x159f   :  { %3876 = vrot.lane.b32.xlu1 %v9536_v62, %s8503_s17 }
0x15a2   :  { %3926 = vrot.lane.b32.xlu0 %v9538_v7, %s8503_s17 }
0x1615   :  { %v3770_v36 = vpop.xlane.xlu0 %3769 }
0x1616   :  { %8424 = vrcp.f32 %v3770_v36 }
0x1617   :  { %v3773_v25 = vpop.xlane.xlu1 %3772 }
0x1618   :  { %8426 = vrcp.f32 %v3773_v25 }
0x1619   :  { %v3929_v49 = vpop.permute.xlu0 %3928 }
0x161a   :  { %v3934_v26 = vsel %vm264_vm9, %v3929_v49, 0 }
0x161b   :  { %v3879_v61 = vpop.permute.xlu1 %3878 }
0x161c   :  { %v3884_v46 = vsel %vm264_vm9, %v3879_v61, 0 }
0x161d   :  { %v3927_v51 = vpop.permute.xlu0 %3926 }
0x161f   :  { %v3877_v30 = vpop.permute.xlu1 %3876 }
0x1620   :  { %v8425_v27 = vpop.eup %8424 }
0x1621   :  { %v3776_v37 = vmul.f32 %v8425_v27, %v8421_v33 }
0x1622   :  { %v8427_v40 = vpop.eup %8426 }
0x1623   :  { %v3777_v20 = vmul.f32 %v8427_v40, %v8423_v34  ;;  %v3778_v38 = vpack.c.bf16 %v3776_v37, %v3776_v37 }
0x1625   :  { %7984 = vmatmul.mubr.msk.bf16.vlgmr.msra.gmra.mrb[80].mxu1 %vm264_vm9, %v3778_v38  ;;  %v3779_v48 = vpack.c.bf16 %v3777_v20, %v3777_v20 }
0x1626   :  { %7994 = vmatpush3.bf16.xpose.msra.mxu1 %v3884_v46  ;;  %7995 = vmatprep.mubr.msk.bf16.mxu1 %vm8496_vm0, %v8495_v1 }
0x1627   :  { %7990 = vmatmul.mubr.msk.bf16.vlgmr.msra.gmra.mrb[84].mxu0 %vm264_vm9, %v3779_v48  ;;  %8005 = vmatprep.subr.bf16.mxu1 %v8495_v1 }
0x1628   :  { %8000 = vmatpush3.bf16.xpose.msra.mxu0 %v3934_v26  ;;  %8001 = vmatprep.mubr.msk.bf16.mxu0 %vm8496_vm0, %v8495_v1 }
0x1629   :  { %8011 = vmatprep.subr.bf16.mxu0 %v8495_v1 }
0x162d   :  { %7996 = vmatmul.mubr.msk.bf16.vlgmr.msra.gmra.mrb[84].mxu1 %vm264_vm9, %v3877_v30 }
0x162e   :  { %8007 = vmatprep.mubr.msk.bf16.mxu1 %vm8496_vm0, %v8495_v1 }
0x162f   :  { %8002 = vmatmul.mubr.msk.bf16.vlgmr.msra.gmra.mrb[88].mxu0 %vm264_vm9, %v3927_v51 }
0x1630   :  { %8013 = vmatprep.mubr.msk.bf16.mxu0 %vm8496_vm0, %v8495_v1 }
0x16f8   :  { %v9632_v52 = vpop.f32.mrb[80].mxu1 }
0x16f9   :  { %v7985_v55 = vpop.f32.mrb[81].mxu1 }
0x16fa   :  { %v3825_v57 = vpop.f32.mrb[82].mxu1  ;;  %v9634_v58 = vpop.f32.mrb[84].mxu0 }
0x16fb   :  { %v8091_v3 = vpack.i.bf16 %v9634_v58, %v9632_v52  ;;  %v7986_v4 = vpop.f32.mrb[83].mxu1  ;;  %v7991_v10 = vpop.f32.mrb[85].mxu0 }
0x16fc   :  { %v3873_v59 = vpop.f32.mrb[86].mxu0 }
0x16fd   :  { %v7992_v5 = vpop.f32.mrb[87].mxu0 }
0x1700   :  { %v3920_v6 = vpop.f32.mrb[84].mxu1 }
0x1701   :  { %v7997_v8 = vpop.f32.mrb[85].mxu1  ;;  %v3976_v11 = vsel %vm264_vm9, %v3920_v6, -inf }
0x1702   :  { %3977 = vmax.xlane.f32.xlu1 %v3976_v11  ;;  %v3923_v12 = vpop.f32.mrb[86].mxu1  ;;  %v3970_v13 = vpop.f32.mrb[88].mxu0 }
0x1703   :  { %v7998_v14 = vpop.f32.mrb[87].mxu1  ;;  %v8003_v15 = vpop.f32.mrb[89].mxu0  ;;  %v3979_v16 = vsel %vm264_vm9, %v3970_v13, -inf }
0x1704   :  { %3980 = vmax.xlane.f32.xlu0 %v3979_v16  ;;  %v3973_v41 = vpop.f32.mrb[90].mxu0 }
0x1705   :  { %v8004_v17 = vpop.f32.mrb[91].mxu0 }
0x1713   :  { %4048 = vrot.lane.b32.xlu1 %v9538_v7, %s8504_s29 }
0x171a   :  { %4000 = vrot.lane.b32.xlu0 %v9536_v62, %s8504_s29 }
0x178f   :  { %v3978_v42 = vpop.xlane.xlu1 %3977 }
0x1790   :  { %v3982_v18 = vsub.f32 %v3920_v6, %v3978_v42 }
0x1791   :  { %v3981_v19 = vpop.xlane.xlu0 %3980 }
0x1792   :  { %v3984_v21 = vmul.f32 1.442695, %v3982_v18  ;;  %v3983_v22 = vsub.f32 %v3970_v13, %v3981_v19 }
0x1793   :  { %v4049_v23 = vpop.permute.xlu1 %4048 }
0x1794   :  { %8428 = vpow2.f32 %v3984_v21  ;;  %v3986_v24 = vmul.f32 1.442695, %v3983_v22  ;;  %v4054_v43 = vsel %vm167_vm4, %v4049_v23, 0 }
0x1795   :  { %8012 = vmatpush3.bf16.msra.mxu0 %v4054_v43  ;;  %v4001_v39 = vpop.permute.xlu0 %4000 }
0x1796   :  { %8430 = vpow2.f32 %v3986_v24  ;;  %v4006_v28 = vsel %vm167_vm4, %v4001_v39, 0  ;;  %8023 = vmatprep.subr.bf16.mxu0 %v8495_v1 }
0x1797   :  { %8006 = vmatpush3.bf16.msra.mxu1 %v4006_v28 }
0x1798   :  { %8017 = vmatprep.subr.bf16.mxu1 %v8495_v1 }
0x179e   :  { %v8429_v32 = vpop.eup %8428 }
0x179f   :  { %v3988_v33 = vsel %vm264_vm9, %v8429_v32, 0.0 }
0x17a0   :  { %v8431_v29 = vpop.eup %8430  ;;  %3989 = vadd.xlane.f32.xlu0 %v3988_v33 }
0x17a1   :  { %v3991_v34 = vsel %vm264_vm9, %v8431_v29, 0.0 }
0x17a2   :  { %3992 = vadd.xlane.f32.xlu1 %v3991_v34 }
0x17b3   :  { %4098 = vrot.lane.b32.xlu1 %v9536_v62, %s8505_s0 }
0x17b6   :  { %4148 = vrot.lane.b32.xlu0 %v9538_v7, %s8505_s0 }
0x17b7   :  { %4096 = vrot.lane.b32.xlu1 %v9536_v62, %s8506_s15 }
0x17ba   :  { %4146 = vrot.lane.b32.xlu0 %v9538_v7, %s8506_s15 }
0x182d   :  { %v3990_v35 = vpop.xlane.xlu0 %3989 }
0x182e   :  { %8432 = vrcp.f32 %v3990_v35 }
0x182f   :  { %v3993_v36 = vpop.xlane.xlu1 %3992 }
0x1830   :  { %8434 = vrcp.f32 %v3993_v36 }
0x1831   :  { %v4149_v38 = vpop.permute.xlu0 %4148 }
0x1832   :  { %v4154_v48 = vsel %vm264_vm9, %v4149_v38, 0 }
0x1833   :  { %v4099_v40 = vpop.permute.xlu1 %4098 }
0x1834   :  { %v4104_v49 = vsel %vm264_vm9, %v4099_v40, 0  ;;  %v8240_v40 = vld [vmem:[%s10351_s5 + $0x10] sm:$0xff]  }
0x1835   :  { %v4147_v30 = vpop.permute.xlu0 %4146 }
0x1837   :  { %v4097_v26 = vpop.permute.xlu1 %4096 }
0x1838   :  { %v8433_v25 = vpop.eup %8432 }
0x1839   :  { %v3996_v27 = vmul.f32 %v8433_v25, %v8429_v32 }
0x183a   :  { %v8435_v37 = vpop.eup %8434 }
0x183b   :  { %v3997_v61 = vmul.f32 %v8435_v37, %v8431_v29  ;;  %v3998_v20 = vpack.c.bf16 %v3996_v27, %v3996_v27 }
0x183d   :  { %8008 = vmatmul.mubr.msk.bf16.vlgmr.msra.gmra.mrb[88].mxu1 %vm264_vm9, %v3998_v20  ;;  %v3999_v46 = vpack.c.bf16 %v3997_v61, %v3997_v61  ;;  %v8241_v61 = vld [vmem:[%s10351_s5 + $0x18] sm:$0xff]  }
0x183e   :  { %8018 = vmatpush3.bf16.xpose.msra.mxu1 %v4104_v49  ;;  %8019 = vmatprep.mubr.msk.bf16.mxu1 %vm8496_vm0, %v8495_v1 }
0x183f   :  { %8014 = vmatmul.mubr.msk.bf16.vlgmr.msra.gmra.mrb[92].mxu0 %vm264_vm9, %v3999_v46  ;;  %8029 = vmatprep.subr.bf16.mxu1 %v8495_v1 }
0x1840   :  { %8024 = vmatpush3.bf16.xpose.msra.mxu0 %v4154_v48  ;;  %8025 = vmatprep.mubr.msk.bf16.mxu0 %vm8496_vm0, %v8495_v1 }
0x1841   :  { %8035 = vmatprep.subr.bf16.mxu0 %v8495_v1 }
0x1845   :  { %8020 = vmatmul.mubr.msk.bf16.vlgmr.msra.gmra.mrb[92].mxu1 %vm264_vm9, %v4097_v26 }
0x1846   :  { %8031 = vmatprep.mubr.msk.bf16.mxu1 %vm8496_vm0, %v8495_v1 }
0x1847   :  { %8026 = vmatmul.mubr.msk.bf16.vlgmr.msra.gmra.mrb[96].mxu0 %vm264_vm9, %v4147_v30 }
0x1848   :  { %8037 = vmatprep.mubr.msk.bf16.mxu0 %vm8496_vm0, %v8495_v1 }
0x1910   :  { %v4042_v51 = vpop.f32.mrb[88].mxu1 }
0x1911   :  { %v8009_v55 = vpop.f32.mrb[89].mxu1 }
0x1912   :  { %v4045_v57 = vpop.f32.mrb[90].mxu1  ;;  %v4090_v4 = vpop.f32.mrb[92].mxu0 }
0x1913   :  { %v8096_v10 = vpack.i.bf16 %v4090_v4, %v4042_v51  ;;  %v8010_v59 = vpop.f32.mrb[91].mxu1  ;;  %v8015_v5 = vpop.f32.mrb[93].mxu0 }
0x1914   :  { %v4093_v6 = vpop.f32.mrb[94].mxu0 }
0x1915   :  { %v8016_v8 = vpop.f32.mrb[95].mxu0 }
0x1918   :  { %v4140_v11 = vpop.f32.mrb[92].mxu1 }
0x1919   :  { %v8021_v12 = vpop.f32.mrb[93].mxu1  ;;  %v4196_v13 = vsel %vm264_vm9, %v4140_v11, -inf }
0x191a   :  { %4197 = vmax.xlane.f32.xlu1 %v4196_v13  ;;  %v4143_v14 = vpop.f32.mrb[94].mxu1  ;;  %v4190_v15 = vpop.f32.mrb[96].mxu0 }
0x191b   :  { %v8022_v16 = vpop.f32.mrb[95].mxu1  ;;  %v8027_v41 = vpop.f32.mrb[97].mxu0  ;;  %v4199_v17 = vsel %vm264_vm9, %v4190_v15, -inf }
0x191c   :  { %4200 = vmax.xlane.f32.xlu0 %v4199_v17  ;;  %v4193_v42 = vpop.f32.mrb[98].mxu0 }
0x191d   :  { %v8028_v18 = vpop.f32.mrb[99].mxu0 }
0x19a7   :  { %v4198_v19 = vpop.xlane.xlu1 %4197 }
0x19a8   :  { %v4202_v21 = vsub.f32 %v4140_v11, %v4198_v19 }
0x19a9   :  { %v4201_v22 = vpop.xlane.xlu0 %4200 }
0x19aa   :  { %v4204_v23 = vmul.f32 1.442695, %v4202_v21  ;;  %v4203_v24 = vsub.f32 %v4190_v15, %v4201_v22 }
0x19ac   :  { %8436 = vpow2.f32 %v4204_v23  ;;  %v4206_v43 = vmul.f32 1.442695, %v4203_v24 }
0x19ae   :  { %8438 = vpow2.f32 %v4206_v43 }
0x19b6   :  { %v8437_v39 = vpop.eup %8436 }
0x19b7   :  { %v4208_v28 = vsel %vm264_vm9, %v8437_v39, 0.0 }
0x19b8   :  { %v8439_v32 = vpop.eup %8438  ;;  %4209 = vadd.xlane.f32.xlu0 %v4208_v28 }
0x19b9   :  { %v4211_v33 = vsel %vm264_vm9, %v8439_v32, 0.0 }
0x19ba   :  { %4212 = vadd.xlane.f32.xlu1 %v4211_v33 }
0x19cb   :  { %4268 = vrot.lane.b32.xlu1 %v9538_v7, %s8507_s8 }
0x19ce   :  { %4220 = vrot.lane.b32.xlu0 %v9536_v62, %s8507_s8 }
0x19cf   :  { %8092 = vrot.lane.b32.xlu1 %v8091_v3, %s8508_s10 }
0x19d2   :  { %8097 = vrot.lane.b32.xlu0 %v8096_v10, %s8509_s13 }
0x1a45   :  { %v4210_v29 = vpop.xlane.xlu0 %4209 }
0x1a46   :  { %8440 = vrcp.f32 %v4210_v29 }
0x1a47   :  { %v4213_v34 = vpop.xlane.xlu1 %4212 }
0x1a48   :  { %8442 = vrcp.f32 %v4213_v34 }
0x1a49   :  { %v4221_v35 = vpop.permute.xlu0 %4220 }
0x1a4a   :  { %v4226_v36 = vsel %vm167_vm4, %v4221_v35, 0 }
0x1a4b   :  { %v4269_v25 = vpop.permute.xlu1 %4268  ;;  %8030 = vmatpush3.bf16.msra.mxu1 %v4226_v36 }
0x1a4c   :  { %v4274_v7 = vsel %vm167_vm4, %v4269_v25, 0  ;;  %8041 = vmatprep.subr.bf16.mxu1 %v8495_v1 }
0x1a4d   :  { %8036 = vmatpush3.bf16.msra.mxu0 %v4274_v7  ;;  %v8098_v59 = vpop.permute.xlu0 %8097 }
0x1a4e   :  { %v8100_v8 = vunpack.i.h.bf16 %v8098_v59  ;;  %v8099_v11 = vunpack.i.l.bf16 %v8098_v59 }
0x1a4f   :  { %v8093_v57 = vpop.permute.xlu1 %8092 }
0x1a50   :  { %v8441_v62 = vpop.eup %8440  ;;  %v8095_v4 = vunpack.i.h.bf16 %v8093_v57  ;;  %v8094_v10 = vunpack.i.l.bf16 %v8093_v57  ;;  %v6936_v57 = vld [vmem:[%s10353_s7 + $0x150] sm:$0xff] }
0x1a51   :  { %v4216_v27 = vmul.f32 %v8441_v62, %v8437_v39 }
0x1a52   :  { %v8443_v52 = vpop.eup %8442  ;;  %v4341_v5 = vsel %vm264_vm9, %v9594_v9, %v8095_v4  ;;  %v4340_v6 = vsel %vm264_vm9, %v9592_v0, %v8094_v10  ;;  %v6918_v0 = vld [vmem:[%s10352_s6 + $0x1] ss:$0 sm:$0xff]  ;;  %v6929_v4 = vld [vmem:[%s10353_s7 + $0x118] sm:$0xff] }
0x1a53   :  { %v4217_v58 = vmul.f32 %v8443_v52, %v8439_v32  ;;  %v4218_v3 = vpack.c.bf16 %v4216_v27, %v4216_v27  ;;  %v4342_v15 = vsel %vm1166_vm10, %v4340_v6, %v8099_v11  ;;  %v4343_v16 = vsel %vm1166_vm10, %v4341_v5, %v8100_v8  ;;  %v6934_v27 = vld [vmem:[%s10353_s7 + $0x140] sm:$0xff]  ;;  %v6927_v52 = vld [vmem:[%s10353_s7 + $0x108] sm:$0xff]  ;;  %v6937_v5 = vld [vmem:[%s10353_s7 + $0x158] sm:$0xff] }
0x1a54   :  { %v6966_v6 = vcombine.low %v6929_v4, %v6937_v5  ;;  %v6967_v8 = vcombine.high %v6929_v4, %v6937_v5  ;;  %v6956_v4 = vld [vmem:[%s10353_s7 + $0x1f0] sm:$0xff] }
0x1a55   :  { %8032 = vmatmul.mubr.msk.bf16.vlgmr.msra.gmra.mrb[96].mxu1 %vm264_vm9, %v4218_v3  ;;  %v4219_v37 = vpack.c.bf16 %v4217_v58, %v4217_v58  ;;  %v6935_v3 = vld [vmem:[%s10353_s7 + $0x148] sm:$0xff] }
0x1a56   :  { %8045 = vmatprep.mubr.msk.bf16.mxu1 %vm8496_vm0, %v8495_v1  ;;  %8042 = vmatpush3.bf16.msra.mxu1 %v8240_v40  ;;  %v6962_v40 = vcombine.low %v6927_v52, %v6935_v3 }
0x1a57   :  { %8038 = vmatmul.mubr.msk.bf16.vlgmr.msra.gmra.mrb[100].mxu0 %vm264_vm9, %v4219_v37  ;;  %8043 = vmatprep.subr.bf16.mxu1 %v8495_v1 }
0x1a58   :  { %4771 = vmatprep.mubr.bf16.mxu0 %v8511_v2 }
0x1a5a   :  { %8044 = vmatpush3.bf16.msra.mxu1 %v8241_v61  ;;  %v6963_v61 = vcombine.high %v6927_v52, %v6935_v3  ;;  %v6954_v52 = vld [vmem:[%s10353_s7 + $0x1e0] sm:$0xff]  ;;  %v6955_v3 = vld [vmem:[%s10353_s7 + $0x1e8] sm:$0xff] }
0x1a5c   :  { %4782 = vmatprep.subr.bf16.mxu1 %v6963_v61 }
0x1b28   :  { %v4262_v20 = vpop.f32.mrb[96].mxu1 }
0x1b29   :  { %v8033_v38 = vpop.f32.mrb[97].mxu1 }
0x1b2a   :  { %v4265_v49 = vpop.f32.mrb[98].mxu1  ;;  %v4310_v46 = vpop.f32.mrb[100].mxu0  ;;  %v6950_v38 = vld [vmem:[%s10353_s7 + $0x1c0] sm:$0xff] }
0x1b2b   :  { %v8101_v48 = vpack.i.bf16 %v4310_v46, %v4262_v20  ;;  %v8034_v26 = vpop.f32.mrb[99].mxu1  ;;  %v8039_v30 = vpop.f32.mrb[101].mxu0  ;;  %v6942_v20 = vld [vmem:[%s10353_s7 + $0x180] sm:$0xff]  ;;  %v6943_v49 = vld [vmem:[%s10353_s7 + $0x188] sm:$0xff] }
0x1b2c   :  { %v4313_v51 = vpop.f32.mrb[102].mxu0  ;;  %v6977_v46 = vcombine.high %v6942_v20, %v6950_v38  ;;  %v6976_v26 = vcombine.low %v6942_v20, %v6950_v38  ;;  %v6932_v38 = vld [vmem:[%s10353_s7 + $0x130] sm:$0xff] }
0x1b2d   :  { %8102 = vrot.lane.b32.xlu1 %v8101_v48, %s10393_s16  ;;  %v8040_v55 = vpop.f32.mrb[103].mxu0  ;;  %v6951_v48 = vld [vmem:[%s10353_s7 + $0x1c8] sm:$0xff]  ;;  %s6651_s16 = sshll.u32 %s8512_s18, 4  ;;  %s6652_s16 = int_to_ptr.vmem [resolvable:$true] %s6651_s16 }
0x1b2e   :  { %v6978_v30 = vcombine.low %v6943_v49, %v6951_v48  ;;  %v6979_v51 = vcombine.high %v6943_v49, %v6951_v48  ;;  %v6928_v55 = vld [vmem:[%s10353_s7 + $0x110] sm:$0xff]  ;;  %v6941_v48 = vld [vmem:[%s10353_s7 + $0x178] sm:$0xff]  ;;  %s8468_s5 = scalar_lea.vmem %s6652_s16, 32  ;;  %p8473_p6 = scmp.lt.s32.totalorder %s6652_s16, %s6652_s16 }
0x1b2f   :  { %v6964_v10 = vcombine.low %v6928_v55, %v6936_v57  ;;  %v6965_v59 = vcombine.high %v6928_v55, %v6936_v57  ;;  %v6940_v49 = vld [vmem:[%s10353_s7 + $0x170] sm:$0xff]  ;;  %p8469_p5 = scmp.ne.s32.totalorder %s6652_s16, %s8468_s5  ;;  %p8474_p7 = scmp.lt.s32.totalorder %s8468_s5, %s8468_s5 }
0x1b30   :  { %v6948_v57 = vld [vmem:[%s10353_s7 + $0x1b0] sm:$0xff]  ;;  %v6972_v5 = vcombine.low %v6932_v38, %v6940_v49 }
0x1b31   :  { %p8475_p8 = por %p8474_p7, %p8473_p6 }
0x1b33   :  { %p8476_p9 = pnand %p8475_p8, %p8469_p5 }
0x1b9f   :  { %v8103_v12 = vpop.permute.xlu1 %8102 }
0x1ba0   :  { %v8105_v13 = vunpack.i.h.bf16 %v8103_v12  ;;  %v8104_v14 = vunpack.i.l.bf16 %v8103_v12 }
0x1ba2   :  { %v4345_v41 = vsel %vm1169_vm11, %v4343_v16, %v8105_v13  ;;  %v4344_v17 = vsel %vm1169_vm11, %v4342_v15, %v8104_v14 }
0x1ba3   :  { %v4346_v42 = vpack.c.bf16 %v4345_v41, %v4344_v17 }
0x1ba5   :  { %8046 = vmatmul.mubr.msk.bf16.vlgmr.msra.gmra.mrb[100].mxu1 %vm214_vm8, %v4346_v42  ;;  %v6923_v42 = vld [vmem:[%s10357_s11 + $0x1] ss:$0 sm:$0xff] }
0x1ba6   :  { %4814 = vmatprep.mubr.bf16.mxu1 %v8511_v2  ;;  %4783 = vmatpush1.bf16.msra.mxu1 %v6962_v40 }
0x1ba7   :  { %4784 = vmatprep.subr.bf16.mxu1 %v6979_v51  ;;  %v6973_v51 = vcombine.high %v6932_v38, %v6940_v49 }
0x1baa   :  { %4785 = vmatpush1.bf16.msra.mxu1 %v6978_v30 }
0x1bab   :  { %4868 = vmatprep.subr.bf16.mxu1 %v6967_v8  ;;  %v6989_v8 = vcombine.high %v6948_v57, %v6956_v4 }
0x1c78   :  { %v4402_v9 = vpop.f32.mrb[100].mxu1 }
0x1c79   :  { %v4403_v18 = vadd.f32 %v6918_v0, %v4402_v9  ;;  %v8047_v19 = vpop.f32.mrb[101].mxu1 }
0x1c7a   :  { %v4405_v21 = vpop.f32.mrb[102].mxu1  ;;  %v6925_v19 = vld [vmem:[%s10358_s12 + $0x1] ss:$0 sm:$0xff] }
0x1c7b   :  { %v4406_v22 = vadd.f32 %v6918_v0, %v4405_v21  ;;  %v8048_v23 = vpop.f32.mrb[103].mxu1  ;;  %v4409_v24 = vadd.f32 %v4403_v18, %v9524_v60 }
0x1c7c   :  { %v6952_v23 = vld [vmem:[%s10353_s7 + $0x1d0] sm:$0xff] }
0x1c7d   :  { %v4410_v43 = vadd.f32 %v4406_v22, %v9526_v63  ;;  %v4411_v39 = vsel %vm214_vm8, %v4409_v24, 0.0  ;;  %v6926_v63 = vld [vmem:[%s10353_s7 + $0x100] sm:$0xff]  ;;  %v6944_v22 = vld [vmem:[%s10353_s7 + $0x190] sm:$0xff] }
0x1c7e   :  { %4412 = vadd.xlane.f32.xlu0 %v4411_v39  ;;  %v6961_v58 = vcombine.high %v6926_v63, %v6934_v27  ;;  %v6960_v37 = vcombine.low %v6926_v63, %v6934_v27  ;;  %v6946_v27 = vld [vmem:[%s10353_s7 + $0x1a0] sm:$0xff] }
0x1c7f   :  { %v4414_v28 = vsel %vm214_vm8, %v4410_v43, 0.0  ;;  %v6985_v61 = vcombine.high %v6946_v27, %v6954_v52 }
0x1c80   :  { %4415 = vadd.xlane.f32.xlu1 %v4414_v28  ;;  %4739 = vmatprep.subr.bf16.mxu0 %v6961_v58  ;;  %v6947_v58 = vld [vmem:[%s10353_s7 + $0x1a8] sm:$0xff] }
0x1c81   :  { %4740 = vmatpush1.bf16.msra.mxu0 %v6960_v37  ;;  %v6987_v20 = vcombine.high %v6947_v58, %v6955_v3  ;;  %v6986_v30 = vcombine.low %v6947_v58, %v6955_v3  ;;  %v8271_v58 = vld [vmem:[%s10387_s26 + $0x4f8] sm:$0xff]  }
0x1c82   :  { %4741 = vmatprep.subr.bf16.mxu0 %v6977_v46  ;;  %v6933_v46 = vld [vmem:[%s10353_s7 + $0x138] sm:$0xff] }
0x1c83   :  { %v6975_v55 = vcombine.high %v6933_v46, %v6941_v48  ;;  %v8272_v3 = vld [vmem:[%s10387_s26 + $0x438] sm:$0xff]  }
0x1c85   :  { %4742 = vmatpush1.bf16.msra.mxu0 %v6976_v26  ;;  %v6984_v26 = vcombine.low %v6946_v27, %v6954_v52  ;;  %v8269_v27 = vld [vmem:[%s10387_s26 + $0x4b0] sm:$0xff]   ;;  %v8270_v52 = vld [vmem:[%s10387_s26 + $0x478] sm:$0xff]  }
0x1c86   :  { %4825 = vmatprep.subr.bf16.mxu0 %v6965_v59  ;;  %v6957_v59 = vld [vmem:[%s10353_s7 + $0x1f8] sm:$0xff] }
0x1d0b   :  { %v4413_v32 = vpop.xlane.xlu0 %4412 }
0x1d0c   :  { %v4417_v33 = vmul.f32 0.03125, %v4413_v32 }
0x1d0d   :  { %v4416_v29 = vpop.xlane.xlu1 %4415 }
0x1d0e   :  { %v4419_v34 = vsub.f32 %v4409_v24, %v4417_v33  ;;  %v4418_v35 = vmul.f32 0.03125, %v4416_v29  ;;  %v6945_v24 = vld [vmem:[%s10353_s7 + $0x198] sm:$0xff]  ;;  %v6981_v33 = vcombine.high %v6944_v22, %v6952_v23 }
0x1d10   :  { %v4420_v36 = vsub.f32 %v4410_v43, %v4418_v35  ;;  %v4421_v25 = vmul.f32 %v4419_v34, %v4419_v34  ;;  %v6953_v43 = vld [vmem:[%s10353_s7 + $0x1d8] sm:$0xff]  ;;  %v6938_v35 = vld [vmem:[%s10353_s7 + $0x160] sm:$0xff] }
0x1d11   :  { %v6983_v29 = vcombine.high %v6945_v24, %v6953_v43 }
0x1d12   :  { %v4423_v7 = vsel %vm214_vm8, %v4421_v25, 0.0  ;;  %v4422_v62 = vmul.f32 %v4420_v36, %v4420_v36  ;;  %v6939_v25 = vld [vmem:[%s10353_s7 + $0x168] sm:$0xff] }
0x1d13   :  { %4424 = vadd.xlane.f32.xlu0 %v4423_v7  ;;  %v6980_v7 = vcombine.low %v6944_v22, %v6952_v23  ;;  %v8254_v22 = vld [vmem:[%s10387_s26 + $0x458] sm:$0xff]  }
0x1d14   :  { %v4426_v60 = vsel %vm214_vm8, %v4422_v62, 0.0  ;;  %v6982_v62 = vcombine.low %v6945_v24, %v6953_v43  ;;  %v8255_v23 = vld [vmem:[%s10387_s26 + $0x4d8] sm:$0xff]  }
0x1d15   :  { %v8256_v24 = vld [vmem:[%s10387_s26 + $0x418] sm:$0xff]  }
0x1d16   :  { %v8257_v43 = vld [vmem:[%s10387_s26 + $0x498] sm:$0xff]  }
0x1d17   :  { %4427 = vadd.xlane.f32.xlu0 %v4426_v60 }
0x1da0   :  { %v4425_v11 = vpop.xlane.xlu0 %4424 }
0x1da1   :  { %v4429_v12 = vmul.f32 0.03125, %v4425_v11 }
0x1da3   :  { %v4431_v13 = vadd.f32 1e-05, %v4429_v12  ;;  %v6988_v12 = vcombine.low %v6948_v57, %v6956_v4 }
0x1da4   :  { %v4428_v14 = vpop.xlane.xlu0 %4427 }
0x1da5   :  { %8444 = vrsqrt.f32 %v4431_v13  ;;  %v4430_v15 = vmul.f32 0.03125, %v4428_v14  ;;  %v8242_v14 = vld [vmem:[%s10387_s26 + $0x440] sm:$0xff]  }
0x1da7   :  { %v4432_v16 = vadd.f32 1e-05, %v4430_v15  ;;  %v8243_v15 = vld [vmem:[%s10387_s26 + $0x4c0] sm:$0xff]  }
0x1da9   :  { %8446 = vrsqrt.f32 %v4432_v16  ;;  %v8244_v16 = vld [vmem:[%s10387_s26 + $0x400] sm:$0xff]  }
0x1daf   :  { %v8445_v41 = vpop.eup %8444 }
0x1db0   :  { %v4435_v17 = vmul.f32 %v8445_v41, %v4419_v34  ;;  %v6930_v34 = vld [vmem:[%s10353_s7 + $0x120] sm:$0xff] }
0x1db1   :  { %v6969_v60 = vcombine.high %v6930_v34, %v6938_v35  ;;  %v6968_v37 = vcombine.low %v6930_v34, %v6938_v35  ;;  %v8245_v41 = vld [vmem:[%s10387_s26 + $0x480] sm:$0xff]   ;;  %v8262_v35 = vld [vmem:[%s10387_s26 + $0x468] sm:$0xff]  }
0x1db2   :  { %v4445_v9 = vmul.f32 %v6923_v42, %v4435_v17  ;;  %v8246_v17 = vld [vmem:[%s10387_s26 + $0x448] sm:$0xff]   ;;  %v8261_v34 = vld [vmem:[%s10387_s26 + $0x4a0] sm:$0xff]  }
0x1db3   :  { %v8447_v0 = vpop.eup %8446 }
0x1db4   :  { %v4436_v18 = vmul.f32 %v8447_v0, %v4420_v36  ;;  %v9776_v39 = vadd.f32 %v6925_v19, %v4445_v9  ;;  %v6931_v36 = vld [vmem:[%s10353_s7 + $0x128] sm:$0xff]  ;;  %v8250_v9 = vld [vmem:[%s10387_s26 + $0x450] sm:$0xff]  }
0x1db5   :  { %v6971_v63 = vcombine.high %v6931_v36, %v6939_v25  ;;  %v6970_v40 = vcombine.low %v6931_v36, %v6939_v25  ;;  %v8249_v0 = vld [vmem:[%s10387_s26 + $0x488] sm:$0xff]  }
0x1db6   :  { %v4446_v21 = vmul.f32 %v6923_v42, %v4436_v18  ;;  %v8248_v42 = vld [vmem:[%s10387_s26 + $0x408] sm:$0xff]   ;;  %v8251_v18 = vld [vmem:[%s10387_s26 + $0x4d0] sm:$0xff]  }
0x1db7   :  { %v8263_v36 = vld [vmem:[%s10387_s26 + $0x4e8] sm:$0xff]  }
0x1db8   :  { %v9778_v28 = vadd.f32 %v6925_v19, %v4446_v21  ;;  %v8252_v19 = vld [vmem:[%s10387_s26 + $0x410] sm:$0xff]   ;;  %v8264_v25 = vld [vmem:[%s10387_s26 + $0x428] sm:$0xff]  }
0x1db9   :  { %v8253_v21 = vld [vmem:[%s10387_s26 + $0x490] sm:$0xff]  }
0x1dba   :  { %v9782_v32 = vpack.c.bf16 %v9778_v28, %v9776_v39 }
0x1dbc   :  { %6992 = vmatmul.mubr.msk.bf16.vlgmr.msra.gmra.mrb[104].mxu0 %vm214_vm8, %v9782_v32  ;;  %6993 = vmatmul.mubr.msk.bf16.vlgmr.msra.gmra.mrb[104].mxu1 %vm214_vm8, %v9782_v32 }
0x1dbd   :  { %4826 = vmatpush1.bf16.msra.mxu0 %v6964_v10  ;;  %4869 = vmatpush1.bf16.msra.mxu1 %v6966_v6  ;;  %v6949_v10 = vld [vmem:[%s10353_s7 + $0x1b8] sm:$0xff]  ;;  %v6974_v6 = vcombine.low %v6933_v46, %v6941_v48 }
0x1dbe   :  { %4827 = vmatprep.subr.bf16.mxu0 %v6981_v33  ;;  %4870 = vmatprep.subr.bf16.mxu1 %v6983_v29  ;;  %v6991_v11 = vcombine.high %v6949_v10, %v6957_v59  ;;  %v6990_v13 = vcombine.low %v6949_v10, %v6957_v59  ;;  %v8259_v33 = vld [vmem:[%s10387_s26 + $0x4e0] sm:$0xff]  }
0x1dbf   :  { %4857 = vmatprep.mubr.bf16.mxu0 %v8511_v2  ;;  %4900 = vmatprep.mubr.bf16.mxu1 %v8511_v2  ;;  %v8260_v29 = vld [vmem:[%s10387_s26 + $0x420] sm:$0xff]  }
0x1dc1   :  { %4828 = vmatpush1.bf16.msra.mxu0 %v6980_v7  ;;  %4871 = vmatpush1.bf16.msra.mxu1 %v6982_v62  ;;  %v8265_v7 = vld [vmem:[%s10387_s26 + $0x4a8] sm:$0xff]   ;;  %v8266_v62 = vld [vmem:[%s10387_s26 + $0x470] sm:$0xff]  }
0x1dc2   :  { %4911 = vmatprep.subr.bf16.mxu0 %v6969_v60  ;;  %4954 = vmatprep.subr.bf16.mxu1 %v6971_v63  ;;  %v8267_v60 = vld [vmem:[%s10387_s26 + $0x4f0] sm:$0xff]  }
0x1dc3   :  { %v8268_v63 = vld [vmem:[%s10387_s26 + $0x430] sm:$0xff]  }
0x1dc4   :  { %6994 = vmatmul.mubr.msk.bf16.vlgmr.msra.gmra.mrb[108].mxu0 %vm214_vm8, %v9782_v32  ;;  %6995 = vmatmul.mubr.msk.bf16.vlgmr.msra.gmra.mrb[108].mxu1 %vm214_vm8, %v9782_v32 }
0x1dc5   :  { %4912 = vmatpush1.bf16.msra.mxu0 %v6968_v37  ;;  %4955 = vmatpush1.bf16.msra.mxu1 %v6970_v40  ;;  %v8273_v37 = vld [vmem:[%s10387_s26 + $0x4b8] sm:$0xff]   ;;  %v8274_v40 = vld [vmem:[%s10387_s26 + $0x540] sm:$0xff]  }
0x1dc6   :  { %4913 = vmatprep.subr.bf16.mxu0 %v6985_v61  ;;  %4956 = vmatprep.subr.bf16.mxu1 %v6987_v20  ;;  %v8275_v61 = vld [vmem:[%s10387_s26 + $0x5c0] sm:$0xff]   ;;  %v6958_v20 = vld [vmem:[%s10388_s25 + $0x10] sm:$0xff] }
0x1dc7   :  { %4943 = vmatprep.mubr.bf16.mxu0 %v8511_v2  ;;  %4986 = vmatprep.mubr.bf16.mxu1 %v8511_v2  ;;  %v4499_v38 = vrot.slane %v6958_v20, %v9135_v44  ;;  %v4507_v49 = vrot.slane %v6958_v20, %v9137_v45  ;;  %v4503_v46 = vrot.slane %v6958_v20, %v9142_v56 }
0x1dc8   :  { %v4511_v48 = vrot.slane %v6958_v20, %v9144_v47 }
0x1dc9   :  { %4914 = vmatpush1.bf16.msra.mxu0 %v6984_v26  ;;  %4957 = vmatpush1.bf16.msra.mxu1 %v6986_v30 }
0x1dca   :  { %4997 = vmatprep.subr.bf16.mxu0 %v6973_v51  ;;  %5040 = vmatprep.subr.bf16.mxu1 %v6975_v55 }
0x1dcc   :  { %6996 = vmatmul.mubr.msk.bf16.vlgmr.msra.gmra.mrb[112].mxu0 %vm214_vm8, %v9782_v32  ;;  %6997 = vmatmul.mubr.msk.bf16.vlgmr.msra.gmra.mrb[112].mxu1 %vm214_vm8, %v9782_v32 }
0x1dcd   :  { %4998 = vmatpush1.bf16.msra.mxu0 %v6972_v5  ;;  %5041 = vmatpush1.bf16.msra.mxu1 %v6974_v6 }
0x1dce   :  { %4999 = vmatprep.subr.bf16.mxu0 %v6989_v8  ;;  %5042 = vmatprep.subr.bf16.mxu1 %v6991_v11 }
0x1dcf   :  { %5029 = vmatprep.mubr.bf16.mxu0 %v8511_v2  ;;  %5072 = vmatprep.mubr.bf16.mxu1 %v8511_v2  ;;  %v8247_v2 = vld [vmem:[%s10387_s26 + $0x4c8] sm:$0xff]  }
0x1dd1   :  { %5000 = vmatpush1.bf16.msra.mxu0 %v6988_v12  ;;  %5043 = vmatpush1.bf16.msra.mxu1 %v6990_v13 }
0x1dd2   :  { %7646 = vmatprep.subr.bf16.mxu0 %v8242_v14  ;;  %7668 = vmatprep.subr.bf16.mxu1 %v8243_v15  ;;  %v4515_v14 = vrot.slane %v6958_v20, %v9150_v31  ;;  %v4523_v15 = vrot.slane %v6958_v20, %v9152_v50 }
0x1dd4   :  { %6998 = vmatmul.mubr.msk.bf16.vlgmr.msra.gmra.mrb[116].mxu0 %vm214_vm8, %v9782_v32  ;;  %6999 = vmatmul.mubr.msk.bf16.vlgmr.msra.gmra.mrb[116].mxu1 %vm214_vm8, %v9782_v32  ;;  %v8258_v32 = vld [vmem:[%s10387_s26 + $0x460] sm:$0xff]  }
0x1dd5   :  { %7647 = vmatpush3.bf16.msra.mxu0 %v8244_v16  ;;  %7669 = vmatpush3.bf16.msra.mxu1 %v8245_v41 }
0x1dd6   :  { %7648 = vmatprep.subr.bf16.mxu0 %v8246_v17  ;;  %7670 = vmatprep.subr.bf16.mxu1 %v8247_v2  ;;  %v4519_v17 = vrot.slane %v6958_v20, %v9154_v53  ;;  %v4527_v2 = vrot.slane %v6958_v20, %v9156_v54 }
0x1dd9   :  { %7649 = vmatpush3.bf16.msra.mxu0 %v8248_v42  ;;  %7671 = vmatpush3.bf16.msra.mxu1 %v8249_v0 }
0x1dda   :  { %7650 = vmatprep.subr.bf16.mxu0 %v8250_v9  ;;  %7672 = vmatprep.subr.bf16.mxu1 %v8251_v18 }
0x1ddd   :  { %7651 = vmatpush3.bf16.msra.mxu0 %v8252_v19  ;;  %7673 = vmatpush3.bf16.msra.mxu1 %v8253_v21 }
0x1dde   :  { %7652 = vmatprep.subr.bf16.mxu0 %v8254_v22  ;;  %7674 = vmatprep.subr.bf16.mxu1 %v8255_v23 }
0x1de1   :  { %7653 = vmatpush3.bf16.msra.mxu0 %v8256_v24  ;;  %7675 = vmatpush3.bf16.msra.mxu1 %v8257_v43  ;;  %v9970_v24 = vld [vmem:[%s10388_s25 + $0x18] sm:$0xff] }
0x1de2   :  { %7654 = vmatprep.subr.bf16.mxu0 %v8258_v32  ;;  %7676 = vmatprep.subr.bf16.mxu1 %v8259_v33  ;;  %v4539_v20 = vrot.slane %v9970_v24, %v9137_v45  ;;  %v8281_v45 = vld [vmem:[%s10387_s26 + $0x588] sm:$0xff]  }
0x1de5   :  { %7655 = vmatpush3.bf16.msra.mxu0 %v8260_v29  ;;  %7677 = vmatpush3.bf16.msra.mxu1 %v8261_v34 }
0x1de6   :  { %7656 = vmatprep.subr.bf16.mxu0 %v8262_v35  ;;  %7678 = vmatprep.subr.bf16.mxu1 %v8263_v36  ;;  %v8276_v36 = vld [vmem:[%s10387_s26 + $0x500] sm:$0xff]  }
0x1de9   :  { %7657 = vmatpush3.bf16.msra.mxu0 %v8264_v25  ;;  %7679 = vmatpush3.bf16.msra.mxu1 %v8265_v7  ;;  %v8277_v25 = vld [vmem:[%s10387_s26 + $0x580] sm:$0xff]  }
0x1dea   :  { %7658 = vmatprep.subr.bf16.mxu0 %v8266_v62  ;;  %7680 = vmatprep.subr.bf16.mxu1 %v8267_v60 }
0x1ded   :  { %7659 = vmatpush3.bf16.msra.mxu0 %v8268_v63  ;;  %7681 = vmatpush3.bf16.msra.mxu1 %v8269_v27  ;;  %v8278_v27 = vld [vmem:[%s10387_s26 + $0x548] sm:$0xff]  }
0x1dee   :  { %7660 = vmatprep.subr.bf16.mxu0 %v8270_v52  ;;  %7682 = vmatprep.subr.bf16.mxu1 %v8271_v58  ;;  %v8279_v52 = vld [vmem:[%s10387_s26 + $0x5c8] sm:$0xff]   ;;  %v4531_v58 = vrot.slane %v9970_v24, %v9135_v44 }
0x1df1   :  { %7661 = vmatpush3.bf16.msra.mxu0 %v8272_v3  ;;  %7683 = vmatpush3.bf16.msra.mxu1 %v8273_v37 }
0x1df2   :  { %7690 = vmatprep.subr.bf16.mxu0 %v8274_v40  ;;  %7712 = vmatprep.subr.bf16.mxu1 %v8275_v61 }
0x1e8f   :  { %v4773_v26 = vpop.f32.mrb[104].mxu0  ;;  %v4816_v30 = vpop.f32.mrb[104].mxu1 }
0x1e90   :  { %v4774_v51 = vadd.f32 %v4773_v26, %v4499_v38  ;;  %v4817_v55 = vadd.f32 %v4816_v30, %v4507_v49  ;;  %v4775_v57 = vpop.f32.mrb[105].mxu0  ;;  %v4818_v4 = vpop.f32.mrb[105].mxu1  ;;  %v4535_v26 = vrot.slane %v9970_v24, %v9142_v56  ;;  %v8282_v56 = vld [vmem:[%s10387_s26 + $0x550] sm:$0xff]  }
0x1e91   :  { %v4776_v10 = vadd.f32 %v4775_v57, %v4503_v46  ;;  %v4819_v59 = vadd.f32 %v4818_v4, %v4511_v48  ;;  %v4777_v5 = vpop.f32.mrb[106].mxu0  ;;  %v4820_v6 = vpop.f32.mrb[106].mxu1 }
0x1e92   :  { %v4778_v8 = vadd.f32 %v4777_v5, %v4499_v38  ;;  %v4821_v11 = vadd.f32 %v4820_v6, %v4507_v49  ;;  %v4779_v12 = vpop.f32.mrb[107].mxu0  ;;  %v4822_v13 = vpop.f32.mrb[107].mxu1  ;;  %v5083_v42 = vmax.f32 %v4774_v51, 0.0  ;;  %v5085_v0 = vmax.f32 %v4817_v55, 0.0  ;;  %v8280_v51 = vld [vmem:[%s10387_s26 + $0x508] sm:$0xff]   ;;  %v8283_v5 = vld [vmem:[%s10387_s26 + $0x5d0] sm:$0xff]  }
0x1e93   :  { %v4780_v16 = vadd.f32 %v4779_v12, %v4503_v46  ;;  %v4823_v41 = vadd.f32 %v4822_v13, %v4511_v48  ;;  %v5084_v19 = vmax.f32 %v4776_v10, 0.0  ;;  %v5086_v21 = vmax.f32 %v4819_v59, 0.0 }
0x1e94   :  { %v5099_v9 = vmax.f32 %v4778_v8, 0.0  ;;  %v5101_v18 = vmax.f32 %v4821_v11, 0.0  ;;  %v4543_v55 = vrot.slane %v9970_v24, %v9144_v47 }
0x1e95   :  { %v5100_v22 = vmax.f32 %v4780_v16, 0.0  ;;  %v5102_v23 = vmax.f32 %v4823_v41, 0.0 }
0x1e96   :  { %v5115_v43 = vpack.c.bf16 %v5099_v9, %v5083_v42  ;;  %v5117_v32 = vpack.c.bf16 %v5101_v18, %v5085_v0 }
0x1e97   :  { %v5116_v33 = vpack.c.bf16 %v5100_v22, %v5084_v19  ;;  %v5118_v29 = vpack.c.bf16 %v5102_v23, %v5086_v21  ;;  %v4859_v34 = vpop.f32.mrb[108].mxu0  ;;  %v4902_v35 = vpop.f32.mrb[108].mxu1  ;;  %v8286_v19 = vld [vmem:[%s10387_s26 + $0x558] sm:$0xff]  }
0x1e98   :  { %v4860_v7 = vadd.f32 %v4859_v34, %v4515_v14  ;;  %v4903_v62 = vadd.f32 %v4902_v35, %v4523_v15  ;;  %v4861_v60 = vpop.f32.mrb[109].mxu0  ;;  %v4904_v63 = vpop.f32.mrb[109].mxu1  ;;  %v8287_v21 = vld [vmem:[%s10387_s26 + $0x5d8] sm:$0xff]  }
0x1e99   :  { %v4862_v3 = vadd.f32 %v4861_v60, %v4519_v17  ;;  %v4905_v37 = vadd.f32 %v4904_v63, %v4527_v2  ;;  %v4863_v40 = vpop.f32.mrb[110].mxu0  ;;  %v4906_v61 = vpop.f32.mrb[110].mxu1  ;;  %6196 = vmatprep.mubr.bf16.mxu0 %v5116_v33  ;;  %6237 = vmatprep.mubr.bf16.mxu1 %v5118_v29  ;;  %v4547_v33 = vrot.slane %v9970_v24, %v9150_v31  ;;  %v8288_v63 = vld [vmem:[%s10387_s26 + $0x518] sm:$0xff]  }
0x1e9a   :  { %v4864_v38 = vadd.f32 %v4863_v40, %v4515_v14  ;;  %v4907_v49 = vadd.f32 %v4906_v61, %v4523_v15  ;;  %v4865_v46 = vpop.f32.mrb[111].mxu0  ;;  %v4908_v48 = vpop.f32.mrb[111].mxu1  ;;  %6197 = vmatmul.mubr.bf16.vlgmr.msra.gmra.mrb[120].mxu0 %v5115_v43  ;;  %6238 = vmatmul.mubr.bf16.vlgmr.msra.gmra.mrb[120].mxu1 %v5117_v32  ;;  %v5087_v57 = vmax.f32 %v4860_v7, 0.0  ;;  %v5089_v4 = vmax.f32 %v4903_v62, 0.0  ;;  %v8289_v31 = vld [vmem:[%s10387_s26 + $0x598] sm:$0xff]  }
0x1e9b   :  { %v4866_v30 = vadd.f32 %v4865_v46, %v4519_v17  ;;  %v4909_v44 = vadd.f32 %v4908_v48, %v4527_v2  ;;  %7691 = vmatpush3.bf16.msra.mxu0 %v8276_v36  ;;  %7713 = vmatpush3.bf16.msra.mxu1 %v8277_v25  ;;  %v5088_v6 = vmax.f32 %v4862_v3, 0.0  ;;  %v5090_v8 = vmax.f32 %v4905_v37, 0.0  ;;  %v8284_v17 = vld [vmem:[%s10387_s26 + $0x510] sm:$0xff]   ;;  %v8291_v37 = vld [vmem:[%s10387_s26 + $0x5e0] sm:$0xff]  }
0x1e9c   :  { %v5103_v10 = vmax.f32 %v4864_v38, 0.0  ;;  %v5105_v59 = vmax.f32 %v4907_v49, 0.0  ;;  %7692 = vmatprep.subr.bf16.mxu0 %v8278_v27  ;;  %7714 = vmatprep.subr.bf16.mxu1 %v8279_v52  ;;  %v8285_v2 = vld [vmem:[%s10387_s26 + $0x590] sm:$0xff]   ;;  %v4555_v25 = vrot.slane %v9970_v24, %v9152_v50  ;;  %v4551_v7 = vrot.slane %v9970_v24, %v9154_v53  ;;  %v8290_v53 = vld [vmem:[%s10387_s26 + $0x560] sm:$0xff]  }
0x1e9d   :  { %v5104_v11 = vmax.f32 %v4866_v30, 0.0  ;;  %v5106_v12 = vmax.f32 %v4909_v44, 0.0  ;;  %v4559_v27 = vrot.slane %v9970_v24, %v9156_v54  ;;  %v8292_v30 = vld [vmem:[%s10387_s26 + $0x520] sm:$0xff]  }
0x1e9e   :  { %v10004_v13 = vpack.c.bf16 %v5103_v10, %v5087_v57  ;;  %v10006_v47 = vpack.c.bf16 %v5105_v59, %v5089_v4  ;;  %v8293_v44 = vld [vmem:[%s10387_s26 + $0x5a0] sm:$0xff]   ;;  %v8294_v4 = vld [vmem:[%s10387_s26 + $0x568] sm:$0xff]  }
0x1e9f   :  { %v5120_v14 = vpack.c.bf16 %v5104_v11, %v5088_v6  ;;  %v5122_v15 = vpack.c.bf16 %v5106_v12, %v5090_v8  ;;  %7693 = vmatpush3.bf16.msra.mxu0 %v8280_v51  ;;  %7715 = vmatpush3.bf16.msra.mxu1 %v8281_v45  ;;  %v4945_v16 = vpop.f32.mrb[112].mxu0  ;;  %v4988_v41 = vpop.f32.mrb[112].mxu1  ;;  %v8295_v10 = vld [vmem:[%s10387_s26 + $0x5e8] sm:$0xff]  }
0x1ea0   :  { %v4946_v42 = vadd.f32 %v4945_v16, %v4531_v58  ;;  %v4989_v0 = vadd.f32 %v4988_v41, %v4539_v20  ;;  %v4947_v9 = vpop.f32.mrb[113].mxu0  ;;  %v4990_v18 = vpop.f32.mrb[113].mxu1  ;;  %7694 = vmatprep.subr.bf16.mxu0 %v8282_v56  ;;  %7716 = vmatprep.subr.bf16.mxu1 %v8283_v5  ;;  %v8296_v41 = vld [vmem:[%s10387_s26 + $0x528] sm:$0xff]  }
0x1ea1   :  { %v4948_v22 = vadd.f32 %v4947_v9, %v4535_v26  ;;  %v4991_v23 = vadd.f32 %v4990_v18, %v4543_v55  ;;  %v4949_v43 = vpop.f32.mrb[114].mxu0  ;;  %v4992_v32 = vpop.f32.mrb[114].mxu1  ;;  %6278 = vmatprep.mubr.bf16.mxu0 %v5120_v14  ;;  %6319 = vmatprep.mubr.bf16.mxu1 %v5122_v15  ;;  %v8298_v18 = vld [vmem:[%s10387_s26 + $0x570] sm:$0xff]  }
0x1ea2   :  { %v4950_v29 = vadd.f32 %v4949_v43, %v4531_v58  ;;  %v4993_v34 = vadd.f32 %v4992_v32, %v4539_v20  ;;  %v4951_v35 = vpop.f32.mrb[115].mxu0  ;;  %v4994_v36 = vpop.f32.mrb[115].mxu1  ;;  %v5091_v52 = vmax.f32 %v4946_v42, 0.0  ;;  %v5093_v50 = vmax.f32 %v4989_v0, 0.0 }
0x1ea3   :  { %v4952_v62 = vadd.f32 %v4951_v35, %v4535_v26  ;;  %v4995_v60 = vadd.f32 %v4994_v36, %v4543_v55  ;;  %7695 = vmatpush3.bf16.msra.mxu0 %v8284_v17  ;;  %7717 = vmatpush3.bf16.msra.mxu1 %v8285_v2  ;;  %v5092_v40 = vmax.f32 %v4948_v22, 0.0  ;;  %v5094_v61 = vmax.f32 %v4991_v23, 0.0  ;;  %v8297_v17 = vld [vmem:[%s10387_s26 + $0x5a8] sm:$0xff]   ;;  %v8300_v35 = vld [vmem:[%s10387_s26 + $0x530] sm:$0xff]  }
0x1ea4   :  { %v5107_v58 = vmax.f32 %v4950_v29, 0.0  ;;  %v5109_v3 = vmax.f32 %v4993_v34, 0.0  ;;  %7696 = vmatprep.subr.bf16.mxu0 %v8286_v19  ;;  %7718 = vmatprep.subr.bf16.mxu1 %v8287_v21  ;;  %v8299_v19 = vld [vmem:[%s10387_s26 + $0x5f0] sm:$0xff]  }
0x1ea5   :  { %v5108_v20 = vmax.f32 %v4952_v62, 0.0  ;;  %v5110_v38 = vmax.f32 %v4995_v60, 0.0  ;;  %v8301_v36 = vld [vmem:[%s10387_s26 + $0x5b0] sm:$0xff]   ;;  %v8304_v62 = vld [vmem:[%s10387_s26 + $0x538] sm:$0xff]  }
0x1ea6   :  { %v10040_v49 = vpack.c.bf16 %v5107_v58, %v5091_v52  ;;  %v10042_v54 = vpack.c.bf16 %v5109_v3, %v5093_v50  ;;  %v8305_v60 = vld [vmem:[%s10387_s26 + $0x5b8] sm:$0xff]   ;;  %v8309_v52 = vld [vmem:[%s10387_s26 + $0x680] sm:$0xff]   ;;  %v8310_v50 = vld [vmem:[%s10387_s26 + $0x648] sm:$0xff]  }
0x1ea7   :  { %v10044_v24 = vpack.c.bf16 %v5108_v20, %v5092_v40  ;;  %v10046_v46 = vpack.c.bf16 %v5110_v38, %v5094_v61  ;;  %7697 = vmatpush3.bf16.msra.mxu0 %v8288_v63  ;;  %7719 = vmatpush3.bf16.msra.mxu1 %v8289_v31  ;;  %v5031_v48 = vpop.f32.mrb[116].mxu0  ;;  %v5074_v26 = vpop.f32.mrb[116].mxu1  ;;  %v8306_v63 = vld [vmem:[%s10387_s26 + $0x640] sm:$0xff]   ;;  %v8311_v58 = vld [vmem:[%s10387_s26 + $0x6c8] sm:$0xff]   ;;  %v8317_v40 = vld [vmem:[%s10387_s26 + $0x690] sm:$0xff]  }
0x1ea8   :  { %v5032_v51 = vadd.f32 %v5031_v48, %v4547_v33  ;;  %v5075_v45 = vadd.f32 %v5074_v26, %v4555_v25  ;;  %v5033_v55 = vpop.f32.mrb[117].mxu0  ;;  %v5076_v57 = vpop.f32.mrb[117].mxu1  ;;  %7698 = vmatprep.subr.bf16.mxu0 %v8290_v53  ;;  %7720 = vmatprep.subr.bf16.mxu1 %v8291_v37  ;;  %v8307_v31 = vld [vmem:[%s10387_s26 + $0x6c0] sm:$0xff]   ;;  %v8312_v3 = vld [vmem:[%s10387_s26 + $0x608] sm:$0xff]   ;;  %v8316_v37 = vld [vmem:[%s10387_s26 + $0x610] sm:$0xff]  }
0x1ea9   :  { %v5034_v59 = vadd.f32 %v5033_v55, %v4551_v7  ;;  %v5077_v56 = vadd.f32 %v5076_v57, %v4559_v27  ;;  %v5035_v5 = vpop.f32.mrb[118].mxu0  ;;  %v5078_v6 = vpop.f32.mrb[118].mxu1  ;;  %v8313_v53 = vld [vmem:[%s10387_s26 + $0x688] sm:$0xff]   ;;  %v8318_v61 = vld [vmem:[%s10387_s26 + $0x658] sm:$0xff]   ;;  %v8323_v48 = vld [vmem:[%s10387_s26 + $0x6e0] sm:$0xff]  }
0x1eaa   :  { %v5036_v8 = vadd.f32 %v5035_v5, %v4547_v33  ;;  %v5079_v11 = vadd.f32 %v5078_v6, %v4555_v25  ;;  %v5037_v12 = vpop.f32.mrb[119].mxu0  ;;  %v5080_v14 = vpop.f32.mrb[119].mxu1  ;;  %v5095_v2 = vmax.f32 %v5032_v51, 0.0  ;;  %v5097_v42 = vmax.f32 %v5075_v45, 0.0  ;;  %v8302_v25 = vld [vmem:[%s10387_s26 + $0x578] sm:$0xff]   ;;  %v8324_v26 = vld [vmem:[%s10387_s26 + $0x620] sm:$0xff]  }
0x1eab   :  { %v5038_v15 = vadd.f32 %v5037_v12, %v4551_v7  ;;  %v5081_v16 = vadd.f32 %v5080_v14, %v4559_v27  ;;  %7699 = vmatpush3.bf16.msra.mxu0 %v8292_v30  ;;  %7721 = vmatpush3.bf16.msra.mxu1 %v8293_v44  ;;  %v5096_v21 = vmax.f32 %v5034_v59, 0.0  ;;  %v5098_v22 = vmax.f32 %v5077_v56, 0.0  ;;  %v8303_v7 = vld [vmem:[%s10387_s26 + $0x5f8] sm:$0xff]   ;;  %v8308_v27 = vld [vmem:[%s10387_s26 + $0x600] sm:$0xff]   ;;  %v8326_v44 = vld [vmem:[%s10387_s26 + $0x668] sm:$0xff]  }
0x1eac   :  { %v5111_v0 = vmax.f32 %v5036_v8, 0.0  ;;  %v5113_v9 = vmax.f32 %v5079_v11, 0.0  ;;  %7700 = vmatprep.subr.bf16.mxu0 %v8294_v4  ;;  %7722 = vmatprep.subr.bf16.mxu1 %v8295_v10  ;;  %v8319_v20 = vld [vmem:[%s10387_s26 + $0x6d8] sm:$0xff]   ;;  %v8325_v30 = vld [vmem:[%s10387_s26 + $0x6a0] sm:$0xff]   ;;  %v8327_v51 = vld [vmem:[%s10387_s26 + $0x6e8] sm:$0xff]  }
0x1ead   :  { %v5112_v23 = vmax.f32 %v5038_v15, 0.0  ;;  %v5114_v43 = vmax.f32 %v5081_v16, 0.0  ;;  %v8320_v38 = vld [vmem:[%s10387_s26 + $0x618] sm:$0xff]   ;;  %v8328_v45 = vld [vmem:[%s10387_s26 + $0x628] sm:$0xff]   ;;  %v8330_v57 = vld [vmem:[%s10387_s26 + $0x670] sm:$0xff]  }
0x1eae   :  { %v10072_v32 = vpack.c.bf16 %v5111_v0, %v5095_v2  ;;  %v10074_v33 = vpack.c.bf16 %v5113_v9, %v5097_v42  ;;  %v8329_v55 = vld [vmem:[%s10387_s26 + $0x6a8] sm:$0xff]   ;;  %v8331_v4 = vld [vmem:[%s10387_s26 + $0x6f0] sm:$0xff]   ;;  %v8334_v56 = vld [vmem:[%s10387_s26 + $0x678] sm:$0xff]  }
0x1eaf   :  { %v10076_v29 = vpack.c.bf16 %v5112_v23, %v5096_v21  ;;  %v10078_v34 = vpack.c.bf16 %v5114_v43, %v5098_v22  ;;  %7701 = vmatpush3.bf16.msra.mxu0 %v8296_v41  ;;  %7723 = vmatpush3.bf16.msra.mxu1 %v8297_v17  ;;  %v8332_v10 = vld [vmem:[%s10387_s26 + $0x630] sm:$0xff]   ;;  %v8335_v5 = vld [vmem:[%s10387_s26 + $0x6f8] sm:$0xff]   ;;  %v8338_v11 = vld [vmem:[%s10387_s26 + $0x740] sm:$0xff]  }
0x1eb0   :  { %7702 = vmatprep.subr.bf16.mxu0 %v8298_v18  ;;  %7724 = vmatprep.subr.bf16.mxu1 %v8299_v19  ;;  %v8333_v59 = vld [vmem:[%s10387_s26 + $0x6b0] sm:$0xff]   ;;  %v8336_v6 = vld [vmem:[%s10387_s26 + $0x638] sm:$0xff]   ;;  %v8339_v12 = vld [vmem:[%s10387_s26 + $0x7c0] sm:$0xff]  }
0x1eb1   :  { %v8337_v8 = vld [vmem:[%s10387_s26 + $0x6b8] sm:$0xff]   ;;  %v8340_v14 = vld [vmem:[%s10387_s26 + $0x700] sm:$0xff]   ;;  %v8342_v16 = vld [vmem:[%s10387_s26 + $0x748] sm:$0xff]  }
0x1eb2   :  { %v8341_v15 = vld [vmem:[%s10387_s26 + $0x780] sm:$0xff]   ;;  %v8343_v41 = vld [vmem:[%s10387_s26 + $0x7c8] sm:$0xff]   ;;  %v8348_v42 = vld [vmem:[%s10387_s26 + $0x710] sm:$0xff]  }
0x1eb3   :  { %7703 = vmatpush3.bf16.msra.mxu0 %v8300_v35  ;;  %7725 = vmatpush3.bf16.msra.mxu1 %v8301_v36  ;;  %v8344_v17 = vld [vmem:[%s10387_s26 + $0x708] sm:$0xff]   ;;  %v8349_v0 = vld [vmem:[%s10387_s26 + $0x790] sm:$0xff]   ;;  %v8350_v9 = vld [vmem:[%s10387_s26 + $0x758] sm:$0xff]  }
0x1eb4   :  { %7704 = vmatprep.subr.bf16.mxu0 %v8302_v25  ;;  %7726 = vmatprep.subr.bf16.mxu1 %v8303_v7  ;;  %v8345_v2 = vld [vmem:[%s10387_s26 + $0x788] sm:$0xff]   ;;  %v8351_v18 = vld [vmem:[%s10387_s26 + $0x7d8] sm:$0xff]   ;;  %v8354_v22 = vld [vmem:[%s10387_s26 + $0x760] sm:$0xff]  }
0x1eb5   :  { %v8352_v19 = vld [vmem:[%s10387_s26 + $0x718] sm:$0xff]   ;;  %v8355_v23 = vld [vmem:[%s10387_s26 + $0x7e0] sm:$0xff]   ;;  %v8359_v35 = vld [vmem:[%s10387_s26 + $0x7e8] sm:$0xff]  }
0x1eb6   :  { %v8353_v21 = vld [vmem:[%s10387_s26 + $0x798] sm:$0xff]   ;;  %v8356_v43 = vld [vmem:[%s10387_s26 + $0x720] sm:$0xff]   ;;  %v8360_v36 = vld [vmem:[%s10387_s26 + $0x728] sm:$0xff]  }
0x1eb7   :  { %7705 = vmatpush3.bf16.msra.mxu0 %v8304_v62  ;;  %7727 = vmatpush3.bf16.msra.mxu1 %v8305_v60  ;;  %v8361_v25 = vld [vmem:[%s10387_s26 + $0x7a8] sm:$0xff]   ;;  %v8362_v7 = vld [vmem:[%s10387_s26 + $0x770] sm:$0xff]  }
0x1eb8   :  { %7734 = vmatprep.subr.bf16.mxu0 %v8306_v63  ;;  %7756 = vmatprep.subr.bf16.mxu1 %v8307_v31  ;;  %v8363_v62 = vld [vmem:[%s10387_s26 + $0x7f0] sm:$0xff]   ;;  %v8366_v31 = vld [vmem:[%s10387_s26 + $0x778] sm:$0xff]  }
0x1eb9   :  { %v8364_v60 = vld [vmem:[%s10387_s26 + $0x730] sm:$0xff]  }
0x1eba   :  { %6279 = vmatmul.mubr.bf16.vlgmr.msra.gmra.mrb[124].mxu0 %v10004_v13  ;;  %6320 = vmatmul.mubr.bf16.vlgmr.msra.gmra.mrb[124].mxu1 %v10006_v47  ;;  %v8314_v13 = vld [vmem:[%s10387_s26 + $0x650] sm:$0xff]  }
0x1ebb   :  { %7735 = vmatpush3.bf16.msra.mxu0 %v8308_v27  ;;  %6360 = vmatprep.mubr.bf16.mxu0 %v10044_v24  ;;  %v8315_v47 = vld [vmem:[%s10387_s26 + $0x6d0] sm:$0xff]   ;;  %v8321_v24 = vld [vmem:[%s10387_s26 + $0x698] sm:$0xff]  }
0x1ebc   :  { %7757 = vmatpush3.bf16.msra.mxu1 %v8309_v52  ;;  %6401 = vmatprep.mubr.bf16.mxu1 %v10046_v46  ;;  %v8322_v46 = vld [vmem:[%s10387_s26 + $0x660] sm:$0xff]   ;;  %v8365_v63 = vld [vmem:[%s10387_s26 + $0x7b0] sm:$0xff]   ;;  %v8367_v27 = vld [vmem:[%s10387_s26 + $0x7f8] sm:$0xff]  }
0x1ebd   :  { %7736 = vmatprep.subr.bf16.mxu0 %v8310_v50  ;;  %7758 = vmatprep.subr.bf16.mxu1 %v8311_v58  ;;  %v8368_v52 = vld [vmem:[%s10387_s26 + $0x738] sm:$0xff]  }
0x1ebe   :  { %v8369_v50 = vld [vmem:[%s10387_s26 + $0x7b8] sm:$0xff]  }
0x1ebf   :  { %7737 = vmatpush3.bf16.msra.mxu0 %v8312_v3 }
0x1ec0   :  { %7759 = vmatpush3.bf16.msra.mxu1 %v8313_v53  ;;  %7738 = vmatprep.subr.bf16.mxu0 %v8314_v13  ;;  %v7257_v53 = vld [vmem:[%s10389_s24 + $0x1] ss:$0 sm:$0xff] }
0x1ec1   :  { %7760 = vmatprep.subr.bf16.mxu1 %v8315_v47 }
0x1ec3   :  { %7739 = vmatpush3.bf16.msra.mxu0 %v8316_v37 }
0x1ec4   :  { %7761 = vmatpush3.bf16.msra.mxu1 %v8317_v40  ;;  %7740 = vmatprep.subr.bf16.mxu0 %v8318_v61 }
0x1ec5   :  { %7762 = vmatprep.subr.bf16.mxu1 %v8319_v20 }
0x1ec7   :  { %7741 = vmatpush3.bf16.msra.mxu0 %v8320_v38 }
0x1ec8   :  { %7763 = vmatpush3.bf16.msra.mxu1 %v8321_v24  ;;  %7742 = vmatprep.subr.bf16.mxu0 %v8322_v46 }
0x1ec9   :  { %7764 = vmatprep.subr.bf16.mxu1 %v8323_v48 }
0x1ecb   :  { %7743 = vmatpush3.bf16.msra.mxu0 %v8324_v26 }
0x1ecc   :  { %7765 = vmatpush3.bf16.msra.mxu1 %v8325_v30  ;;  %7744 = vmatprep.subr.bf16.mxu0 %v8326_v44 }
0x1ecd   :  { %7766 = vmatprep.subr.bf16.mxu1 %v8327_v51 }
0x1ecf   :  { %7745 = vmatpush3.bf16.msra.mxu0 %v8328_v45 }
0x1ed0   :  { %7767 = vmatpush3.bf16.msra.mxu1 %v8329_v55  ;;  %7746 = vmatprep.subr.bf16.mxu0 %v8330_v57 }
0x1ed1   :  { %7768 = vmatprep.subr.bf16.mxu1 %v8331_v4 }
0x1ed3   :  { %7747 = vmatpush3.bf16.msra.mxu0 %v8332_v10 }
0x1ed4   :  { %7769 = vmatpush3.bf16.msra.mxu1 %v8333_v59  ;;  %7748 = vmatprep.subr.bf16.mxu0 %v8334_v56 }
0x1ed5   :  { %7770 = vmatprep.subr.bf16.mxu1 %v8335_v5 }
0x1ed7   :  { %7749 = vmatpush3.bf16.msra.mxu0 %v8336_v6 }
0x1ed8   :  { %7771 = vmatpush3.bf16.msra.mxu1 %v8337_v8  ;;  %7778 = vmatprep.subr.bf16.mxu0 %v8338_v11 }
0x1ed9   :  { %7800 = vmatprep.subr.bf16.mxu1 %v8339_v12 }
0x1eda   :  { %6361 = vmatmul.mubr.bf16.vlgmr.msra.gmra.mrb[128].mxu0 %v10040_v49  ;;  %v8346_v49 = vld [vmem:[%s10387_s26 + $0x750] sm:$0xff]  }
0x1edb   :  { %6402 = vmatmul.mubr.bf16.vlgmr.msra.gmra.mrb[128].mxu1 %v10042_v54  ;;  %7779 = vmatpush3.bf16.msra.mxu0 %v8340_v14  ;;  %v8347_v54 = vld [vmem:[%s10387_s26 + $0x7d0] sm:$0xff]  }
0x1edc   :  { %6442 = vmatprep.mubr.bf16.mxu0 %v10076_v29  ;;  %7801 = vmatpush3.bf16.msra.mxu1 %v8341_v15  ;;  %v8357_v29 = vld [vmem:[%s10387_s26 + $0x7a0] sm:$0xff]  }
0x1edd   :  { %6483 = vmatprep.mubr.bf16.mxu1 %v10078_v34  ;;  %7780 = vmatprep.subr.bf16.mxu0 %v8342_v16  ;;  %v8358_v34 = vld [vmem:[%s10387_s26 + $0x768] sm:$0xff]  }
0x1ede   :  { %7802 = vmatprep.subr.bf16.mxu1 %v8343_v41 }
0x1edf   :  { %7781 = vmatpush3.bf16.msra.mxu0 %v8344_v17 }
0x1ee0   :  { %7803 = vmatpush3.bf16.msra.mxu1 %v8345_v2  ;;  %7782 = vmatprep.subr.bf16.mxu0 %v8346_v49 }
0x1ee1   :  { %7804 = vmatprep.subr.bf16.mxu1 %v8347_v54 }
0x1ee3   :  { %7783 = vmatpush3.bf16.msra.mxu0 %v8348_v42 }
0x1ee4   :  { %7805 = vmatpush3.bf16.msra.mxu1 %v8349_v0  ;;  %7784 = vmatprep.subr.bf16.mxu0 %v8350_v9 }
0x1ee5   :  { %7806 = vmatprep.subr.bf16.mxu1 %v8351_v18 }
0x1ee7   :  { %7785 = vmatpush3.bf16.msra.mxu0 %v8352_v19 }
0x1ee8   :  { %7807 = vmatpush3.bf16.msra.mxu1 %v8353_v21  ;;  %7786 = vmatprep.subr.bf16.mxu0 %v8354_v22 }
0x1ee9   :  { %7808 = vmatprep.subr.bf16.mxu1 %v8355_v23 }
0x1eeb   :  { %7787 = vmatpush3.bf16.msra.mxu0 %v8356_v43 }
0x1eec   :  { %7809 = vmatpush3.bf16.msra.mxu1 %v8357_v29  ;;  %7788 = vmatprep.subr.bf16.mxu0 %v8358_v34 }
0x1eed   :  { %7810 = vmatprep.subr.bf16.mxu1 %v8359_v35 }
0x1eef   :  { %7789 = vmatpush3.bf16.msra.mxu0 %v8360_v36 }
0x1ef0   :  { %7811 = vmatpush3.bf16.msra.mxu1 %v8361_v25  ;;  %7790 = vmatprep.subr.bf16.mxu0 %v8362_v7 }
0x1ef1   :  { %7812 = vmatprep.subr.bf16.mxu1 %v8363_v62 }
0x1ef3   :  { %7791 = vmatpush3.bf16.msra.mxu0 %v8364_v60 }
0x1ef4   :  { %7813 = vmatpush3.bf16.msra.mxu1 %v8365_v63  ;;  %7792 = vmatprep.subr.bf16.mxu0 %v8366_v31 }
0x1ef5   :  { %7814 = vmatprep.subr.bf16.mxu1 %v8367_v27 }
0x1ef7   :  { %7793 = vmatpush3.bf16.msra.mxu0 %v8368_v52 }
0x1ef8   :  { %7815 = vmatpush3.bf16.msra.mxu1 %v8369_v50  ;;  %8049 = vmatprep.subr.bf16.mxu0 %v8495_v1 }
0x1efa   :  { %6443 = vmatmul.mubr.bf16.vlgmr.msra.gmra.mrb[132].mxu0 %v10072_v32 }
0x1efb   :  { %6484 = vmatmul.mubr.bf16.vlgmr.msra.gmra.mrb[132].mxu1 %v10074_v33  ;;  %8053 = vmatprep.mubr.msk.bf16.mxu0 %vm8496_vm0, %v8495_v1 }
0x1f6d   :  { %v7662_v58 = vpop.f32.mrb[120].mxu0  ;;  %v7684_v3 = vpop.f32.mrb[120].mxu1 }
0x1f6e   :  { %v7663_v13 = vpop.f32.mrb[121].mxu0  ;;  %v7685_v47 = vpop.f32.mrb[121].mxu1 }
0x1f6f   :  { %v7664_v37 = vadd.f32 %v7663_v13, %v7662_v58  ;;  %v7686_v40 = vadd.f32 %v7685_v47, %v7684_v3  ;;  %v7665_v61 = vpop.f32.mrb[122].mxu0  ;;  %v7687_v20 = vpop.f32.mrb[122].mxu1 }
0x1f70   :  { %v7666_v38 = vpop.f32.mrb[123].mxu0  ;;  %v7688_v24 = vpop.f32.mrb[123].mxu1 }
0x1f71   :  { %v6199_v32 = vadd.f32 %v7664_v37, %v7257_v53  ;;  %v7667_v46 = vadd.f32 %v7666_v38, %v7665_v61  ;;  %v7689_v33 = vadd.f32 %v7688_v24, %v7687_v20 }
0x1f73   :  { %v6240_v48 = vadd.f32 %v7686_v40, %v6199_v32  ;;  %v6202_v26 = vadd.f32 %v7667_v46, %v7257_v53 }
0x1f75   :  { %v6243_v30 = vadd.f32 %v7689_v33, %v6202_v26 }
0x1f8d   :  { %v7706_v44 = vpop.f32.mrb[124].mxu0  ;;  %v7728_v51 = vpop.f32.mrb[124].mxu1 }
0x1f8e   :  { %v7707_v45 = vpop.f32.mrb[125].mxu0  ;;  %v7729_v55 = vpop.f32.mrb[125].mxu1 }
0x1f8f   :  { %v7708_v57 = vadd.f32 %v7707_v45, %v7706_v44  ;;  %v7730_v4 = vadd.f32 %v7729_v55, %v7728_v51  ;;  %v7709_v10 = vpop.f32.mrb[126].mxu0  ;;  %v7731_v59 = vpop.f32.mrb[126].mxu1  ;;  %v8371_v44 = vld [vmem:[%s10394_s19 + $0x8] sm:$0xff]  }
0x1f90   :  { %v7710_v56 = vpop.f32.mrb[127].mxu0  ;;  %v7732_v5 = vpop.f32.mrb[127].mxu1 }
0x1f91   :  { %v6281_v6 = vadd.f32 %v7708_v57, %v6240_v48  ;;  %v7711_v8 = vadd.f32 %v7710_v56, %v7709_v10  ;;  %v7733_v11 = vadd.f32 %v7732_v5, %v7731_v59  ;;  %v7387_v56 = vld [vmem:[%s10391_s22 + $0x1] ss:$0 sm:$0xff] }
0x1f93   :  { %v6322_v12 = vadd.f32 %v7730_v4, %v6281_v6  ;;  %v6284_v14 = vadd.f32 %v7711_v8, %v6243_v30 }
0x1f95   :  { %v6325_v15 = vadd.f32 %v7733_v11, %v6284_v14 }
0x1fad   :  { %v7750_v16 = vpop.f32.mrb[128].mxu0 }
0x1fae   :  { %v7772_v41 = vpop.f32.mrb[128].mxu1  ;;  %v7751_v17 = vpop.f32.mrb[129].mxu0 }
0x1faf   :  { %v7752_v2 = vadd.f32 %v7751_v17, %v7750_v16  ;;  %v7773_v49 = vpop.f32.mrb[129].mxu1  ;;  %v7753_v54 = vpop.f32.mrb[130].mxu0 }
0x1fb0   :  { %v7774_v42 = vadd.f32 %v7773_v49, %v7772_v41  ;;  %v7775_v0 = vpop.f32.mrb[130].mxu1  ;;  %v7754_v9 = vpop.f32.mrb[131].mxu0 }
0x1fb1   :  { %v6363_v18 = vadd.f32 %v7752_v2, %v6322_v12  ;;  %v7755_v19 = vadd.f32 %v7754_v9, %v7753_v54  ;;  %v7776_v21 = vpop.f32.mrb[131].mxu1 }
0x1fb2   :  { %v7777_v22 = vadd.f32 %v7776_v21, %v7775_v0 }
0x1fb3   :  { %v6404_v23 = vadd.f32 %v7774_v42, %v6363_v18  ;;  %v6366_v43 = vadd.f32 %v7755_v19, %v6325_v15 }
0x1fb5   :  { %v6407_v29 = vadd.f32 %v7777_v22, %v6366_v43 }
0x1fcd   :  { %v7794_v34 = vpop.f32.mrb[132].mxu0 }
0x1fce   :  { %v7816_v35 = vpop.f32.mrb[132].mxu1  ;;  %v7795_v36 = vpop.f32.mrb[133].mxu0 }
0x1fcf   :  { %v7796_v25 = vadd.f32 %v7795_v36, %v7794_v34  ;;  %v7817_v7 = vpop.f32.mrb[133].mxu1  ;;  %v7797_v62 = vpop.f32.mrb[134].mxu0 }
0x1fd0   :  { %v7818_v60 = vadd.f32 %v7817_v7, %v7816_v35  ;;  %v7819_v63 = vpop.f32.mrb[134].mxu1  ;;  %v7798_v31 = vpop.f32.mrb[135].mxu0 }
0x1fd1   :  { %v6445_v27 = vadd.f32 %v7796_v25, %v6404_v23  ;;  %v7799_v52 = vadd.f32 %v7798_v31, %v7797_v62  ;;  %v7820_v50 = vpop.f32.mrb[135].mxu1 }
0x1fd2   :  { %v7821_v58 = vadd.f32 %v7820_v50, %v7819_v63 }
0x1fd3   :  { %v6486_v3 = vadd.f32 %v7818_v60, %v6445_v27  ;;  %v6448_v53 = vadd.f32 %v7799_v52, %v6407_v29  ;;  %v7390_v60 = vld [vmem:[%s10395_s1] ss:$0 sm:$0xff] }
0x1fd5   :  { %v6489_v13 = vadd.f32 %v7821_v58, %v6448_v53  ;;  %v6492_v47 = vadd.f32 %v6486_v3, %v9776_v39 }
0x1fd7   :  { %v6494_v37 = vsel %vm214_vm8, %v6492_v47, 0.0  ;;  %v6493_v40 = vadd.f32 %v6489_v13, %v9778_v28  ;;  %v8370_v28 = vld [vmem:[%s10394_s19] sm:$0xff]  }
0x1fd8   :  { %6495 = vadd.xlane.f32.xlu1 %v6494_v37  ;;  %8050 = vmatpush3.bf16.msra.mxu0 %v8370_v28 }
0x1fd9   :  { %v6497_v61 = vsel %vm214_vm8, %v6493_v40, 0.0  ;;  %8051 = vmatprep.subr.bf16.mxu0 %v8495_v1  ;;  %v7389_v1 = vld [vmem:[%s10392_s2 + $0x1] ss:$0 sm:$0xff] }
0x1fda   :  { %6498 = vadd.xlane.f32.xlu0 %v6497_v61 }
0x1fdc   :  { %8052 = vmatpush3.bf16.msra.mxu0 %v8371_v44 }
0x2065   :  { %v6496_v20 = vpop.xlane.xlu1 %6495 }
0x2066   :  { %v6500_v38 = vmul.f32 0.03125, %v6496_v20 }
0x2067   :  { %v6499_v24 = vpop.xlane.xlu0 %6498 }
0x2068   :  { %v6502_v32 = vsub.f32 %v6492_v47, %v6500_v38  ;;  %v6501_v46 = vmul.f32 0.03125, %v6499_v24 }
0x206a   :  { %v6503_v33 = vsub.f32 %v6493_v40, %v6501_v46  ;;  %v6504_v48 = vmul.f32 %v6502_v32, %v6502_v32 }
0x206c   :  { %v6506_v26 = vsel %vm214_vm8, %v6504_v48, 0.0  ;;  %v6505_v30 = vmul.f32 %v6503_v33, %v6503_v33 }
0x206d   :  { %6507 = vadd.xlane.f32.xlu1 %v6506_v26 }
0x206e   :  { %v6509_v39 = vsel %vm214_vm8, %v6505_v30, 0.0 }
0x206f   :  { %6510 = vadd.xlane.f32.xlu0 %v6509_v39 }
0x20fa   :  { %v6508_v51 = vpop.xlane.xlu1 %6507 }
0x20fb   :  { %v6512_v45 = vmul.f32 0.03125, %v6508_v51 }
0x20fc   :  { %v6511_v55 = vpop.xlane.xlu0 %6510 }
0x20fd   :  { %v6514_v57 = vadd.f32 1e-05, %v6512_v45  ;;  %v6513_v4 = vmul.f32 0.03125, %v6511_v55 }
0x20ff   :  { %8448 = vrsqrt.f32 %v6514_v57  ;;  %v6515_v10 = vadd.f32 1e-05, %v6513_v4 }
0x2101   :  { %8450 = vrsqrt.f32 %v6515_v10 }
0x2109   :  { %v8449_v59 = vpop.eup %8448 }
0x210a   :  { %v6518_v5 = vmul.f32 %v8449_v59, %v6502_v32 }
0x210b   :  { %v8451_v6 = vpop.eup %8450 }
0x210c   :  { %v6528_v8 = vmul.f32 %v7387_v56, %v6518_v5  ;;  %v6519_v11 = vmul.f32 %v8451_v6, %v6503_v33 }
0x210e   :  { %v6538_v12 = vadd.f32 %v7389_v1, %v6528_v8  ;;  %v6529_v14 = vmul.f32 %v7387_v56, %v6519_v11 }
0x2110   :  { %v6540_v15 = vsel %vm214_vm8, %v6538_v12, 0.0  ;;  %v6539_v16 = vadd.f32 %v7389_v1, %v6529_v14 }
0x2111   :  { %v6541_v41 = vrot.slane %v6540_v15, 4 }
0x2112   :  { %v6547_v17 = vsel %vm214_vm8, %v6539_v16, 0.0 }
0x2113   :  { %v6542_v2 = vadd.f32 %v6541_v41, %v6540_v15  ;;  %v6548_v49 = vrot.slane %v6547_v17, 4 }
0x2115   :  { %v6543_v54 = vrot.slane %v6542_v2, 2  ;;  %v6549_v42 = vadd.f32 %v6548_v49, %v6547_v17 }
0x2117   :  { %v6550_v0 = vrot.slane %v6549_v42, 2  ;;  %v6544_v9 = vadd.f32 %v6543_v54, %v6542_v2 }
0x2119   :  { %v6545_v18 = vrot.slane %v6544_v9, 1  ;;  %v6551_v19 = vadd.f32 %v6550_v0, %v6549_v42 }
0x211b   :  { %v6546_v21 = vadd.f32 %v6545_v18, %v6544_v9  ;;  %v6552_v22 = vrot.slane %v6551_v19, 1 }
0x211d   :  { %v6553_v23 = vadd.f32 %v6552_v22, %v6551_v19  ;;  %v6555_v43 = vmul.f32 0.125, %v6546_v21 }
0x211f   :  { %v6556_v29 = vmul.f32 0.125, %v6553_v23  ;;  %v6557_v34 = vpack.c.bf16 %v6555_v43, %v6555_v43 }
0x2121   :  { %v6558_v35 = vpack.c.bf16 %v6556_v29, %v6556_v29  ;;  %v6572_v36 = vunpack.c.l.b16 %v6557_v34 }
0x2123   :  { %v6573_v25 = vunpack.c.l.b16 %v6558_v35 }
0x2125   :  { %v6575_v7 = vsel %vm6574_vm12, %v6573_v25, %v6572_v36 }
0x2126   :  { %v6576_v62 = vpack.c.b16 %v6575_v7, %v6575_v7 }
0x2128   :  { %8054 = vmatmul.mubr.msk.bf16.vlgmr.msra.gmra.mrb[136].mxu0 %vm214_vm8, %v6576_v62 }
0x21fb   :  { %v6626_v63 = vpop.f32.mrb[136].mxu0 }
0x21fc   :  { %v6627_v31 = vadd.f32 %v7390_v60, %v6626_v63  ;;  %v8055_v27 = vpop.f32.mrb[137].mxu0 }
0x21fd   :  { %v6629_v52 = vpop.f32.mrb[138].mxu0 }
0x21fe   :  { %v8056_v50 = vpop.f32.mrb[139].mxu0  ;;  %v6633_v58 = vsel %vm6632_vm13, %v6627_v31, -inf }
0x21ff   :  { %6634 = vmax.xlane.f32.xlu1 %v6633_v58 }
0x228c   :  { %v6635_v3 = vpop.xlane.xlu1 %6634 }
0x228d   :  { %v6636_v53 = vsub.f32 %v6627_v31, %v6635_v3 }
0x228f   :  { %v6637_v13 = vmul.f32 1.442695, %v6636_v53 }
0x2291   :  { %8452 = vpow2.f32 %v6637_v13 }
0x229b   :  { %v8453_v47 = vpop.eup %8452 }
0x229c   :  { %v6639_v37 = vsel %vm6632_vm13, %v8453_v47, 0.0 }
0x229d   :  { %6640 = vadd.xlane.f32.xlu0 %v6639_v37 }
0x232a   :  { %v6641_v40 = vpop.xlane.xlu0 %6640 }
0x232b   :  { %8454 = vrcp.f32 %v6641_v40 }
0x2335   :  { %v8455_v61 = vpop.eup %8454 }
0x2336   :  { %v6643_v20 = vmul.f32 %v8455_v61, %v8453_v47 }
0x2338   :  { %6644 = vst.msk [vmem:[#allocation5] sm:$0x3] %vm6632_vm13, %v6643_v20 }
0x2339   :  { %8479 = shalt.err (!%p8476_p9)
}
0x233a   :  { %s10396_s28 = sld [smem:[#allocation18_spill]] }
0x2340   :  { %s8480_s17 = scalar_lea.hbm %s10396_s28, 32 }
0x2341   :  { %p8481_p10 = scmp.ne.s32.totalorder %s10396_s28, %s8480_s17  ;;  %p8484_p11 = scmp.lt.u32.totalorder %s8480_s17, %s10396_s28 }
0x2343   :  { %p8486_p12 = pnand %p8484_p11, %p8481_p10 }
0x2345   :  { %8489 = shalt.err (!%p8486_p12)
}
0x2346   :  { %6654 = dma.vmem_to_hbm [thread:$0]  %s6652_s16, 32, %s10396_s28, [#allocation3]  }
0x2347   :  { %8492 = dma.done.wait [#allocation3], 32  }
0x2348   :  { %8493 = vsyncadd [#allocation3], 4294967264 }
0x2349   :  { %6658 = vsyncpa [#allocation3], 1 }
0x234a   :  { %6659 = vsyncpa [#allocation4], 1 }

</bundles_post_ra>
